<compile_context>
chip_gen: v6e
topology: v6e:2x2x1
jax: 0.10.0
libtpu: 0.0.40
codegen_flags: <defaults>
</compile_context>

<pallas_src>
import functools

import jax
import jax.numpy as jnp
from jax.experimental import pallas as pl
from jax.experimental.pallas import tpu as pltpu


def duel_qnet_kernel(x_ref, w1_ref, b1_ref, w2_ref, b2_ref, wo_ref, bo_ref,
                     out_ref, *, mxu_dtype):
    # shared_mlp: Linear -> ReLU -> Linear -> ReLU, then the folded dueling head.
    # f32 accumulation on the MXU; bias add / ReLU stay on the f32 VPU path.
    x = x_ref[...].astype(mxu_dtype)          # in-kernel cast: no wrapper HBM pass
    h = jnp.dot(x, w1_ref[...], preferred_element_type=jnp.float32)
    h = jnp.maximum(h + b1_ref[...], 0.0)
    h = jnp.dot(h.astype(mxu_dtype), w2_ref[...],
                preferred_element_type=jnp.float32)
    h = jnp.maximum(h + b2_ref[...], 0.0)
    q = jnp.dot(h.astype(mxu_dtype), wo_ref[...],
                preferred_element_type=jnp.float32)
    out_ref[...] = (q + bo_ref[...]).astype(out_ref.dtype)


def _choose_pack(state_dim, h0, h1, action_dim,
                 weight_budget_bytes=8 * 1024 * 1024, max_pack=128):
    """Batch rows packed per vreg row.

    Grow `pack` (powers of two) until both the packed input (pack*state_dim) and
    the packed output (pack*action_dim) are multiples of 128 lanes (lane-dense MXU
    operands, unmasked output stores), as long as the block-diagonal weights stay
    within a small VMEM budget.  For large hidden dims this degenerates to pack=1
    (plain dense matmuls, which are already lane-dense there)."""
    def wbytes(p):
        return 4 * p * p * (state_dim * h0 + h0 * h1 + h1 * action_dim)

    pack = 1
    while (pack < max_pack
           and wbytes(2 * pack) <= weight_budget_bytes
           and ((pack * state_dim) % 128 or (pack * action_dim) % 128)):
        pack *= 2
    return pack


def duel_qnet_forward(x, params, *, block_b=8192, mxu_dtype=jnp.float32,
                      pack=None):
    """Dueling Q-network forward pass.

    x: (B, state_dim) float32. params: as returned by init_duel_qnet_params.
    block_b: batch tile size in ORIGINAL rows (sweep upward at very large B).
    mxu_dtype: jnp.bfloat16 halves MXU pushes / weight bytes on all generations
      (v5e's MXU is bf16-native too); elementwise + accumulation stay f32.
    pack: rows packed per vreg row (auto-chosen if None).
    """
    w1, b1, w2, b2, wa, ba, wv, bv = params
    B, state_dim = x.shape
    h0 = w1.shape[1]
    h1 = w2.shape[1]
    action_dim = wa.shape[1]

    # --- fold dueling combine (v + a - mean(a)) into a single head ------------
    w_out = wa + wv - jnp.mean(wa, axis=1, keepdims=True)      # (h1, A)
    b_out = ba + bv - jnp.mean(ba, axis=1, keepdims=True)      # (1, A)

    # --- pack `pack` batch rows per vreg row; block-diagonal weights ----------
    if pack is None:
        pack = _choose_pack(state_dim, h0, h1, action_dim)
    eye = jnp.eye(pack, dtype=jnp.float32)
    w1p = jnp.kron(eye, w1)              # (pack*s,  pack*h0)
    w2p = jnp.kron(eye, w2)              # (pack*h0, pack*h1)
    wop = jnp.kron(eye, w_out)           # (pack*h1, pack*A)
    b1p = jnp.tile(b1, (1, pack))        # (1, pack*h0)
    b2p = jnp.tile(b2, (1, pack))        # (1, pack*h1)
    bop = jnp.tile(b_out, (1, pack))     # (1, pack*A)

    if mxu_dtype != jnp.float32:
        # Only the tiny, resident weights are cast here; x is cast inside the
        # kernel so we never add a full HBM read+write pass over x.
        w1p = w1p.astype(mxu_dtype)
        w2p = w2p.astype(mxu_dtype)
        wop = wop.astype(mxu_dtype)

    # --- pad only up to a multiple of `pack`, then free row-major reshape -----
    padded_b = pl.cdiv(B, pack) * pack
    if padded_b != B:
        # TODO(synk): a remainder-only second call would avoid this full pass over x.
        x = jnp.pad(x, ((0, padded_b - B), (0, 0)))
    bp = padded_b // pack
    xp = x.reshape(bp, pack * state_dim)

    # --- batch tile (in packed rows): big tiles, >=2 grid steps, 8-aligned -----
    max_tbp = max(1, block_b // pack)
    if bp <= 8:
        tbp = bp                                   # single full block
    else:
        tbp = min(max_tbp, pl.cdiv(bp, 2))         # keep >=2 grid steps (v7x 2 TCs)
        tbp = max(8, (tbp // 8) * 8)               # sublane-aligned
    grid = (pl.cdiv(bp, tbp),)

    def batch_tiled(i):          # x / out: walk the (packed) batch dimension
        return (i, 0)

    def resident(i):             # weights / biases: constant block index ->
        return (0, 0)            # DMA'd once, VMEM-resident across grid steps

    in_specs = [
        pl.BlockSpec((tbp, pack * state_dim), batch_tiled),
        pl.BlockSpec(w1p.shape, resident),
        pl.BlockSpec(b1p.shape, resident),
        pl.BlockSpec(w2p.shape, resident),
        pl.BlockSpec(b2p.shape, resident),
        pl.BlockSpec(wop.shape, resident),
        pl.BlockSpec(bop.shape, resident),
    ]
    out_spec = pl.BlockSpec((tbp, pack * action_dim), batch_tiled)

    kernel = functools.partial(duel_qnet_kernel, mxu_dtype=mxu_dtype)
    out_packed = pl.pallas_call(
        kernel,
        out_shape=jax.ShapeDtypeStruct((bp, pack * action_dim), jnp.float32),
        grid=grid,
        in_specs=in_specs,
        out_specs=out_spec,
        compiler_params=pltpu.CompilerParams(
            # Batch tiles are independent -> shard across v7x's 2 TensorCores.
            dimension_semantics=("parallel",),
            vmem_limit_bytes=32 * 1024 * 1024),
    )(xp, w1p, b1p, w2p, b2p, wop, bop)

    # Free row-major reshape back to (padded_b, action_dim), drop padded rows.
    return out_packed.reshape(padded_b, action_dim)[:B]


def xavier_uniform(key, fan_in, fan_out, dtype=jnp.float32):
    # Matches torch.nn.init.xavier_uniform_ (gain=1): U(-a, a), a = sqrt(6/(fan_in+fan_out))
    limit = (6.0 / (fan_in + fan_out)) ** 0.5
    return jax.random.uniform(key, (fan_in, fan_out), dtype=dtype,
                              minval=-limit, maxval=limit)


def init_duel_qnet_params(key, state_dim, action_dim, n_hidden_units):
    h0, h1 = n_hidden_units
    k1, k2, k3, k4 = jax.random.split(key, 4)
    w1 = xavier_uniform(k1, state_dim, h0)
    b1 = jnp.full((1, h0), 0.01, jnp.float32)
    w2 = xavier_uniform(k2, h0, h1)
    b2 = jnp.full((1, h1), 0.01, jnp.float32)
    wa = xavier_uniform(k3, h1, action_dim)
    ba = jnp.full((1, action_dim), 0.01, jnp.float32)
    wv = xavier_uniform(k4, h1, 1)
    bv = jnp.full((1, 1), 0.01, jnp.float32)
    return (w1, b1, w2, b2, wa, ba, wv, bv)


def duel_qnet_reference(x, params):
    w1, b1, w2, b2, wa, ba, wv, bv = params
    h = jnp.maximum(x @ w1 + b1, 0.0)
    h = jnp.maximum(h @ w2 + b2, 0.0)
    a = h @ wa + ba
    v = h @ wv + bv
    return v + a - a.mean(axis=1, keepdims=True)


if __name__ == "__main__":
    state_dim = 16
    action_dim = 4
    n_hidden_units = (32, 32)

    key = jax.random.PRNGKey(0)
    kx, kp = jax.random.split(key)
    params = init_duel_qnet_params(kp, state_dim, action_dim, n_hidden_units)

    # Main check: batch large enough to exercise a multi-step batch grid
    # (pack=32 -> 32 packed rows -> 2 grid steps with the default tiling).
    batch = 1024
    x = jax.random.normal(kx, (batch, state_dim), dtype=jnp.float32)
    out = jax.block_until_ready(duel_qnet_forward(x, params))
    ref = duel_qnet_reference(x, params)
    assert out.shape == (batch, action_dim)
    assert jnp.allclose(out, ref, atol=1e-4, rtol=1e-4), "mismatch (f32)"

    # Batch not a multiple of the pack factor -> pad-to-pack path.
    x2 = jax.random.normal(jax.random.PRNGKey(1), (61, state_dim), dtype=jnp.float32)
    out2 = jax.block_until_ready(duel_qnet_forward(x2, params))
    assert out2.shape == (61, action_dim)
    assert jnp.allclose(out2, duel_qnet_reference(x2, params),
                        atol=1e-4, rtol=1e-4), "mismatch (ragged batch)"

    # Batch producing a partial last grid tile (bp=20, tbp=8 -> 3 steps, last partial).
    x3 = jax.random.normal(jax.random.PRNGKey(2), (640, state_dim), dtype=jnp.float32)
    out3 = jax.block_until_ready(duel_qnet_forward(x3, params))
    assert jnp.allclose(out3, duel_qnet_reference(x3, params),
                        atol=1e-4, rtol=1e-4), "mismatch (partial tile)"

    # bf16 MXU-input path (weights cast in wrapper, x cast in-kernel); looser tol.
    out_bf16 = jax.block_until_ready(
        duel_qnet_forward(x, params, mxu_dtype=jnp.bfloat16))
    assert jnp.allclose(out_bf16, ref, atol=5e-2, rtol=5e-2), "mismatch (bf16)"

    print("KERNEL_OK")
</pallas_src>

<mosaic_0001>
module attributes {stable_mosaic.version = 11 : i64} {
  func.func @duel_qnet_kernel(%arg0: i32, %arg1: memref<16x512xf32, #tpu.memory_space<vmem>>, %arg2: memref<512x1024xf32, #tpu.memory_space<vmem>>, %arg3: memref<1x1024xf32, #tpu.memory_space<vmem>>, %arg4: memref<1024x1024xf32, #tpu.memory_space<vmem>>, %arg5: memref<1x1024xf32, #tpu.memory_space<vmem>>, %arg6: memref<1024x128xf32, #tpu.memory_space<vmem>>, %arg7: memref<1x128xf32, #tpu.memory_space<vmem>>, %arg8: memref<16x128xf32, #tpu.memory_space<vmem>>) attributes {dimension_semantics = [#tpu.dimension_semantics<parallel>], iteration_bounds = array<i64: 2>, scalar_prefetch = 0 : i64, scratch_operands = 0 : i64, tpu.core_type = #tpu.core_type<tc>, window_params = [{transform_indices = @transform_0, window_bounds = array<i64: 16, 512>}, {pipeline_mode = #tpu.pipeline_mode<synchronous>, transform_indices = @transform_1, window_bounds = array<i64: 512, 1024>}, {pipeline_mode = #tpu.pipeline_mode<synchronous>, transform_indices = @transform_2, window_bounds = array<i64: 1, 1024>}, {pipeline_mode = #tpu.pipeline_mode<synchronous>, transform_indices = @transform_3, window_bounds = array<i64: 1024, 1024>}, {pipeline_mode = #tpu.pipeline_mode<synchronous>, transform_indices = @transform_4, window_bounds = array<i64: 1, 1024>}, {pipeline_mode = #tpu.pipeline_mode<synchronous>, transform_indices = @transform_5, window_bounds = array<i64: 1024, 128>}, {pipeline_mode = #tpu.pipeline_mode<synchronous>, transform_indices = @transform_6, window_bounds = array<i64: 1, 128>}, {transform_indices = @transform_7, window_bounds = array<i64: 16, 128>}]} {
    %c0 = arith.constant 0 : index
    %c0_0 = arith.constant 0 : index
    %0 = vector.load %arg1[%c0, %c0_0] : memref<16x512xf32, #tpu.memory_space<vmem>>, vector<16x512xf32>
    %c0_1 = arith.constant 0 : index
    %c0_2 = arith.constant 0 : index
    %1 = vector.load %arg2[%c0_1, %c0_2] : memref<512x1024xf32, #tpu.memory_space<vmem>>, vector<512x1024xf32>
    %cst = arith.constant dense<0.000000e+00> : vector<16x1024xf32>
    %2 = tpu.matmul %0, %1, %cst {dimension_numbers = #tpu.dot_dimension_numbers<[1], [0], [0], [1], [0, 0, 1, 1], [], []>} : vector<16x512xf32>, vector<512x1024xf32>, vector<16x1024xf32> -> vector<16x1024xf32>
    %c0_3 = arith.constant 0 : index
    %c0_4 = arith.constant 0 : index
    %3 = vector.load %arg3[%c0_3, %c0_4] : memref<1x1024xf32, #tpu.memory_space<vmem>>, vector<1x1024xf32>
    %4 = vector.broadcast %3 : vector<1x1024xf32> to vector<16x1024xf32>
    %5 = arith.addf %2, %4 : vector<16x1024xf32>
    %cst_5 = arith.constant 0.000000e+00 : f32
    %6 = vector.broadcast %cst_5 : f32 to vector<16x1024xf32>
    %7 = arith.maximumf %5, %6 : vector<16x1024xf32>
    %c0_6 = arith.constant 0 : index
    %c0_7 = arith.constant 0 : index
    %8 = vector.load %arg4[%c0_6, %c0_7] : memref<1024x1024xf32, #tpu.memory_space<vmem>>, vector<1024x1024xf32>
    %cst_8 = arith.constant dense<0.000000e+00> : vector<16x1024xf32>
    %9 = tpu.matmul %7, %8, %cst_8 {dimension_numbers = #tpu.dot_dimension_numbers<[1], [0], [0], [1], [0, 0, 1, 1], [], []>} : vector<16x1024xf32>, vector<1024x1024xf32>, vector<16x1024xf32> -> vector<16x1024xf32>
    %c0_9 = arith.constant 0 : index
    %c0_10 = arith.constant 0 : index
    %10 = vector.load %arg5[%c0_9, %c0_10] : memref<1x1024xf32, #tpu.memory_space<vmem>>, vector<1x1024xf32>
    %11 = vector.broadcast %10 : vector<1x1024xf32> to vector<16x1024xf32>
    %12 = arith.addf %9, %11 : vector<16x1024xf32>
    %cst_11 = arith.constant 0.000000e+00 : f32
    %13 = vector.broadcast %cst_11 : f32 to vector<16x1024xf32>
    %14 = arith.maximumf %12, %13 : vector<16x1024xf32>
    %c0_12 = arith.constant 0 : index
    %c0_13 = arith.constant 0 : index
    %15 = vector.load %arg6[%c0_12, %c0_13] : memref<1024x128xf32, #tpu.memory_space<vmem>>, vector<1024x128xf32>
    %cst_14 = arith.constant dense<0.000000e+00> : vector<16x128xf32>
    %16 = tpu.matmul %14, %15, %cst_14 {dimension_numbers = #tpu.dot_dimension_numbers<[1], [0], [0], [1], [0, 0, 1, 1], [], []>} : vector<16x1024xf32>, vector<1024x128xf32>, vector<16x128xf32> -> vector<16x128xf32>
    %c0_15 = arith.constant 0 : index
    %c0_16 = arith.constant 0 : index
    %17 = vector.load %arg7[%c0_15, %c0_16] : memref<1x128xf32, #tpu.memory_space<vmem>>, vector<1x128xf32>
    %18 = vector.broadcast %17 : vector<1x128xf32> to vector<16x128xf32>
    %19 = arith.addf %16, %18 : vector<16x128xf32>
    %c0_17 = arith.constant 0 : index
    %c0_18 = arith.constant 0 : index
    %20 = vector.load %arg8[%c0_17, %c0_18] : memref<16x128xf32, #tpu.memory_space<vmem>>, vector<16x128xf32>
    tpu.vector_store %arg8[%c0_17, %c0_18], %19 {strides = array<i32>} : memref<16x128xf32, #tpu.memory_space<vmem>>, vector<16x128xf32>,
    return
  }
  func.func @transform_0(%arg0: i32) -> (i32, i32) {
    %c0_i32 = arith.constant 0 : i32
    %c0_i32_0 = arith.constant 0 : i32
    return %arg0, %c0_i32 : i32, i32
  }
  func.func @transform_1(%arg0: i32) -> (i32, i32) {
    %c0_i32 = arith.constant 0 : i32
    %c0_i32_0 = arith.constant 0 : i32
    %c0_i32_1 = arith.constant 0 : i32
    return %c0_i32, %c0_i32_0 : i32, i32
  }
  func.func @transform_2(%arg0: i32) -> (i32, i32) {
    %c0_i32 = arith.constant 0 : i32
    %c0_i32_0 = arith.constant 0 : i32
    %c0_i32_1 = arith.constant 0 : i32
    return %c0_i32, %c0_i32_0 : i32, i32
  }
  func.func @transform_3(%arg0: i32) -> (i32, i32) {
    %c0_i32 = arith.constant 0 : i32
    %c0_i32_0 = arith.constant 0 : i32
    %c0_i32_1 = arith.constant 0 : i32
    return %c0_i32, %c0_i32_0 : i32, i32
  }
  func.func @transform_4(%arg0: i32) -> (i32, i32) {
    %c0_i32 = arith.constant 0 : i32
    %c0_i32_0 = arith.constant 0 : i32
    %c0_i32_1 = arith.constant 0 : i32
    return %c0_i32, %c0_i32_0 : i32, i32
  }
  func.func @transform_5(%arg0: i32) -> (i32, i32) {
    %c0_i32 = arith.constant 0 : i32
    %c0_i32_0 = arith.constant 0 : i32
    %c0_i32_1 = arith.constant 0 : i32
    return %c0_i32, %c0_i32_0 : i32, i32
  }
  func.func @transform_6(%arg0: i32) -> (i32, i32) {
    %c0_i32 = arith.constant 0 : i32
    %c0_i32_0 = arith.constant 0 : i32
    %c0_i32_1 = arith.constant 0 : i32
    return %c0_i32, %c0_i32_0 : i32, i32
  }
  func.func @transform_7(%arg0: i32) -> (i32, i32) {
    %c0_i32 = arith.constant 0 : i32
    %c0_i32_0 = arith.constant 0 : i32
    return %arg0, %c0_i32 : i32, i32
  }
}

</mosaic_0001>

<bundles_post_ra>
// kernel: tpu_custom_call.1
= control target key start
LH: loop header
LB: loop body
LE: loop exit
PB: predicated region body
PF: predicated region fallthrough
CT: control target
= control target key end

     0   :  { %s5635_s0 = inlined_call_operand.hbm [shape: f32[32,512], index: 0, kind: input, shape index: {}]   ;;  %s5636_s1 = inlined_call_operand.hbm [shape: f32[512,1024], index: 1, kind: input, shape index: {}]   ;;  %s5637_s2 = inlined_call_operand.hbm [shape: f32[1,1024], index: 2, kind: input, shape index: {}]   ;;  %s5638_s3 = inlined_call_operand.hbm [shape: f32[1024,1024], index: 3, kind: input, shape index: {}]   ;;  %s5639_s4 = inlined_call_operand.hbm [shape: f32[1,1024], index: 4, kind: input, shape index: {}]   ;;  %s5640_s5 = inlined_call_operand.hbm [shape: f32[1024,128], index: 5, kind: input, shape index: {}]   ;;  %s5641_s6 = inlined_call_operand.hbm [shape: f32[1,128], index: 6, kind: input, shape index: {}]   ;;  %s5642_s7 = inlined_call_operand.hbm [shape: f32[32,128], index: 7, kind: output, shape index: {}]  }
   0x1   :  { %5647 = sst [smem:[#allocation20_spill]] %s5636_s1 }
   0x2   :  { %12 = vsyncpa [#allocation3], 0 }
   0x3   :  { %14 = vsyncpa [#allocation3 + $0x1], 0 }
   0x4   :  { %15 = vsyncpa [#allocation6], 0 }
   0x5   :  { %16 = vsyncpa [#allocation9], 0 }
   0x6   :  { %17 = vsyncpa [#allocation12], 0 }
   0x7   :  { %18 = vsyncpa [#allocation4], 0 }
   0x8   :  { %20 = vsyncpa [#allocation4 + $0x1], 0  ;;  %s5096_s24 = smov 0   ;;  %s5098_s25 = smov 0  }
   0x9   :  { %s5100_s26 = smov 0   ;;  %s5102_s27 = smov 0  }
   0xa LB: > { %s5040_s28 = smov [#allocation5]   ;;  %s5117_s30 = sadd.s32 4294967295, %s5038_s27   ;;  %s5038_s27 = sphi %s5102_s27, %s5672_s27   ;;  %s5034_s26 = sphi %s5100_s26, %s5671_s26   ;;  %s5030_s25 = sphi %s5098_s25, %s5670_s25   ;;  %s5026_s24 = sphi %s5096_s24, %s5669_s24  }
   0xb   : > { %s221_s29 = sshll.u32 %s5040_s28, 4  ;;  %p4471_p0 = scmp.ge.s32.totalorder %s5038_s27, 1  ;;  %s222_s29 = int_to_ptr.vmem [resolvable:$true] %s221_s29 }
   0xc   : > { %p5643_p1 = scmp.eq.s32.totalorder %s5117_s30, 0  ;;  %p209_p2 = scmp.lt.s32.totalorder %s5038_s27, 3 }
   0xd   : > { %s5041_s9 = smov [#allocation8]   ;;  %s5042_s12 = smov [#allocation11]  }
   0xe   : > { %p5122_p3 = pnand %p4471_p0, %p209_p2  ;;  %s245_s10 = sshll.u32 %s5041_s9, 4  ;;  %s5135_s10 = int_to_ptr.vmem [resolvable:$true] %s245_s10 }
   0xf   : > { %s269_s13 = sshll.u32 %s5042_s12, 4  ;;  %s4789_s15 = scalar_lea.vmem %s222_s29, 65536  ;;  %s5137_s13 = int_to_ptr.vmem [resolvable:$true] %s269_s13 }
  0x10   : > { %s5648_s8 = scalar_select %p5122_p3, 1, 0 }
  0x11   : > { %p4681_p5 = pneg %p5122_p3  ;;  %p4790_p8 = scmp.ne.s32.totalorder %s222_s29, %s4789_s15 }
  0x12   : > { %p4797_p11 = scmp.lt.s32.totalorder %s222_s29, %s222_s29  ;;  %p4798_p12 = scmp.lt.s32.totalorder %s4789_s15, %s4789_s15 }
  0x13   : > { %p5131_p6 = pnand %p4681_p5, %p5643_p1 }
  0x14   : > { %p4799_p13 = por %p4798_p12, %p4797_p11 }
  0x15   : > { %p5141_p7 = pneg %p5131_p6 }
  0x17   : > { %p4792_p9 = pnand %p4790_p8, %p5141_p7 }
  0x19   : > { %p4793_p10 = pneg %p4792_p9 }
  0x1b   : > { %p4800_p0 = pnand %p4799_p13, %p4793_p10 }
  0x1d   : > { %4803 = shalt.err (!%p4800_p0)
}
  0x1e   : > { %s5043_s16 = smov 1024   ;;  %s5044_s17 = smov 64  }
  0x1f   : > { %s5651_s1 = sld [smem:[#allocation20_spill]]  ;;  %s4815_s20 = scalar_lea.vmem %s5135_s10, 131072 }
  0x20   : > { %p4816_p2 = scmp.ne.s32.totalorder %s5135_s10, %s4815_s20  ;;  %p4823_p9 = scmp.lt.s32.totalorder %s5135_s10, %s5135_s10 }
  0x21   : > { %p4824_p10 = scmp.lt.s32.totalorder %s4815_s20, %s4815_s20 }
  0x22   : > { %p4818_p5 = pnand %p4816_p2, %p5141_p7 }
  0x23   : > { %p4825_p11 = por %p4824_p10, %p4823_p9 }
  0x24   : > { %p4819_p8 = pneg %p4818_p5 }
  0x25   : > { %4684 = dma.hbm_to_vmem [thread:$0]  (!%p5131_p6), %s5651_s1, 65536, %s222_s29, [#allocation6], %s5043_s16, %s5043_s16, %s5044_s17  }
  0x26   : > { %p4826_p12 = pnand %p4825_p11, %p4819_p8 }
  0x28   : > { %4829 = shalt.err (!%p4826_p12)
}
  0x29   : > { %4690 = dma.hbm_to_vmem [thread:$0]  (!%p5131_p6), %s5638_s3, 131072, %s5135_s10, [#allocation9], %s5043_s16, %s5043_s16, %s5044_s17  }
  0x2a   : > { %s4841_s23 = scalar_lea.vmem %s5137_s13, 16384  ;;  %p4849_p5 = scmp.lt.s32.totalorder %s5137_s13, %s5137_s13 }
  0x2b   : > { %p4842_p13 = scmp.ne.s32.totalorder %s5137_s13, %s4841_s23  ;;  %p4850_p8 = scmp.lt.s32.totalorder %s4841_s23, %s4841_s23 }
  0x2d   : > { %p4844_p0 = pnand %p4842_p13, %p5141_p7  ;;  %p4851_p9 = por %p4850_p8, %p4849_p5 }
  0x2f   : > { %p4845_p2 = pneg %p4844_p0 }
  0x31   : > { %p4852_p10 = pnand %p4851_p9, %p4845_p2 }
  0x33   : > { %4855 = shalt.err (!%p4852_p10)
}
  0x34   : > { %s5045_s28 = smov 128   ;;  %s5046_s29 = smov 8  }
  0x35   : > { %4696 = dma.hbm_to_vmem [thread:$0]  (!%p5131_p6), %s5640_s5, 16384, %s5137_s13, [#allocation12], %s5045_s28, %s5045_s28, %s5046_s29  }
  0x36   : > { %s5047_s10 = smov [#allocation7]   ;;  %s5048_s16 = smov [#allocation10]  }
  0x37   : > { %s235_s15 = sshll.u32 %s5047_s10, 4  ;;  %s259_s17 = sshll.u32 %s5048_s16, 4  ;;  %s236_s15 = int_to_ptr.vmem [resolvable:$true] %s235_s15  ;;  %s260_s17 = int_to_ptr.vmem [resolvable:$true] %s259_s17 }
  0x38   : > { %s4867_s18 = scalar_lea.vmem %s236_s15, 128  ;;  %p4875_p0 = scmp.lt.s32.totalorder %s236_s15, %s236_s15 }
  0x39   : > { %p4868_p11 = scmp.ne.s32.totalorder %s236_s15, %s4867_s18  ;;  %p4876_p2 = scmp.lt.s32.totalorder %s4867_s18, %s4867_s18 }
  0x3b   : > { %p4870_p12 = pnand %p4868_p11, %p5141_p7  ;;  %p4877_p5 = por %p4876_p2, %p4875_p0 }
  0x3d   : > { %p4871_p13 = pneg %p4870_p12 }
  0x3f   : > { %p4878_p8 = pnand %p4877_p5, %p4871_p13 }
  0x41   : > { %4881 = shalt.err (!%p4878_p8)
}
  0x42   : > { %4687 = dma.hbm_to_vmem [thread:$0]  (!%p5131_p6), %s5637_s2, 128, %s236_s15, [#allocation6]  }
  0x43   : > { %s4893_s13 = scalar_lea.vmem %s260_s17, 128  ;;  %p4901_p11 = scmp.lt.s32.totalorder %s260_s17, %s260_s17 }
  0x44   : > { %p4894_p9 = scmp.ne.s32.totalorder %s260_s17, %s4893_s13  ;;  %p4902_p12 = scmp.lt.s32.totalorder %s4893_s13, %s4893_s13 }
  0x46   : > { %p4896_p10 = pnand %p4894_p9, %p5141_p7  ;;  %p4903_p1 = por %p4902_p12, %p4901_p11 }
  0x48   : > { %p4897_p4 = pneg %p4896_p10 }
  0x4a   : > { %p4904_p3 = pnand %p4903_p1, %p4897_p4 }
  0x4c   : > { %4907 = shalt.err (!%p4904_p3)
}
  0x4d   : > { %4693 = dma.hbm_to_vmem [thread:$0]  (!%p5131_p6), %s5639_s4, 128, %s260_s17, [#allocation9]  }
  0x4e   : > { %s5049_s23 = smov [#allocation13]  }
  0x4f   : > { %s283_s28 = sshll.u32 %s5049_s23, 4  ;;  %s284_s28 = int_to_ptr.vmem [resolvable:$true] %s283_s28 }
  0x50   : > { %s4919_s29 = scalar_lea.vmem %s284_s28, 16  ;;  %s4926_s9 = scalar_lea.vmem %s284_s28, 32 }
  0x51   : > { %p4920_p13 = scmp.ne.s32.totalorder %s284_s28, %s4919_s29  ;;  %p4927_p5 = scmp.lt.s32.totalorder %s284_s28, %s284_s28 }
  0x52   : > { %p4928_p8 = scmp.lt.s32.totalorder %s4926_s9, %s4919_s29 }
  0x53   : > { %p4922_p0 = pnand %p4920_p13, %p5141_p7 }
  0x54   : > { %p4929_p1 = por %p4928_p8, %p4927_p5 }
  0x55   : > { %p4923_p2 = pneg %p4922_p0 }
  0x57   : > { %p4930_p3 = pnand %p4929_p1, %p4923_p2 }
  0x59   : > { %4933 = shalt.err (!%p4930_p3)
}
  0x5a   : > { %4699 = dma.hbm_to_vmem [thread:$0]  (!%p5131_p6), %s5641_s6, 16, %s284_s28, [#allocation12]  }
  0x5b   : > { %s4470_s14 = sadd.s32 4294967294, %s5038_s27   ;;  %s5199_s11 = sadd.s32 1, %s5038_s27  }
  0x5c   : > { %s30_s15 = ssub.s32 %s5038_s27, %s5199_s11  ;;  %s33_s16 = sadd.s32 1, %s5034_s26 }
  0x5d   : > { %p31_p4 = scmp.eq.s32.totalorder %s30_s15, 0  ;;  %p40_p7 = scmp.ne.s32.totalorder %s5034_s26, %s5030_s25 }
  0x5e   : > { %p41_p9 = scmp.eq.s32.totalorder %s5038_s27, 0  ;;  %p46_p10 = scmp.ne.s32.totalorder %s5030_s25, %s5026_s24 }
  0x5f   : > { %s5210_s17 = scalar_select %p31_p4, %s5034_s26, %s33_s16  }
  0x60   : > { %p5212_p11 = por %p41_p9, %p40_p7  ;;  %p5653_p12 = scmp.eq.s32.totalorder %s5117_s30, 0 }
  0x61   : > { %p196_p13 = scmp.eq.s32.totalorder %s5117_s30, 1  ;;  %p202_p0 = scmp.eq.s32.totalorder %s4470_s14, 1 }
  0x62   : > { %p5218_p6 = por %p5653_p12, %p46_p10  ;;  %p4714_p2 = scmp.lt.s32.totalorder %s5038_s27, 2 }
  0x63   : > { %s294_s20 = sand.u32 1, %s5034_s26   ;;  %p5225_p5 = por %p196_p13, %p40_p7 }
  0x64   : > { %s5654_s19 = scalar_select %p5218_p6, 1, 0 }
  0x65   : > { %s5655_s13 = scalar_select %p5225_p5, 1, 0 }
  0x66   : > { %p5229_p8 = por %p202_p0, %p46_p10  ;;  %s4479_s22 = sshll.u32 %s294_s20, 6 }
  0x67   : > { %s4499_s23 = sshll.u32 %s5038_s27, 10  ;;  %s298_s12 = scalar_lea.vmem [#allocation2], %s4479_s22 }
  0x68   : > { %s5656_s21 = scalar_select %p5229_p8, 1, 0 }
  0x69   : > { %s5237_s9 = scalar_lea.hbm %s5635_s0, %s4499_s23  ;;  %s306_s10 = sshll.u32 %s298_s12, 4  ;;  %s5239_s10 = int_to_ptr.vmem [resolvable:$true] %s306_s10 }
  0x6a   : > { %p5243_p1 = pnand %p4714_p2, %p5212_p11  ;;  %s5247_s15 = scalar_lea.sflag [#allocation3], %s294_s20 }
  0x6b   : > { %s4934_s16 = scalar_lea.hbm %s5237_s9, 1024  ;;  %s4939_s22 = scalar_lea.hbm %s5635_s0, 2048 }
  0x6c   : > { %p4935_p3 = scmp.ne.s32.totalorder %s5237_s9, %s4934_s16  ;;  %p4936_p4 = pneg %p5243_p1 }
  0x6d   : > { %p4940_p10 = scmp.lt.s32.totalorder %s5237_s9, %s5635_s0  ;;  %p4941_p11 = scmp.lt.s32.totalorder %s4939_s22, %s4934_s16 }
  0x6e   : > { %p4937_p7 = pnand %p4936_p4, %p4935_p3 }
  0x6f   : > { %p4942_p12 = por %p4941_p11, %p4940_p10 }
  0x70   : > { %p4938_p9 = pneg %p4937_p7 }
  0x72   : > { %p4943_p13 = pnand %p4942_p12, %p4938_p9 }
  0x74   : > { %4946 = shalt.err (!%p4943_p13)
}
  0x75   : > { %s4947_s18 = scalar_lea.vmem %s5239_s10, 1024  ;;  %s5050_s20 = smov [#allocation2]  }
  0x76   : > { %p4948_p0 = scmp.ne.s32.totalorder %s5239_s10, %s4947_s18  ;;  %s4952_s1 = sshll.u32 %s5050_s20, 4  ;;  %s4953_s1 = int_to_ptr.vmem [resolvable:$false] %s4952_s1 }
  0x77   : > { %s4954_s23 = scalar_lea.vmem %s4953_s1, 2048  ;;  %p4955_p7 = scmp.lt.s32.totalorder %s5239_s10, %s4953_s1 }
  0x78   : > { %p4950_p2 = pnand %p4948_p0, %p4936_p4  ;;  %p4956_p8 = scmp.lt.s32.totalorder %s4954_s23, %s4947_s18 }
  0x7a   : > { %p4951_p3 = pneg %p4950_p2  ;;  %p4957_p5 = por %p4956_p8, %p4955_p7 }
  0x7c   : > { %p4958_p6 = pnand %p4957_p5, %p4951_p3 }
  0x7e   : > { %4961 = shalt.err (!%p4958_p6)
}
  0x7f   : > { %s5051_s16 = smov 512   ;;  %s5052_s28 = smov 32  }
  0x80   : > { %4703 = dma.hbm_to_vmem [thread:$0]  (!%p5243_p1), %s5237_s9, 1024, %s5239_s10, %s5247_s15, %s5051_s16, %s5051_s16, %s5052_s28  }
  0x81   : > { %p5658_p4 = scmp.ne.s32.totalorder %s5648_s8, 0 }
  0x82   : > { %s5271_s22 = sand.u32 (!%p5658_p4), 1, %s5030_s25   ;;  %p5659_p6 = scmp.ne.s32.totalorder (!%p5658_p4), %s5654_s19, 0 }
  0x83   : > { %318 = sbr.rel (%p5658_p4) target bundleno = 1440 (0x5a0), region = 48  ;;  %s4484_s1 = sshll.u32 (!%p5658_p4), %s5271_s22, 6 }
  0x84   : > { %s321_s29 = scalar_lea.sflag (!%p5658_p4), [#allocation3], %s5271_s22  ;;  %s5275_s12 = scalar_lea.vmem (!%p5658_p4), [#allocation2], %s4484_s1 }
  0x88   : > { %5005 = dma.done.wait (%p5659_p6), %s321_s29, 1024  }
  0x89   : > { %5007 = vsyncadd (%p5659_p6), %s321_s29, 4294966272  ;;  %p5660_p5 = scmp.eq.s32.totalorder %s5117_s30, 0 }
  0x8b   : > { %5009 = dma.done.wait (%p5660_p5), [#allocation6], 65664   ;;  %p5661_p8 = pmov %p5660_p5 }
  0x8c   : > { %p5662_p1 = pmov %p5660_p5 }
  0x8d   : > { %5011 = vsyncadd (%p5661_p8), [#allocation6], 4294901632 }
  0x8e   : > { %5013 = dma.done.wait (%p5662_p1), [#allocation9], 131200   ;;  %p5663_p9 = pmov %p5662_p1 }
  0x8f   : > { %p5664_p10 = pmov %p5662_p1 }
  0x90   : > { %5015 = vsyncadd (%p5663_p9), [#allocation9], 4294836096 }
  0x91   : > { %5017 = dma.done.wait (%p5664_p10), [#allocation12], 16400   ;;  %p5665_p11 = pmov %p5662_p1 }
  0x92   : > { %v510_v0 = vld [vmem:[#allocation5 + $0x3c8] sm:$0xff]  ;;  %v509_v2 = vld [vmem:[#allocation5 + $0x3c0] sm:$0xff]  ;;  %s4491_s8 = sshll.u32 %s5271_s22, 4  ;;  %s4500_s10 = sshll.u32 %s5117_s30, 8 }
  0x93   : > { %5019 = vsyncadd (%p5665_p11), [#allocation12], 4294950896  ;;  %v766_v1 = vld [vmem:[#allocation5 + $0xbc8] sm:$0xff]  ;;  %943 = vmatprep.subr.mxu0 %v510_v0  ;;  %v765_v3 = vld [vmem:[#allocation5 + $0xbc0] sm:$0xff]  ;;  %s378_s19 = scalar_lea.vmem [#allocation14], %s4491_s8  ;;  %s5592_s18 = scalar_lea.hbm %s5642_s7, %s4500_s10 }
  0x94   : > { %1020 = vmatprep.subr.mxu1 %v766_v1  ;;  %v502_v4 = vld [vmem:[#allocation5 + $0x388] sm:$0xff]  ;;  %944 = vmatpush1.msra.mxu0 %v509_v2  ;;  %v501_v6 = vld [vmem:[#allocation5 + $0x380] sm:$0xff]  ;;  %s4340_s9 = sshll.u32 %s378_s19, 4  ;;  %s4327_s20 = scalar_lea.sflag [#allocation4], %s5271_s22  ;;  %s5587_s9 = int_to_ptr.vmem [resolvable:$true] %s4340_s9 }
  0x95   : > { %v758_v5 = vld [vmem:[#allocation5 + $0xb88] sm:$0xff]  ;;  %1021 = vmatpush1.msra.mxu1 %v765_v3  ;;  %v757_v7 = vld [vmem:[#allocation5 + $0xb80] sm:$0xff]  ;;  %945 = vmatprep.subr.mxu0 %v502_v4  ;;  %s4962_s23 = scalar_lea.vmem %s5587_s9, 256  ;;  %p5666_p13 = scmp.ne.s32.totalorder %s5655_s13, 0 }
  0x96   : > { %v494_v8 = vld [vmem:[#allocation5 + $0x348] sm:$0xff]  ;;  %1022 = vmatprep.subr.mxu1 %v758_v5  ;;  %v493_v10 = vld [vmem:[#allocation5 + $0x340] sm:$0xff]  ;;  %946 = vmatpush1.msra.mxu0 %v501_v6  ;;  %p4963_p12 = scmp.ne.s32.totalorder %s5587_s9, %s4962_s23  ;;  %s5053_s30 = smov [#allocation14]  }
  0x97   : > { %v750_v9 = vld [vmem:[#allocation5 + $0xb48] sm:$0xff]  ;;  %v749_v11 = vld [vmem:[#allocation5 + $0xb40] sm:$0xff]  ;;  %1023 = vmatpush1.msra.mxu1 %v757_v7  ;;  %947 = vmatprep.subr.mxu0 %v494_v8  ;;  %s4966_s16 = sshll.u32 %s5053_s30, 4  ;;  %s4967_s16 = int_to_ptr.vmem [resolvable:$false] %s4966_s16 }
  0x98   : > { %v486_v12 = vld [vmem:[#allocation5 + $0x308] sm:$0xff]  ;;  %1024 = vmatprep.subr.mxu1 %v750_v9  ;;  %v485_v14 = vld [vmem:[#allocation5 + $0x300] sm:$0xff]  ;;  %948 = vmatpush1.msra.mxu0 %v493_v10  ;;  %p4964_p0 = pnand %p4963_p12, %p5666_p13  ;;  %s4968_s28 = scalar_lea.vmem %s4967_s16, 512 }
  0x99   : > { %v742_v13 = vld [vmem:[#allocation5 + $0xb08] sm:$0xff]  ;;  %v741_v15 = vld [vmem:[#allocation5 + $0xb00] sm:$0xff]  ;;  %1025 = vmatpush1.msra.mxu1 %v749_v11  ;;  %949 = vmatprep.subr.mxu0 %v486_v12  ;;  %p4969_p3 = scmp.lt.s32.totalorder %s5587_s9, %s4967_s16  ;;  %p4970_p7 = scmp.lt.s32.totalorder %s4968_s28, %s4962_s23 }
  0x9a   : > { %v478_v16 = vld [vmem:[#allocation5 + $0x2c8] sm:$0xff]  ;;  %1026 = vmatprep.subr.mxu1 %v742_v13  ;;  %v477_v18 = vld [vmem:[#allocation5 + $0x2c0] sm:$0xff]  ;;  %950 = vmatpush1.msra.mxu0 %v485_v14  ;;  %p4965_p2 = pneg %p4964_p0 }
  0x9b   : > { %v734_v17 = vld [vmem:[#allocation5 + $0xac8] sm:$0xff]  ;;  %v733_v19 = vld [vmem:[#allocation5 + $0xac0] sm:$0xff]  ;;  %1027 = vmatpush1.msra.mxu1 %v741_v15  ;;  %951 = vmatprep.subr.mxu0 %v478_v16  ;;  %p4971_p4 = por %p4970_p7, %p4969_p3 }
  0x9c   : > { %v470_v20 = vld [vmem:[#allocation5 + $0x288] sm:$0xff]  ;;  %1028 = vmatprep.subr.mxu1 %v734_v17  ;;  %v469_v22 = vld [vmem:[#allocation5 + $0x280] sm:$0xff]  ;;  %952 = vmatpush1.msra.mxu0 %v477_v18 }
  0x9d   : > { %v726_v21 = vld [vmem:[#allocation5 + $0xa88] sm:$0xff]  ;;  %v725_v23 = vld [vmem:[#allocation5 + $0xa80] sm:$0xff]  ;;  %1029 = vmatpush1.msra.mxu1 %v733_v19  ;;  %953 = vmatprep.subr.mxu0 %v470_v20  ;;  %p4972_p6 = pnand %p4971_p4, %p4965_p2 }
  0x9e   : > { %v462_v24 = vld [vmem:[#allocation5 + $0x248] sm:$0xff]  ;;  %1030 = vmatprep.subr.mxu1 %v726_v21  ;;  %v461_v26 = vld [vmem:[#allocation5 + $0x240] sm:$0xff]  ;;  %954 = vmatpush1.msra.mxu0 %v469_v22 }
  0x9f   : > { %v718_v25 = vld [vmem:[#allocation5 + $0xa48] sm:$0xff]  ;;  %v717_v27 = vld [vmem:[#allocation5 + $0xa40] sm:$0xff]  ;;  %1031 = vmatpush1.msra.mxu1 %v725_v23  ;;  %955 = vmatprep.subr.mxu0 %v462_v24 }
  0xa0   : > { %v454_v28 = vld [vmem:[#allocation5 + $0x208] sm:$0xff]  ;;  %1032 = vmatprep.subr.mxu1 %v718_v25  ;;  %v453_v30 = vld [vmem:[#allocation5 + $0x200] sm:$0xff]  ;;  %956 = vmatpush1.msra.mxu0 %v461_v26 }
  0xa1   : > { %v710_v29 = vld [vmem:[#allocation5 + $0xa08] sm:$0xff]  ;;  %v709_v31 = vld [vmem:[#allocation5 + $0xa00] sm:$0xff]  ;;  %1033 = vmatpush1.msra.mxu1 %v717_v27  ;;  %957 = vmatprep.subr.mxu0 %v454_v28 }
  0xa2   : > { %v446_v32 = vld [vmem:[#allocation5 + $0x1c8] sm:$0xff]  ;;  %1034 = vmatprep.subr.mxu1 %v710_v29  ;;  %v445_v34 = vld [vmem:[#allocation5 + $0x1c0] sm:$0xff]  ;;  %958 = vmatpush1.msra.mxu0 %v453_v30 }
  0xa3   : > { %v702_v33 = vld [vmem:[#allocation5 + $0x9c8] sm:$0xff]  ;;  %v701_v35 = vld [vmem:[#allocation5 + $0x9c0] sm:$0xff]  ;;  %1035 = vmatpush1.msra.mxu1 %v709_v31  ;;  %959 = vmatprep.subr.mxu0 %v446_v32 }
  0xa4   : > { %v438_v36 = vld [vmem:[#allocation5 + $0x188] sm:$0xff]  ;;  %1036 = vmatprep.subr.mxu1 %v702_v33  ;;  %v437_v38 = vld [vmem:[#allocation5 + $0x180] sm:$0xff]  ;;  %960 = vmatpush1.msra.mxu0 %v445_v34 }
  0xa5   : > { %v694_v37 = vld [vmem:[#allocation5 + $0x988] sm:$0xff]  ;;  %v693_v39 = vld [vmem:[#allocation5 + $0x980] sm:$0xff]  ;;  %1037 = vmatpush1.msra.mxu1 %v701_v35  ;;  %961 = vmatprep.subr.mxu0 %v438_v36 }
  0xa6   : > { %v430_v40 = vld [vmem:[#allocation5 + $0x148] sm:$0xff]  ;;  %1038 = vmatprep.subr.mxu1 %v694_v37  ;;  %v429_v42 = vld [vmem:[#allocation5 + $0x140] sm:$0xff]  ;;  %962 = vmatpush1.msra.mxu0 %v437_v38 }
  0xa7   : > { %v686_v41 = vld [vmem:[#allocation5 + $0x948] sm:$0xff]  ;;  %v685_v43 = vld [vmem:[#allocation5 + $0x940] sm:$0xff]  ;;  %1039 = vmatpush1.msra.mxu1 %v693_v39  ;;  %963 = vmatprep.subr.mxu0 %v430_v40 }
  0xa8   : > { %v422_v44 = vld [vmem:[#allocation5 + $0x108] sm:$0xff]  ;;  %1040 = vmatprep.subr.mxu1 %v686_v41  ;;  %v421_v46 = vld [vmem:[#allocation5 + $0x100] sm:$0xff]  ;;  %964 = vmatpush1.msra.mxu0 %v429_v42 }
  0xa9   : > { %v678_v45 = vld [vmem:[#allocation5 + $0x908] sm:$0xff]  ;;  %v677_v47 = vld [vmem:[#allocation5 + $0x900] sm:$0xff]  ;;  %1041 = vmatpush1.msra.mxu1 %v685_v43  ;;  %965 = vmatprep.subr.mxu0 %v422_v44 }
  0xaa   : > { %v414_v48 = vld [vmem:[#allocation5 + $0xc8] sm:$0xff]  ;;  %1042 = vmatprep.subr.mxu1 %v678_v45  ;;  %v413_v50 = vld [vmem:[#allocation5 + $0xc0] sm:$0xff]  ;;  %966 = vmatpush1.msra.mxu0 %v421_v46 }
  0xab   : > { %v670_v49 = vld [vmem:[#allocation5 + $0x8c8] sm:$0xff]  ;;  %v669_v51 = vld [vmem:[#allocation5 + $0x8c0] sm:$0xff]  ;;  %1043 = vmatpush1.msra.mxu1 %v677_v47  ;;  %967 = vmatprep.subr.mxu0 %v414_v48 }
  0xac   : > { %v406_v52 = vld [vmem:[#allocation5 + $0x88] sm:$0xff]  ;;  %1044 = vmatprep.subr.mxu1 %v670_v49  ;;  %v405_v54 = vld [vmem:[#allocation5 + $0x80] sm:$0xff]  ;;  %968 = vmatpush1.msra.mxu0 %v413_v50 }
  0xad   : > { %v662_v53 = vld [vmem:[#allocation5 + $0x888] sm:$0xff]  ;;  %v661_v55 = vld [vmem:[#allocation5 + $0x880] sm:$0xff]  ;;  %1045 = vmatpush1.msra.mxu1 %v669_v51  ;;  %969 = vmatprep.subr.mxu0 %v406_v52 }
  0xae   : > { %v398_v56 = vld [vmem:[#allocation5 + $0x48] sm:$0xff]  ;;  %1046 = vmatprep.subr.mxu1 %v662_v53  ;;  %v397_v58 = vld [vmem:[#allocation5 + $0x40] sm:$0xff]  ;;  %970 = vmatpush1.msra.mxu0 %v405_v54 }
  0xaf   : > { %v654_v57 = vld [vmem:[#allocation5 + $0x848] sm:$0xff]  ;;  %v653_v59 = vld [vmem:[#allocation5 + $0x840] sm:$0xff]  ;;  %1047 = vmatpush1.msra.mxu1 %v661_v55  ;;  %971 = vmatprep.subr.mxu0 %v398_v56 }
  0xb0   : > { %v390_v60 = vld [vmem:[#allocation5 + $0x8] sm:$0xff]  ;;  %1048 = vmatprep.subr.mxu1 %v654_v57  ;;  %v389_v62 = vld [vmem:[#allocation5] sm:$0xff]  ;;  %972 = vmatpush1.msra.mxu0 %v397_v58 }
  0xb1   : > { %v646_v61 = vld [vmem:[#allocation5 + $0x808] sm:$0xff]  ;;  %v645_v63 = vld [vmem:[#allocation5 + $0x800] sm:$0xff]  ;;  %1049 = vmatpush1.msra.mxu1 %v653_v59  ;;  %973 = vmatprep.subr.mxu0 %v390_v60 }
  0xb2   : > { %v638_v0 = vld [vmem:[#allocation5 + $0x7c8] sm:$0xff]  ;;  %1050 = vmatprep.subr.mxu1 %v646_v61  ;;  %v637_v2 = vld [vmem:[#allocation5 + $0x7c0] sm:$0xff]  ;;  %974 = vmatpush1.msra.mxu0 %v389_v62 }
  0xb3   : > { %v894_v1 = vld [vmem:[#allocation5 + $0xfc8] sm:$0xff]  ;;  %v893_v3 = vld [vmem:[#allocation5 + $0xfc0] sm:$0xff]  ;;  %1051 = vmatpush1.msra.mxu1 %v645_v63  ;;  %975 = vmatprep.subr.mxu0 %v638_v0 }
  0xb4   : > { %v630_v4 = vld [vmem:[#allocation5 + $0x788] sm:$0xff]  ;;  %1052 = vmatprep.subr.mxu1 %v894_v1  ;;  %v629_v6 = vld [vmem:[#allocation5 + $0x780] sm:$0xff]  ;;  %976 = vmatpush2.msra.mxu0 %v637_v2  ;;  %v5300_v2 = vld [vmem:[%s5275_s12 + $0x18] sm:$0xff] }
  0xb5   : > { %v886_v5 = vld [vmem:[#allocation5 + $0xf88] sm:$0xff]  ;;  %v885_v7 = vld [vmem:[#allocation5 + $0xf80] sm:$0xff]  ;;  %1053 = vmatpush2.msra.mxu1 %v893_v3  ;;  %977 = vmatprep.subr.mxu0 %v630_v4  ;;  %v512_v3 = vld [vmem:[#allocation5 + $0x3d8] sm:$0xff] }
  0xb6   : > { %v622_v8 = vld [vmem:[#allocation5 + $0x748] sm:$0xff]  ;;  %1054 = vmatprep.subr.mxu1 %v886_v5  ;;  %v621_v10 = vld [vmem:[#allocation5 + $0x740] sm:$0xff]  ;;  %978 = vmatpush2.msra.mxu0 %v629_v6  ;;  %v768_v4 = vld [vmem:[#allocation5 + $0xbd8] sm:$0xff] }
  0xb7   : > { %v878_v9 = vld [vmem:[#allocation5 + $0xf48] sm:$0xff]  ;;  %v877_v11 = vld [vmem:[#allocation5 + $0xf40] sm:$0xff]  ;;  %1055 = vmatpush2.msra.mxu1 %v885_v7  ;;  %979 = vmatprep.subr.mxu0 %v622_v8  ;;  %v5304_v5 = vld [vmem:[%s5275_s12 + $0x10] sm:$0xff] }
  0xb8   : > { %v614_v12 = vld [vmem:[#allocation5 + $0x708] sm:$0xff]  ;;  %1056 = vmatprep.subr.mxu1 %v878_v9  ;;  %v613_v14 = vld [vmem:[#allocation5 + $0x700] sm:$0xff]  ;;  %980 = vmatpush2.msra.mxu0 %v621_v10  ;;  %v511_v6 = vld [vmem:[#allocation5 + $0x3d0] sm:$0xff] }
  0xb9   : > { %v870_v13 = vld [vmem:[#allocation5 + $0xf08] sm:$0xff]  ;;  %v869_v15 = vld [vmem:[#allocation5 + $0xf00] sm:$0xff]  ;;  %1057 = vmatpush2.msra.mxu1 %v877_v11  ;;  %981 = vmatprep.subr.mxu0 %v614_v12  ;;  %v767_v7 = vld [vmem:[#allocation5 + $0xbd0] sm:$0xff] }
  0xba   : > { %v606_v16 = vld [vmem:[#allocation5 + $0x6c8] sm:$0xff]  ;;  %1058 = vmatprep.subr.mxu1 %v870_v13  ;;  %v605_v18 = vld [vmem:[#allocation5 + $0x6c0] sm:$0xff]  ;;  %982 = vmatpush2.msra.mxu0 %v613_v14  ;;  %v504_v8 = vld [vmem:[#allocation5 + $0x398] sm:$0xff] }
  0xbb   : > { %v862_v17 = vld [vmem:[#allocation5 + $0xec8] sm:$0xff]  ;;  %v861_v19 = vld [vmem:[#allocation5 + $0xec0] sm:$0xff]  ;;  %1059 = vmatpush2.msra.mxu1 %v869_v15  ;;  %983 = vmatprep.subr.mxu0 %v606_v16  ;;  %v760_v9 = vld [vmem:[#allocation5 + $0xb98] sm:$0xff] }
  0xbc   : > { %v598_v20 = vld [vmem:[#allocation5 + $0x688] sm:$0xff]  ;;  %1060 = vmatprep.subr.mxu1 %v862_v17  ;;  %v597_v22 = vld [vmem:[#allocation5 + $0x680] sm:$0xff]  ;;  %984 = vmatpush2.msra.mxu0 %v605_v18  ;;  %v503_v10 = vld [vmem:[#allocation5 + $0x390] sm:$0xff] }
  0xbd   : > { %v854_v21 = vld [vmem:[#allocation5 + $0xe88] sm:$0xff]  ;;  %v853_v23 = vld [vmem:[#allocation5 + $0xe80] sm:$0xff]  ;;  %1061 = vmatpush2.msra.mxu1 %v861_v19  ;;  %985 = vmatprep.subr.mxu0 %v598_v20  ;;  %v759_v11 = vld [vmem:[#allocation5 + $0xb90] sm:$0xff] }
  0xbe   : > { %v590_v24 = vld [vmem:[#allocation5 + $0x648] sm:$0xff]  ;;  %1062 = vmatprep.subr.mxu1 %v854_v21  ;;  %v589_v26 = vld [vmem:[#allocation5 + $0x640] sm:$0xff]  ;;  %986 = vmatpush2.msra.mxu0 %v597_v22  ;;  %v496_v12 = vld [vmem:[#allocation5 + $0x358] sm:$0xff] }
  0xbf   : > { %v846_v25 = vld [vmem:[#allocation5 + $0xe48] sm:$0xff]  ;;  %v845_v27 = vld [vmem:[#allocation5 + $0xe40] sm:$0xff]  ;;  %1063 = vmatpush2.msra.mxu1 %v853_v23  ;;  %987 = vmatprep.subr.mxu0 %v590_v24  ;;  %v752_v13 = vld [vmem:[#allocation5 + $0xb58] sm:$0xff] }
  0xc0   : > { %v582_v28 = vld [vmem:[#allocation5 + $0x608] sm:$0xff]  ;;  %1064 = vmatprep.subr.mxu1 %v846_v25  ;;  %v581_v30 = vld [vmem:[#allocation5 + $0x600] sm:$0xff]  ;;  %988 = vmatpush2.msra.mxu0 %v589_v26  ;;  %v495_v14 = vld [vmem:[#allocation5 + $0x350] sm:$0xff] }
  0xc1   : > { %v838_v29 = vld [vmem:[#allocation5 + $0xe08] sm:$0xff]  ;;  %v837_v31 = vld [vmem:[#allocation5 + $0xe00] sm:$0xff]  ;;  %1065 = vmatpush2.msra.mxu1 %v845_v27  ;;  %989 = vmatprep.subr.mxu0 %v582_v28  ;;  %v751_v15 = vld [vmem:[#allocation5 + $0xb50] sm:$0xff] }
  0xc2   : > { %v574_v32 = vld [vmem:[#allocation5 + $0x5c8] sm:$0xff]  ;;  %1066 = vmatprep.subr.mxu1 %v838_v29  ;;  %v573_v34 = vld [vmem:[#allocation5 + $0x5c0] sm:$0xff]  ;;  %990 = vmatpush2.msra.mxu0 %v581_v30  ;;  %v488_v16 = vld [vmem:[#allocation5 + $0x318] sm:$0xff] }
  0xc3   : > { %v830_v33 = vld [vmem:[#allocation5 + $0xdc8] sm:$0xff]  ;;  %v829_v35 = vld [vmem:[#allocation5 + $0xdc0] sm:$0xff]  ;;  %1067 = vmatpush2.msra.mxu1 %v837_v31  ;;  %991 = vmatprep.subr.mxu0 %v574_v32  ;;  %v744_v17 = vld [vmem:[#allocation5 + $0xb18] sm:$0xff] }
  0xc4   : > { %v566_v36 = vld [vmem:[#allocation5 + $0x588] sm:$0xff]  ;;  %1068 = vmatprep.subr.mxu1 %v830_v33  ;;  %v565_v38 = vld [vmem:[#allocation5 + $0x580] sm:$0xff]  ;;  %992 = vmatpush2.msra.mxu0 %v573_v34  ;;  %v487_v18 = vld [vmem:[#allocation5 + $0x310] sm:$0xff] }
  0xc5   : > { %v822_v37 = vld [vmem:[#allocation5 + $0xd88] sm:$0xff]  ;;  %v821_v39 = vld [vmem:[#allocation5 + $0xd80] sm:$0xff]  ;;  %1069 = vmatpush2.msra.mxu1 %v829_v35  ;;  %993 = vmatprep.subr.mxu0 %v566_v36  ;;  %v743_v19 = vld [vmem:[#allocation5 + $0xb10] sm:$0xff] }
  0xc6   : > { %v558_v40 = vld [vmem:[#allocation5 + $0x548] sm:$0xff]  ;;  %1070 = vmatprep.subr.mxu1 %v822_v37  ;;  %v557_v42 = vld [vmem:[#allocation5 + $0x540] sm:$0xff]  ;;  %994 = vmatpush2.msra.mxu0 %v565_v38  ;;  %v480_v20 = vld [vmem:[#allocation5 + $0x2d8] sm:$0xff] }
  0xc7   : > { %v814_v41 = vld [vmem:[#allocation5 + $0xd48] sm:$0xff]  ;;  %v813_v43 = vld [vmem:[#allocation5 + $0xd40] sm:$0xff]  ;;  %1071 = vmatpush2.msra.mxu1 %v821_v39  ;;  %995 = vmatprep.subr.mxu0 %v558_v40  ;;  %v736_v21 = vld [vmem:[#allocation5 + $0xad8] sm:$0xff] }
  0xc8   : > { %v550_v44 = vld [vmem:[#allocation5 + $0x508] sm:$0xff]  ;;  %1072 = vmatprep.subr.mxu1 %v814_v41  ;;  %v549_v46 = vld [vmem:[#allocation5 + $0x500] sm:$0xff]  ;;  %996 = vmatpush2.msra.mxu0 %v557_v42  ;;  %v479_v22 = vld [vmem:[#allocation5 + $0x2d0] sm:$0xff] }
  0xc9   : > { %v806_v45 = vld [vmem:[#allocation5 + $0xd08] sm:$0xff]  ;;  %v805_v47 = vld [vmem:[#allocation5 + $0xd00] sm:$0xff]  ;;  %1073 = vmatpush2.msra.mxu1 %v813_v43  ;;  %997 = vmatprep.subr.mxu0 %v550_v44  ;;  %v735_v23 = vld [vmem:[#allocation5 + $0xad0] sm:$0xff] }
  0xca   : > { %v542_v48 = vld [vmem:[#allocation5 + $0x4c8] sm:$0xff]  ;;  %1074 = vmatprep.subr.mxu1 %v806_v45  ;;  %v541_v50 = vld [vmem:[#allocation5 + $0x4c0] sm:$0xff]  ;;  %998 = vmatpush2.msra.mxu0 %v549_v46  ;;  %v472_v24 = vld [vmem:[#allocation5 + $0x298] sm:$0xff] }
  0xcb   : > { %v798_v49 = vld [vmem:[#allocation5 + $0xcc8] sm:$0xff]  ;;  %v797_v51 = vld [vmem:[#allocation5 + $0xcc0] sm:$0xff]  ;;  %1075 = vmatpush2.msra.mxu1 %v805_v47  ;;  %999 = vmatprep.subr.mxu0 %v542_v48  ;;  %v728_v25 = vld [vmem:[#allocation5 + $0xa98] sm:$0xff] }
  0xcc   : > { %v534_v52 = vld [vmem:[#allocation5 + $0x488] sm:$0xff]  ;;  %1076 = vmatprep.subr.mxu1 %v798_v49  ;;  %v533_v54 = vld [vmem:[#allocation5 + $0x480] sm:$0xff]  ;;  %1000 = vmatpush2.msra.mxu0 %v541_v50  ;;  %v471_v26 = vld [vmem:[#allocation5 + $0x290] sm:$0xff] }
  0xcd   : > { %v790_v53 = vld [vmem:[#allocation5 + $0xc88] sm:$0xff]  ;;  %v789_v55 = vld [vmem:[#allocation5 + $0xc80] sm:$0xff]  ;;  %1077 = vmatpush2.msra.mxu1 %v797_v51  ;;  %1001 = vmatprep.subr.mxu0 %v534_v52  ;;  %v727_v27 = vld [vmem:[#allocation5 + $0xa90] sm:$0xff] }
  0xce   : > { %v526_v56 = vld [vmem:[#allocation5 + $0x448] sm:$0xff]  ;;  %1078 = vmatprep.subr.mxu1 %v790_v53  ;;  %v525_v58 = vld [vmem:[#allocation5 + $0x440] sm:$0xff]  ;;  %1002 = vmatpush2.msra.mxu0 %v533_v54  ;;  %v464_v28 = vld [vmem:[#allocation5 + $0x258] sm:$0xff] }
  0xcf   : > { %v782_v57 = vld [vmem:[#allocation5 + $0xc48] sm:$0xff]  ;;  %v781_v59 = vld [vmem:[#allocation5 + $0xc40] sm:$0xff]  ;;  %1079 = vmatpush2.msra.mxu1 %v789_v55  ;;  %1003 = vmatprep.subr.mxu0 %v526_v56  ;;  %v720_v29 = vld [vmem:[#allocation5 + $0xa58] sm:$0xff] }
  0xd0   : > { %v518_v60 = vld [vmem:[#allocation5 + $0x408] sm:$0xff]  ;;  %1080 = vmatprep.subr.mxu1 %v782_v57  ;;  %v517_v62 = vld [vmem:[#allocation5 + $0x400] sm:$0xff]  ;;  %1004 = vmatpush2.msra.mxu0 %v525_v58  ;;  %v463_v30 = vld [vmem:[#allocation5 + $0x250] sm:$0xff] }
  0xd1   : > { %v774_v61 = vld [vmem:[#allocation5 + $0xc08] sm:$0xff]  ;;  %1081 = vmatpush2.msra.mxu1 %v781_v59  ;;  %v773_v0 = vld [vmem:[#allocation5 + $0xc00] sm:$0xff]  ;;  %1005 = vmatprep.subr.mxu0 %v518_v60  ;;  %v719_v31 = vld [vmem:[#allocation5 + $0xa50] sm:$0xff] }
  0xd2   : > { %v5294_v63 = vld [vmem:[%s5275_s12 + $0x8] sm:$0xff]  ;;  %v5297_v1 = vld [vmem:[%s5275_s12] sm:$0xff]  ;;  %1082 = vmatprep.subr.mxu1 %v774_v61  ;;  %1006 = vmatpush2.msra.mxu0 %v517_v62  ;;  %v456_v32 = vld [vmem:[#allocation5 + $0x218] sm:$0xff] }
  0xd3   : > { %1007 = vmatprep.mubr.f32.mxu0 %v5294_v63  ;;  %1083 = vmatpush2.msra.mxu1 %v773_v0  ;;  %v712_v33 = vld [vmem:[#allocation5 + $0xa18] sm:$0xff]  ;;  %v455_v34 = vld [vmem:[#allocation5 + $0x210] sm:$0xff] }
  0xd4   : > { %1008 = vmatmul.mubr.f32.vlgmr.msra.gmra.mxu0 %v5297_v1  ;;  %1084 = vmatprep.mubr.f32.mxu1 %v5300_v2  ;;  %v711_v35 = vld [vmem:[#allocation5 + $0xa10] sm:$0xff]  ;;  %v448_v36 = vld [vmem:[#allocation5 + $0x1d8] sm:$0xff] }
  0xd5   : > { %1097 = vmatprep.subr.mxu0 %v512_v3  ;;  %1174 = vmatprep.subr.mxu1 %v768_v4  ;;  %v704_v37 = vld [vmem:[#allocation5 + $0x9d8] sm:$0xff]  ;;  %v447_v38 = vld [vmem:[#allocation5 + $0x1d0] sm:$0xff] }
  0xd6   : > { %1085 = vmatmul.mubr.f32.vlgmr.msra.gmra.mxu1 %v5304_v5  ;;  %1098 = vmatpush1.msra.mxu0 %v511_v6  ;;  %v703_v39 = vld [vmem:[#allocation5 + $0x9d0] sm:$0xff]  ;;  %v440_v40 = vld [vmem:[#allocation5 + $0x198] sm:$0xff] }
  0xd7   : > { %1175 = vmatpush1.msra.mxu1 %v767_v7  ;;  %1099 = vmatprep.subr.mxu0 %v504_v8  ;;  %v696_v41 = vld [vmem:[#allocation5 + $0x998] sm:$0xff]  ;;  %v439_v42 = vld [vmem:[#allocation5 + $0x190] sm:$0xff] }
  0xd8   : > { %1176 = vmatprep.subr.mxu1 %v760_v9  ;;  %1100 = vmatpush1.msra.mxu0 %v503_v10  ;;  %v695_v43 = vld [vmem:[#allocation5 + $0x990] sm:$0xff]  ;;  %v432_v44 = vld [vmem:[#allocation5 + $0x158] sm:$0xff] }
  0xd9   : > { %1177 = vmatpush1.msra.mxu1 %v759_v11  ;;  %1101 = vmatprep.subr.mxu0 %v496_v12  ;;  %v688_v45 = vld [vmem:[#allocation5 + $0x958] sm:$0xff]  ;;  %v431_v46 = vld [vmem:[#allocation5 + $0x150] sm:$0xff] }
  0xda   : > { %1178 = vmatprep.subr.mxu1 %v752_v13  ;;  %1102 = vmatpush1.msra.mxu0 %v495_v14  ;;  %v687_v47 = vld [vmem:[#allocation5 + $0x950] sm:$0xff]  ;;  %v424_v48 = vld [vmem:[#allocation5 + $0x118] sm:$0xff] }
  0xdb   : > { %1179 = vmatpush1.msra.mxu1 %v751_v15  ;;  %1103 = vmatprep.subr.mxu0 %v488_v16  ;;  %v680_v49 = vld [vmem:[#allocation5 + $0x918] sm:$0xff]  ;;  %v423_v50 = vld [vmem:[#allocation5 + $0x110] sm:$0xff] }
  0xdc   : > { %1180 = vmatprep.subr.mxu1 %v744_v17  ;;  %1104 = vmatpush1.msra.mxu0 %v487_v18  ;;  %v679_v51 = vld [vmem:[#allocation5 + $0x910] sm:$0xff]  ;;  %v416_v52 = vld [vmem:[#allocation5 + $0xd8] sm:$0xff] }
  0xdd   : > { %1181 = vmatpush1.msra.mxu1 %v743_v19  ;;  %1105 = vmatprep.subr.mxu0 %v480_v20  ;;  %v672_v53 = vld [vmem:[#allocation5 + $0x8d8] sm:$0xff]  ;;  %v415_v54 = vld [vmem:[#allocation5 + $0xd0] sm:$0xff] }
  0xde   : > { %1182 = vmatprep.subr.mxu1 %v736_v21  ;;  %1106 = vmatpush1.msra.mxu0 %v479_v22  ;;  %v671_v55 = vld [vmem:[#allocation5 + $0x8d0] sm:$0xff]  ;;  %v408_v56 = vld [vmem:[#allocation5 + $0x98] sm:$0xff] }
  0xdf   : > { %1183 = vmatpush1.msra.mxu1 %v735_v23  ;;  %1107 = vmatprep.subr.mxu0 %v472_v24  ;;  %v664_v57 = vld [vmem:[#allocation5 + $0x898] sm:$0xff]  ;;  %v407_v58 = vld [vmem:[#allocation5 + $0x90] sm:$0xff] }
  0xe0   : > { %1184 = vmatprep.subr.mxu1 %v728_v25  ;;  %1108 = vmatpush1.msra.mxu0 %v471_v26  ;;  %v663_v59 = vld [vmem:[#allocation5 + $0x890] sm:$0xff]  ;;  %v400_v60 = vld [vmem:[#allocation5 + $0x58] sm:$0xff] }
  0xe1   : > { %1185 = vmatpush1.msra.mxu1 %v727_v27  ;;  %1109 = vmatprep.subr.mxu0 %v464_v28  ;;  %v656_v61 = vld [vmem:[#allocation5 + $0x858] sm:$0xff]  ;;  %v399_v62 = vld [vmem:[#allocation5 + $0x50] sm:$0xff] }
  0xe2   : > { %1186 = vmatprep.subr.mxu1 %v720_v29  ;;  %1110 = vmatpush1.msra.mxu0 %v463_v30  ;;  %v655_v0 = vld [vmem:[#allocation5 + $0x850] sm:$0xff]  ;;  %v392_v3 = vld [vmem:[#allocation5 + $0x18] sm:$0xff] }
  0xe3   : > { %1187 = vmatpush1.msra.mxu1 %v719_v31  ;;  %1111 = vmatprep.subr.mxu0 %v456_v32  ;;  %v648_v4 = vld [vmem:[#allocation5 + $0x818] sm:$0xff]  ;;  %v391_v6 = vld [vmem:[#allocation5 + $0x10] sm:$0xff] }
  0xe4   : > { %1188 = vmatprep.subr.mxu1 %v712_v33  ;;  %1112 = vmatpush1.msra.mxu0 %v455_v34  ;;  %v647_v7 = vld [vmem:[#allocation5 + $0x810] sm:$0xff]  ;;  %v640_v8 = vld [vmem:[#allocation5 + $0x7d8] sm:$0xff] }
  0xe5   : > { %1189 = vmatpush1.msra.mxu1 %v711_v35  ;;  %1113 = vmatprep.subr.mxu0 %v448_v36  ;;  %v896_v9 = vld [vmem:[#allocation5 + $0xfd8] sm:$0xff]  ;;  %v639_v10 = vld [vmem:[#allocation5 + $0x7d0] sm:$0xff] }
  0xe6   : > { %1190 = vmatprep.subr.mxu1 %v704_v37  ;;  %1114 = vmatpush1.msra.mxu0 %v447_v38  ;;  %v895_v11 = vld [vmem:[#allocation5 + $0xfd0] sm:$0xff]  ;;  %v632_v12 = vld [vmem:[#allocation5 + $0x798] sm:$0xff] }
  0xe7   : > { %1191 = vmatpush1.msra.mxu1 %v703_v39  ;;  %1115 = vmatprep.subr.mxu0 %v440_v40  ;;  %v888_v13 = vld [vmem:[#allocation5 + $0xf98] sm:$0xff]  ;;  %v631_v14 = vld [vmem:[#allocation5 + $0x790] sm:$0xff] }
  0xe8   : > { %1192 = vmatprep.subr.mxu1 %v696_v41  ;;  %1116 = vmatpush1.msra.mxu0 %v439_v42  ;;  %v887_v15 = vld [vmem:[#allocation5 + $0xf90] sm:$0xff]  ;;  %v624_v16 = vld [vmem:[#allocation5 + $0x758] sm:$0xff] }
  0xe9   : > { %1193 = vmatpush1.msra.mxu1 %v695_v43  ;;  %1117 = vmatprep.subr.mxu0 %v432_v44  ;;  %v880_v17 = vld [vmem:[#allocation5 + $0xf58] sm:$0xff]  ;;  %v623_v18 = vld [vmem:[#allocation5 + $0x750] sm:$0xff] }
  0xea   : > { %1194 = vmatprep.subr.mxu1 %v688_v45  ;;  %1118 = vmatpush1.msra.mxu0 %v431_v46  ;;  %v879_v19 = vld [vmem:[#allocation5 + $0xf50] sm:$0xff]  ;;  %v616_v20 = vld [vmem:[#allocation5 + $0x718] sm:$0xff] }
  0xeb   : > { %1195 = vmatpush1.msra.mxu1 %v687_v47  ;;  %1119 = vmatprep.subr.mxu0 %v424_v48  ;;  %v872_v21 = vld [vmem:[#allocation5 + $0xf18] sm:$0xff]  ;;  %v615_v22 = vld [vmem:[#allocation5 + $0x710] sm:$0xff] }
  0xec   : > { %1196 = vmatprep.subr.mxu1 %v680_v49  ;;  %1120 = vmatpush1.msra.mxu0 %v423_v50  ;;  %v871_v23 = vld [vmem:[#allocation5 + $0xf10] sm:$0xff]  ;;  %v608_v24 = vld [vmem:[#allocation5 + $0x6d8] sm:$0xff] }
  0xed   : > { %1197 = vmatpush1.msra.mxu1 %v679_v51  ;;  %1121 = vmatprep.subr.mxu0 %v416_v52  ;;  %v864_v25 = vld [vmem:[#allocation5 + $0xed8] sm:$0xff]  ;;  %v607_v26 = vld [vmem:[#allocation5 + $0x6d0] sm:$0xff] }
  0xee   : > { %1198 = vmatprep.subr.mxu1 %v672_v53  ;;  %1122 = vmatpush1.msra.mxu0 %v415_v54  ;;  %v863_v27 = vld [vmem:[#allocation5 + $0xed0] sm:$0xff]  ;;  %v600_v28 = vld [vmem:[#allocation5 + $0x698] sm:$0xff] }
  0xef   : > { %1199 = vmatpush1.msra.mxu1 %v671_v55  ;;  %1123 = vmatprep.subr.mxu0 %v408_v56  ;;  %v856_v29 = vld [vmem:[#allocation5 + $0xe98] sm:$0xff]  ;;  %v599_v30 = vld [vmem:[#allocation5 + $0x690] sm:$0xff] }
  0xf0   : > { %1200 = vmatprep.subr.mxu1 %v664_v57  ;;  %1124 = vmatpush1.msra.mxu0 %v407_v58  ;;  %v855_v31 = vld [vmem:[#allocation5 + $0xe90] sm:$0xff]  ;;  %v592_v32 = vld [vmem:[#allocation5 + $0x658] sm:$0xff]  ;;  %v5310_v58 = vld [vmem:[%s5275_s12 + $0x28] sm:$0xff] }
  0xf1   : > { %1201 = vmatpush1.msra.mxu1 %v663_v59  ;;  %1125 = vmatprep.subr.mxu0 %v400_v60  ;;  %v848_v33 = vld [vmem:[#allocation5 + $0xe58] sm:$0xff]  ;;  %v591_v34 = vld [vmem:[#allocation5 + $0x650] sm:$0xff] }
  0xf2   : > { %1202 = vmatprep.subr.mxu1 %v656_v61  ;;  %1126 = vmatpush1.msra.mxu0 %v399_v62  ;;  %v847_v35 = vld [vmem:[#allocation5 + $0xe50] sm:$0xff]  ;;  %v584_v36 = vld [vmem:[#allocation5 + $0x618] sm:$0xff]  ;;  %v5313_v61 = vld [vmem:[%s5275_s12 + $0x20] sm:$0xff] }
  0xf3   : > { %1203 = vmatpush1.msra.mxu1 %v655_v0  ;;  %1127 = vmatprep.subr.mxu0 %v392_v3  ;;  %v840_v37 = vld [vmem:[#allocation5 + $0xe18] sm:$0xff]  ;;  %v583_v38 = vld [vmem:[#allocation5 + $0x610] sm:$0xff] }
  0xf4   : > { %1204 = vmatprep.subr.mxu1 %v648_v4  ;;  %1128 = vmatpush1.msra.mxu0 %v391_v6  ;;  %v839_v39 = vld [vmem:[#allocation5 + $0xe10] sm:$0xff]  ;;  %v576_v40 = vld [vmem:[#allocation5 + $0x5d8] sm:$0xff] }
  0xf5   : > { %1205 = vmatpush1.msra.mxu1 %v647_v7  ;;  %1129 = vmatprep.subr.mxu0 %v640_v8  ;;  %v832_v41 = vld [vmem:[#allocation5 + $0xdd8] sm:$0xff]  ;;  %v575_v42 = vld [vmem:[#allocation5 + $0x5d0] sm:$0xff] }
  0xf6   : > { %1206 = vmatprep.subr.mxu1 %v896_v9  ;;  %1130 = vmatpush2.msra.mxu0 %v639_v10  ;;  %v831_v43 = vld [vmem:[#allocation5 + $0xdd0] sm:$0xff]  ;;  %v568_v44 = vld [vmem:[#allocation5 + $0x598] sm:$0xff] }
  0xf7   : > { %1207 = vmatpush2.msra.mxu1 %v895_v11  ;;  %1131 = vmatprep.subr.mxu0 %v632_v12  ;;  %v824_v45 = vld [vmem:[#allocation5 + $0xd98] sm:$0xff]  ;;  %v567_v46 = vld [vmem:[#allocation5 + $0x590] sm:$0xff] }
  0xf8   : > { %1208 = vmatprep.subr.mxu1 %v888_v13  ;;  %1132 = vmatpush2.msra.mxu0 %v631_v14  ;;  %v823_v47 = vld [vmem:[#allocation5 + $0xd90] sm:$0xff]  ;;  %v560_v48 = vld [vmem:[#allocation5 + $0x558] sm:$0xff] }
  0xf9   : > { %1209 = vmatpush2.msra.mxu1 %v887_v15  ;;  %1133 = vmatprep.subr.mxu0 %v624_v16  ;;  %v816_v49 = vld [vmem:[#allocation5 + $0xd58] sm:$0xff]  ;;  %v559_v50 = vld [vmem:[#allocation5 + $0x550] sm:$0xff]  ;;  %v514_v16 = vld [vmem:[#allocation5 + $0x3e8] sm:$0xff] }
  0xfa   : > { %1210 = vmatprep.subr.mxu1 %v880_v17  ;;  %1134 = vmatpush2.msra.mxu0 %v623_v18  ;;  %v815_v51 = vld [vmem:[#allocation5 + $0xd50] sm:$0xff]  ;;  %v552_v52 = vld [vmem:[#allocation5 + $0x518] sm:$0xff]  ;;  %v770_v17 = vld [vmem:[#allocation5 + $0xbe8] sm:$0xff] }
  0xfb   : > { %1211 = vmatpush2.msra.mxu1 %v879_v19  ;;  %1135 = vmatprep.subr.mxu0 %v616_v20  ;;  %v808_v53 = vld [vmem:[#allocation5 + $0xd18] sm:$0xff]  ;;  %v551_v54 = vld [vmem:[#allocation5 + $0x510] sm:$0xff]  ;;  %v513_v18 = vld [vmem:[#allocation5 + $0x3e0] sm:$0xff] }
  0xfc   : > { %1212 = vmatprep.subr.mxu1 %v872_v21  ;;  %1136 = vmatpush2.msra.mxu0 %v615_v22  ;;  %v807_v55 = vld [vmem:[#allocation5 + $0xd10] sm:$0xff]  ;;  %v544_v56 = vld [vmem:[#allocation5 + $0x4d8] sm:$0xff]  ;;  %v769_v19 = vld [vmem:[#allocation5 + $0xbe0] sm:$0xff] }
  0xfd   : > { %1213 = vmatpush2.msra.mxu1 %v871_v23  ;;  %1137 = vmatprep.subr.mxu0 %v608_v24  ;;  %v800_v57 = vld [vmem:[#allocation5 + $0xcd8] sm:$0xff]  ;;  %v543_v59 = vld [vmem:[#allocation5 + $0x4d0] sm:$0xff]  ;;  %v506_v20 = vld [vmem:[#allocation5 + $0x3a8] sm:$0xff] }
  0xfe   : > { %1214 = vmatprep.subr.mxu1 %v864_v25  ;;  %1138 = vmatpush2.msra.mxu0 %v607_v26  ;;  %v799_v60 = vld [vmem:[#allocation5 + $0xcd0] sm:$0xff]  ;;  %v536_v62 = vld [vmem:[#allocation5 + $0x498] sm:$0xff]  ;;  %v762_v21 = vld [vmem:[#allocation5 + $0xba8] sm:$0xff] }
  0xff   : > { %1215 = vmatpush2.msra.mxu1 %v863_v27  ;;  %1139 = vmatprep.subr.mxu0 %v600_v28  ;;  %v792_v0 = vld [vmem:[#allocation5 + $0xc98] sm:$0xff]  ;;  %v535_v4 = vld [vmem:[#allocation5 + $0x490] sm:$0xff]  ;;  %v505_v22 = vld [vmem:[#allocation5 + $0x3a0] sm:$0xff] }
 0x100   : > { %1216 = vmatprep.subr.mxu1 %v856_v29  ;;  %1140 = vmatpush2.msra.mxu0 %v599_v30  ;;  %v5317_v3 = vld [vmem:[%s5275_s12 + $0x38] sm:$0xff]  ;;  %v791_v6 = vld [vmem:[#allocation5 + $0xc90] sm:$0xff]  ;;  %v761_v23 = vld [vmem:[#allocation5 + $0xba0] sm:$0xff] }
 0x101   : > { %1217 = vmatpush2.msra.mxu1 %v855_v31  ;;  %1141 = vmatprep.subr.mxu0 %v592_v32  ;;  %v528_v7 = vld [vmem:[#allocation5 + $0x458] sm:$0xff]  ;;  %v5321_v8 = vld [vmem:[%s5275_s12 + $0x30] sm:$0xff]  ;;  %v754_v24 = vld [vmem:[#allocation5 + $0xb68] sm:$0xff] }
 0x102   : > { %1218 = vmatprep.subr.mxu1 %v848_v33  ;;  %1142 = vmatpush2.msra.mxu0 %v591_v34  ;;  %v784_v9 = vld [vmem:[#allocation5 + $0xc58] sm:$0xff]  ;;  %v527_v10 = vld [vmem:[#allocation5 + $0x450] sm:$0xff]  ;;  %v490_v25 = vld [vmem:[#allocation5 + $0x328] sm:$0xff] }
 0x103   : > { %1219 = vmatpush2.msra.mxu1 %v847_v35  ;;  %1143 = vmatprep.subr.mxu0 %v584_v36  ;;  %v783_v11 = vld [vmem:[#allocation5 + $0xc50] sm:$0xff]  ;;  %v520_v12 = vld [vmem:[#allocation5 + $0x418] sm:$0xff]  ;;  %v489_v26 = vld [vmem:[#allocation5 + $0x320] sm:$0xff] }
 0x104   : > { %1220 = vmatprep.subr.mxu1 %v840_v37  ;;  %1144 = vmatpush2.msra.mxu0 %v583_v38  ;;  %v776_v13 = vld [vmem:[#allocation5 + $0xc18] sm:$0xff]  ;;  %v519_v14 = vld [vmem:[#allocation5 + $0x410] sm:$0xff]  ;;  %v745_v27 = vld [vmem:[#allocation5 + $0xb20] sm:$0xff] }
 0x105   : > { %1221 = vmatpush2.msra.mxu1 %v839_v39  ;;  %1145 = vmatprep.subr.mxu0 %v576_v40  ;;  %v775_v15 = vld [vmem:[#allocation5 + $0xc10] sm:$0xff]  ;;  %v482_v28 = vld [vmem:[#allocation5 + $0x2e8] sm:$0xff]  ;;  %v481_v30 = vld [vmem:[#allocation5 + $0x2e0] sm:$0xff] }
 0x106   : > { %1222 = vmatprep.subr.mxu1 %v832_v41  ;;  %1146 = vmatpush2.msra.mxu0 %v575_v42  ;;  %v738_v29 = vld [vmem:[#allocation5 + $0xae8] sm:$0xff]  ;;  %v737_v31 = vld [vmem:[#allocation5 + $0xae0] sm:$0xff] }
 0x107   : > { %1223 = vmatpush2.msra.mxu1 %v831_v43  ;;  %1147 = vmatprep.subr.mxu0 %v568_v44  ;;  %v474_v32 = vld [vmem:[#allocation5 + $0x2a8] sm:$0xff]  ;;  %v473_v34 = vld [vmem:[#allocation5 + $0x2a0] sm:$0xff] }
 0x108   : > { %1224 = vmatprep.subr.mxu1 %v824_v45  ;;  %1148 = vmatpush2.msra.mxu0 %v567_v46  ;;  %v730_v33 = vld [vmem:[#allocation5 + $0xaa8] sm:$0xff]  ;;  %v729_v35 = vld [vmem:[#allocation5 + $0xaa0] sm:$0xff] }
 0x109   : > { %1225 = vmatpush2.msra.mxu1 %v823_v47  ;;  %1149 = vmatprep.subr.mxu0 %v560_v48  ;;  %v466_v36 = vld [vmem:[#allocation5 + $0x268] sm:$0xff]  ;;  %v465_v38 = vld [vmem:[#allocation5 + $0x260] sm:$0xff] }
 0x10a   : > { %1226 = vmatprep.subr.mxu1 %v816_v49  ;;  %1150 = vmatpush2.msra.mxu0 %v559_v50  ;;  %v722_v37 = vld [vmem:[#allocation5 + $0xa68] sm:$0xff]  ;;  %v721_v39 = vld [vmem:[#allocation5 + $0xa60] sm:$0xff] }
 0x10b   : > { %1227 = vmatpush2.msra.mxu1 %v815_v51  ;;  %1151 = vmatprep.subr.mxu0 %v552_v52  ;;  %v458_v40 = vld [vmem:[#allocation5 + $0x228] sm:$0xff]  ;;  %v457_v42 = vld [vmem:[#allocation5 + $0x220] sm:$0xff] }
 0x10c   : > { %1228 = vmatprep.subr.mxu1 %v808_v53  ;;  %1152 = vmatpush2.msra.mxu0 %v551_v54  ;;  %v714_v41 = vld [vmem:[#allocation5 + $0xa28] sm:$0xff]  ;;  %v713_v43 = vld [vmem:[#allocation5 + $0xa20] sm:$0xff] }
 0x10d   : > { %1229 = vmatpush2.msra.mxu1 %v807_v55  ;;  %1153 = vmatprep.subr.mxu0 %v544_v56  ;;  %v450_v44 = vld [vmem:[#allocation5 + $0x1e8] sm:$0xff]  ;;  %v449_v46 = vld [vmem:[#allocation5 + $0x1e0] sm:$0xff] }
 0x10e   : > { %1230 = vmatprep.subr.mxu1 %v800_v57  ;;  %1013 = vmatprep.mubr.f32.mxu0 %v5310_v58  ;;  %v706_v45 = vld [vmem:[#allocation5 + $0x9e8] sm:$0xff]  ;;  %v705_v47 = vld [vmem:[#allocation5 + $0x9e0] sm:$0xff] }
 0x10f   : > { %1154 = vmatpush2.msra.mxu0 %v543_v59  ;;  %1231 = vmatpush2.msra.mxu1 %v799_v60  ;;  %v442_v48 = vld [vmem:[#allocation5 + $0x1a8] sm:$0xff]  ;;  %v441_v50 = vld [vmem:[#allocation5 + $0x1a0] sm:$0xff] }
 0x110   : > { %1014 = vmatmul.mubr.f32.gmra.mxu0 %v5313_v61  ;;  %1155 = vmatprep.subr.mxu0 %v536_v62  ;;  %v698_v49 = vld [vmem:[#allocation5 + $0x9a8] sm:$0xff]  ;;  %v697_v51 = vld [vmem:[#allocation5 + $0x9a0] sm:$0xff] }
 0x111   : > { %1232 = vmatprep.subr.mxu1 %v792_v0  ;;  %1090 = vmatprep.mubr.f32.mxu1 %v5317_v3  ;;  %v434_v52 = vld [vmem:[#allocation5 + $0x168] sm:$0xff]  ;;  %v433_v54 = vld [vmem:[#allocation5 + $0x160] sm:$0xff] }
 0x112   : > { %1156 = vmatpush2.msra.mxu0 %v535_v4  ;;  %1233 = vmatpush2.msra.mxu1 %v791_v6  ;;  %v690_v53 = vld [vmem:[#allocation5 + $0x968] sm:$0xff]  ;;  %v689_v55 = vld [vmem:[#allocation5 + $0x960] sm:$0xff] }
 0x113   : > { %1157 = vmatprep.subr.mxu0 %v528_v7  ;;  %1091 = vmatmul.mubr.f32.gmra.mxu1 %v5321_v8  ;;  %v426_v56 = vld [vmem:[#allocation5 + $0x128] sm:$0xff]  ;;  %v425_v59 = vld [vmem:[#allocation5 + $0x120] sm:$0xff] }
 0x114   : > { %1234 = vmatprep.subr.mxu1 %v784_v9  ;;  %1158 = vmatpush2.msra.mxu0 %v527_v10  ;;  %v682_v57 = vld [vmem:[#allocation5 + $0x928] sm:$0xff]  ;;  %v681_v60 = vld [vmem:[#allocation5 + $0x920] sm:$0xff] }
 0x115   : > { %1235 = vmatpush2.msra.mxu1 %v783_v11  ;;  %1159 = vmatprep.subr.mxu0 %v520_v12  ;;  %v418_v62 = vld [vmem:[#allocation5 + $0xe8] sm:$0xff]  ;;  %v417_v4 = vld [vmem:[#allocation5 + $0xe0] sm:$0xff] }
 0x116   : > { %1236 = vmatprep.subr.mxu1 %v776_v13  ;;  %1160 = vmatpush2.msra.mxu0 %v519_v14  ;;  %v674_v0 = vld [vmem:[#allocation5 + $0x8e8] sm:$0xff]  ;;  %v673_v6 = vld [vmem:[#allocation5 + $0x8e0] sm:$0xff] }
 0x117   : > { %1161 = vmatprep.mubr.f32.mxu0 %v5294_v63  ;;  %1237 = vmatpush2.msra.mxu1 %v775_v15  ;;  %v498_v63 = vld [vmem:[#allocation5 + $0x368] sm:$0xff]  ;;  %v409_v10 = vld [vmem:[#allocation5 + $0xa0] sm:$0xff] }
 0x118   : > { %1162 = vmatmul.mubr.f32.vlgmr.msra.gmra.mxu0 %v5297_v1  ;;  %1238 = vmatprep.mubr.f32.mxu1 %v5300_v2  ;;  %v497_v1 = vld [vmem:[#allocation5 + $0x360] sm:$0xff]  ;;  %v410_v7 = vld [vmem:[#allocation5 + $0xa8] sm:$0xff] }
 0x119   : > { %1251 = vmatprep.subr.mxu0 %v514_v16  ;;  %1328 = vmatprep.subr.mxu1 %v770_v17  ;;  %v753_v2 = vld [vmem:[#allocation5 + $0xb60] sm:$0xff]  ;;  %v666_v9 = vld [vmem:[#allocation5 + $0x8a8] sm:$0xff] }
 0x11a   : > { %1239 = vmatmul.mubr.f32.vlgmr.msra.gmra.mxu1 %v5304_v5  ;;  %1252 = vmatpush1.msra.mxu0 %v513_v18  ;;  %v746_v5 = vld [vmem:[#allocation5 + $0xb28] sm:$0xff]  ;;  %v665_v11 = vld [vmem:[#allocation5 + $0x8a0] sm:$0xff] }
 0x11b   : > { %1329 = vmatpush1.msra.mxu1 %v769_v19  ;;  %1253 = vmatprep.subr.mxu0 %v506_v20  ;;  %v402_v12 = vld [vmem:[#allocation5 + $0x68] sm:$0xff]  ;;  %v401_v14 = vld [vmem:[#allocation5 + $0x60] sm:$0xff] }
 0x11c   : > { %1330 = vmatprep.subr.mxu1 %v762_v21  ;;  %1167 = vmatprep.mubr.f32.mxu0 %v5310_v58  ;;  %v658_v13 = vld [vmem:[#allocation5 + $0x868] sm:$0xff]  ;;  %v657_v15 = vld [vmem:[#allocation5 + $0x860] sm:$0xff] }
 0x11d   : > { %1254 = vmatpush1.msra.mxu0 %v505_v22  ;;  %1331 = vmatpush1.msra.mxu1 %v761_v23  ;;  %v394_v16 = vld [vmem:[#allocation5 + $0x28] sm:$0xff]  ;;  %v393_v18 = vld [vmem:[#allocation5 + $0x20] sm:$0xff] }
 0x11e   : > { %1168 = vmatmul.mubr.f32.gmra.mxu0 %v5313_v61  ;;  %1255 = vmatprep.subr.mxu0 %v498_v63  ;;  %v650_v17 = vld [vmem:[#allocation5 + $0x828] sm:$0xff]  ;;  %v649_v19 = vld [vmem:[#allocation5 + $0x820] sm:$0xff] }
 0x11f   : > { %1332 = vmatprep.subr.mxu1 %v754_v24  ;;  %1244 = vmatprep.mubr.f32.mxu1 %v5317_v3  ;;  %v642_v20 = vld [vmem:[#allocation5 + $0x7e8] sm:$0xff]  ;;  %v641_v22 = vld [vmem:[#allocation5 + $0x7e0] sm:$0xff] }
 0x120   : > { %1256 = vmatpush1.msra.mxu0 %v497_v1  ;;  %1333 = vmatpush1.msra.mxu1 %v753_v2  ;;  %v898_v21 = vld [vmem:[#allocation5 + $0xfe8] sm:$0xff]  ;;  %v897_v23 = vld [vmem:[#allocation5 + $0xfe0] sm:$0xff] }
 0x121   : > { %1257 = vmatprep.subr.mxu0 %v490_v25  ;;  %1245 = vmatmul.mubr.f32.gmra.mxu1 %v5321_v8  ;;  %v634_v63 = vld [vmem:[#allocation5 + $0x7a8] sm:$0xff]  ;;  %v633_v1 = vld [vmem:[#allocation5 + $0x7a0] sm:$0xff] }
 0x122   : > { %1334 = vmatprep.subr.mxu1 %v746_v5  ;;  %1258 = vmatpush1.msra.mxu0 %v489_v26  ;;  %v890_v24 = vld [vmem:[#allocation5 + $0xfa8] sm:$0xff]  ;;  %v889_v2 = vld [vmem:[#allocation5 + $0xfa0] sm:$0xff] }
 0x123   : > { %1335 = vmatpush1.msra.mxu1 %v745_v27  ;;  %1259 = vmatprep.subr.mxu0 %v482_v28  ;;  %v626_v25 = vld [vmem:[#allocation5 + $0x768] sm:$0xff]  ;;  %v625_v26 = vld [vmem:[#allocation5 + $0x760] sm:$0xff] }
 0x124   : > { %1336 = vmatprep.subr.mxu1 %v738_v29  ;;  %1260 = vmatpush1.msra.mxu0 %v481_v30  ;;  %v882_v5 = vld [vmem:[#allocation5 + $0xf68] sm:$0xff]  ;;  %v881_v27 = vld [vmem:[#allocation5 + $0xf60] sm:$0xff] }
 0x125   : > { %1337 = vmatpush1.msra.mxu1 %v737_v31  ;;  %1261 = vmatprep.subr.mxu0 %v474_v32  ;;  %v618_v28 = vld [vmem:[#allocation5 + $0x728] sm:$0xff]  ;;  %v617_v30 = vld [vmem:[#allocation5 + $0x720] sm:$0xff] }
 0x126   : > { %1338 = vmatprep.subr.mxu1 %v730_v33  ;;  %1262 = vmatpush1.msra.mxu0 %v473_v34  ;;  %v874_v29 = vld [vmem:[#allocation5 + $0xf28] sm:$0xff]  ;;  %v873_v31 = vld [vmem:[#allocation5 + $0xf20] sm:$0xff] }
 0x127   : > { %1339 = vmatpush1.msra.mxu1 %v729_v35  ;;  %1263 = vmatprep.subr.mxu0 %v466_v36  ;;  %v610_v32 = vld [vmem:[#allocation5 + $0x6e8] sm:$0xff]  ;;  %v609_v34 = vld [vmem:[#allocation5 + $0x6e0] sm:$0xff] }
 0x128   : > { %1340 = vmatprep.subr.mxu1 %v722_v37  ;;  %1264 = vmatpush1.msra.mxu0 %v465_v38  ;;  %v866_v33 = vld [vmem:[#allocation5 + $0xee8] sm:$0xff]  ;;  %v865_v35 = vld [vmem:[#allocation5 + $0xee0] sm:$0xff] }
 0x129   : > { %1341 = vmatpush1.msra.mxu1 %v721_v39  ;;  %1265 = vmatprep.subr.mxu0 %v458_v40  ;;  %v602_v36 = vld [vmem:[#allocation5 + $0x6a8] sm:$0xff]  ;;  %v601_v38 = vld [vmem:[#allocation5 + $0x6a0] sm:$0xff] }
 0x12a   : > { %1342 = vmatprep.subr.mxu1 %v714_v41  ;;  %1266 = vmatpush1.msra.mxu0 %v457_v42  ;;  %v858_v37 = vld [vmem:[#allocation5 + $0xea8] sm:$0xff]  ;;  %v857_v39 = vld [vmem:[#allocation5 + $0xea0] sm:$0xff] }
 0x12b   : > { %1343 = vmatpush1.msra.mxu1 %v713_v43  ;;  %1267 = vmatprep.subr.mxu0 %v450_v44  ;;  %v594_v40 = vld [vmem:[#allocation5 + $0x668] sm:$0xff]  ;;  %v593_v42 = vld [vmem:[#allocation5 + $0x660] sm:$0xff] }
 0x12c   : > { %1344 = vmatprep.subr.mxu1 %v706_v45  ;;  %1268 = vmatpush1.msra.mxu0 %v449_v46  ;;  %v850_v41 = vld [vmem:[#allocation5 + $0xe68] sm:$0xff]  ;;  %v849_v43 = vld [vmem:[#allocation5 + $0xe60] sm:$0xff] }
 0x12d   : > { %1345 = vmatpush1.msra.mxu1 %v705_v47  ;;  %1269 = vmatprep.subr.mxu0 %v442_v48  ;;  %v586_v44 = vld [vmem:[#allocation5 + $0x628] sm:$0xff]  ;;  %v585_v46 = vld [vmem:[#allocation5 + $0x620] sm:$0xff] }
 0x12e   : > { %1346 = vmatprep.subr.mxu1 %v698_v49  ;;  %1270 = vmatpush1.msra.mxu0 %v441_v50  ;;  %v842_v45 = vld [vmem:[#allocation5 + $0xe28] sm:$0xff]  ;;  %v841_v47 = vld [vmem:[#allocation5 + $0xe20] sm:$0xff] }
 0x12f   : > { %1347 = vmatpush1.msra.mxu1 %v697_v51  ;;  %1271 = vmatprep.subr.mxu0 %v434_v52  ;;  %v578_v48 = vld [vmem:[#allocation5 + $0x5e8] sm:$0xff]  ;;  %v577_v50 = vld [vmem:[#allocation5 + $0x5e0] sm:$0xff] }
 0x130   : > { %1348 = vmatprep.subr.mxu1 %v690_v53  ;;  %1272 = vmatpush1.msra.mxu0 %v433_v54  ;;  %v834_v49 = vld [vmem:[#allocation5 + $0xde8] sm:$0xff]  ;;  %v833_v51 = vld [vmem:[#allocation5 + $0xde0] sm:$0xff] }
 0x131   : > { %1349 = vmatpush1.msra.mxu1 %v689_v55  ;;  %1273 = vmatprep.subr.mxu0 %v426_v56  ;;  %v570_v52 = vld [vmem:[#allocation5 + $0x5a8] sm:$0xff]  ;;  %v569_v54 = vld [vmem:[#allocation5 + $0x5a0] sm:$0xff] }
 0x132   : > { %1350 = vmatprep.subr.mxu1 %v682_v57  ;;  %1274 = vmatpush1.msra.mxu0 %v425_v59  ;;  %v826_v53 = vld [vmem:[#allocation5 + $0xda8] sm:$0xff]  ;;  %v825_v55 = vld [vmem:[#allocation5 + $0xda0] sm:$0xff] }
 0x133   : > { %1351 = vmatpush1.msra.mxu1 %v681_v60  ;;  %1275 = vmatprep.subr.mxu0 %v418_v62  ;;  %v562_v56 = vld [vmem:[#allocation5 + $0x568] sm:$0xff]  ;;  %v561_v59 = vld [vmem:[#allocation5 + $0x560] sm:$0xff] }
 0x134   : > { %1352 = vmatprep.subr.mxu1 %v674_v0  ;;  %1276 = vmatpush1.msra.mxu0 %v417_v4  ;;  %v818_v57 = vld [vmem:[#allocation5 + $0xd68] sm:$0xff]  ;;  %v817_v60 = vld [vmem:[#allocation5 + $0xd60] sm:$0xff] }
 0x135   : > { %1353 = vmatpush1.msra.mxu1 %v673_v6  ;;  %1277 = vmatprep.subr.mxu0 %v410_v7  ;;  %v554_v62 = vld [vmem:[#allocation5 + $0x528] sm:$0xff]  ;;  %v553_v4 = vld [vmem:[#allocation5 + $0x520] sm:$0xff] }
 0x136   : > { %1354 = vmatprep.subr.mxu1 %v666_v9  ;;  %1278 = vmatpush1.msra.mxu0 %v409_v10  ;;  %v810_v0 = vld [vmem:[#allocation5 + $0xd28] sm:$0xff]  ;;  %v809_v6 = vld [vmem:[#allocation5 + $0xd20] sm:$0xff] }
 0x137   : > { %1355 = vmatpush1.msra.mxu1 %v665_v11  ;;  %1279 = vmatprep.subr.mxu0 %v402_v12  ;;  %v546_v7 = vld [vmem:[#allocation5 + $0x4e8] sm:$0xff]  ;;  %v545_v10 = vld [vmem:[#allocation5 + $0x4e0] sm:$0xff] }
 0x138   : > { %1356 = vmatprep.subr.mxu1 %v658_v13  ;;  %1280 = vmatpush1.msra.mxu0 %v401_v14  ;;  %v802_v9 = vld [vmem:[#allocation5 + $0xce8] sm:$0xff]  ;;  %v801_v11 = vld [vmem:[#allocation5 + $0xce0] sm:$0xff] }
 0x139   : > { %1357 = vmatpush1.msra.mxu1 %v657_v15  ;;  %1281 = vmatprep.subr.mxu0 %v394_v16  ;;  %v538_v12 = vld [vmem:[#allocation5 + $0x4a8] sm:$0xff]  ;;  %v537_v14 = vld [vmem:[#allocation5 + $0x4a0] sm:$0xff] }
 0x13a   : > { %1358 = vmatprep.subr.mxu1 %v650_v17  ;;  %1282 = vmatpush1.msra.mxu0 %v393_v18  ;;  %v794_v13 = vld [vmem:[#allocation5 + $0xca8] sm:$0xff]  ;;  %v793_v15 = vld [vmem:[#allocation5 + $0xca0] sm:$0xff] }
 0x13b   : > { %1359 = vmatpush1.msra.mxu1 %v649_v19  ;;  %1283 = vmatprep.subr.mxu0 %v642_v20  ;;  %v530_v16 = vld [vmem:[#allocation5 + $0x468] sm:$0xff]  ;;  %v529_v18 = vld [vmem:[#allocation5 + $0x460] sm:$0xff] }
 0x13c   : > { %1360 = vmatprep.subr.mxu1 %v898_v21  ;;  %1284 = vmatpush2.msra.mxu0 %v641_v22  ;;  %v786_v17 = vld [vmem:[#allocation5 + $0xc68] sm:$0xff]  ;;  %v785_v19 = vld [vmem:[#allocation5 + $0xc60] sm:$0xff] }
 0x13d   : > { %1361 = vmatpush2.msra.mxu1 %v897_v23  ;;  %1285 = vmatprep.subr.mxu0 %v634_v63  ;;  %v522_v20 = vld [vmem:[#allocation5 + $0x428] sm:$0xff]  ;;  %v521_v22 = vld [vmem:[#allocation5 + $0x420] sm:$0xff]  ;;  %v516_v63 = vld [vmem:[#allocation5 + $0x3f8] sm:$0xff] }
 0x13e   : > { %1362 = vmatprep.subr.mxu1 %v890_v24  ;;  %1286 = vmatpush2.msra.mxu0 %v633_v1  ;;  %v778_v21 = vld [vmem:[#allocation5 + $0xc28] sm:$0xff]  ;;  %v777_v23 = vld [vmem:[#allocation5 + $0xc20] sm:$0xff]  ;;  %v772_v1 = vld [vmem:[#allocation5 + $0xbf8] sm:$0xff] }
 0x13f   : > { %1363 = vmatpush2.msra.mxu1 %v889_v2  ;;  %1287 = vmatprep.subr.mxu0 %v626_v25  ;;  %v5334_v24 = vld [vmem:[%s5275_s12 + $0x8] sm:$0xff]  ;;  %v5338_v2 = vld [vmem:[%s5275_s12] sm:$0xff]  ;;  %v515_v25 = vld [vmem:[#allocation5 + $0x3f0] sm:$0xff] }
 0x140   : > { %1364 = vmatprep.subr.mxu1 %v882_v5  ;;  %1288 = vmatpush2.msra.mxu0 %v625_v26  ;;  %v771_v5 = vld [vmem:[#allocation5 + $0xbf0] sm:$0xff]  ;;  %v5342_v26 = vld [vmem:[%s5275_s12 + $0x18] sm:$0xff] }
 0x141   : > { %1365 = vmatpush2.msra.mxu1 %v881_v27  ;;  %1289 = vmatprep.subr.mxu0 %v618_v28  ;;  %v508_v27 = vld [vmem:[#allocation5 + $0x3b8] sm:$0xff] }
 0x142   : > { %1366 = vmatprep.subr.mxu1 %v874_v29  ;;  %1290 = vmatpush2.msra.mxu0 %v617_v30  ;;  %v764_v28 = vld [vmem:[#allocation5 + $0xbb8] sm:$0xff]  ;;  %v5346_v29 = vld [vmem:[%s5275_s12 + $0x10] sm:$0xff] }
 0x143   : > { %1367 = vmatpush2.msra.mxu1 %v873_v31  ;;  %1291 = vmatprep.subr.mxu0 %v610_v32  ;;  %v507_v30 = vld [vmem:[#allocation5 + $0x3b0] sm:$0xff]  ;;  %v500_v32 = vld [vmem:[#allocation5 + $0x378] sm:$0xff] }
 0x144   : > { %1368 = vmatprep.subr.mxu1 %v866_v33  ;;  %1292 = vmatpush2.msra.mxu0 %v609_v34  ;;  %v763_v31 = vld [vmem:[#allocation5 + $0xbb0] sm:$0xff]  ;;  %v756_v33 = vld [vmem:[#allocation5 + $0xb78] sm:$0xff] }
 0x145   : > { %1369 = vmatpush2.msra.mxu1 %v865_v35  ;;  %1293 = vmatprep.subr.mxu0 %v602_v36  ;;  %v499_v34 = vld [vmem:[#allocation5 + $0x370] sm:$0xff]  ;;  %v492_v36 = vld [vmem:[#allocation5 + $0x338] sm:$0xff] }
 0x146   : > { %1370 = vmatprep.subr.mxu1 %v858_v37  ;;  %1294 = vmatpush2.msra.mxu0 %v601_v38  ;;  %v755_v35 = vld [vmem:[#allocation5 + $0xb70] sm:$0xff]  ;;  %v748_v37 = vld [vmem:[#allocation5 + $0xb38] sm:$0xff] }
 0x147   : > { %1371 = vmatpush2.msra.mxu1 %v857_v39  ;;  %1295 = vmatprep.subr.mxu0 %v594_v40  ;;  %v491_v38 = vld [vmem:[#allocation5 + $0x330] sm:$0xff]  ;;  %v484_v40 = vld [vmem:[#allocation5 + $0x2f8] sm:$0xff] }
 0x148   : > { %1372 = vmatprep.subr.mxu1 %v850_v41  ;;  %1296 = vmatpush2.msra.mxu0 %v593_v42  ;;  %v747_v39 = vld [vmem:[#allocation5 + $0xb30] sm:$0xff]  ;;  %v740_v41 = vld [vmem:[#allocation5 + $0xaf8] sm:$0xff] }
 0x149   : > { %1373 = vmatpush2.msra.mxu1 %v849_v43  ;;  %1297 = vmatprep.subr.mxu0 %v586_v44  ;;  %v739_v42 = vld [vmem:[#allocation5 + $0xaf0] sm:$0xff]  ;;  %v732_v43 = vld [vmem:[#allocation5 + $0xab8] sm:$0xff] }
 0x14a   : > { %1374 = vmatprep.subr.mxu1 %v842_v45  ;;  %1298 = vmatpush2.msra.mxu0 %v585_v46  ;;  %v475_v44 = vld [vmem:[#allocation5 + $0x2b0] sm:$0xff]  ;;  %v468_v45 = vld [vmem:[#allocation5 + $0x278] sm:$0xff] }
 0x14b   : > { %1375 = vmatpush2.msra.mxu1 %v841_v47  ;;  %1299 = vmatprep.subr.mxu0 %v578_v48  ;;  %v724_v46 = vld [vmem:[#allocation5 + $0xa78] sm:$0xff]  ;;  %v467_v47 = vld [vmem:[#allocation5 + $0x270] sm:$0xff] }
 0x14c   : > { %1376 = vmatprep.subr.mxu1 %v834_v49  ;;  %1300 = vmatpush2.msra.mxu0 %v577_v50  ;;  %v723_v48 = vld [vmem:[#allocation5 + $0xa70] sm:$0xff]  ;;  %v716_v49 = vld [vmem:[#allocation5 + $0xa38] sm:$0xff] }
 0x14d   : > { %1377 = vmatpush2.msra.mxu1 %v833_v51  ;;  %1301 = vmatprep.subr.mxu0 %v570_v52  ;;  %v459_v50 = vld [vmem:[#allocation5 + $0x230] sm:$0xff]  ;;  %v452_v52 = vld [vmem:[#allocation5 + $0x1f8] sm:$0xff] }
 0x14e   : > { %1378 = vmatprep.subr.mxu1 %v826_v53  ;;  %1302 = vmatpush2.msra.mxu0 %v569_v54  ;;  %v715_v51 = vld [vmem:[#allocation5 + $0xa30] sm:$0xff]  ;;  %v708_v53 = vld [vmem:[#allocation5 + $0x9f8] sm:$0xff] }
 0x14f   : > { %1379 = vmatpush2.msra.mxu1 %v825_v55  ;;  %1303 = vmatprep.subr.mxu0 %v562_v56  ;;  %v451_v54 = vld [vmem:[#allocation5 + $0x1f0] sm:$0xff]  ;;  %v444_v56 = vld [vmem:[#allocation5 + $0x1b8] sm:$0xff] }
 0x150   : > { %1380 = vmatprep.subr.mxu1 %v818_v57  ;;  %1304 = vmatpush2.msra.mxu0 %v561_v59  ;;  %v707_v55 = vld [vmem:[#allocation5 + $0x9f0] sm:$0xff]  ;;  %v700_v57 = vld [vmem:[#allocation5 + $0x9b8] sm:$0xff] }
 0x151   : > { %1381 = vmatpush2.msra.mxu1 %v817_v60  ;;  %1305 = vmatprep.subr.mxu0 %v554_v62  ;;  %v443_v59 = vld [vmem:[#allocation5 + $0x1b0] sm:$0xff]  ;;  %v436_v62 = vld [vmem:[#allocation5 + $0x178] sm:$0xff] }
 0x152   : > { %1382 = vmatprep.subr.mxu1 %v810_v0  ;;  %1306 = vmatpush2.msra.mxu0 %v553_v4  ;;  %v699_v60 = vld [vmem:[#allocation5 + $0x9b0] sm:$0xff]  ;;  %v692_v0 = vld [vmem:[#allocation5 + $0x978] sm:$0xff] }
 0x153   : > { %1383 = vmatpush2.msra.mxu1 %v809_v6  ;;  %1307 = vmatprep.subr.mxu0 %v546_v7  ;;  %v435_v4 = vld [vmem:[#allocation5 + $0x170] sm:$0xff]  ;;  %v428_v7 = vld [vmem:[#allocation5 + $0x138] sm:$0xff] }
 0x154   : > { %1384 = vmatprep.subr.mxu1 %v802_v9  ;;  %1308 = vmatpush2.msra.mxu0 %v545_v10  ;;  %v691_v6 = vld [vmem:[#allocation5 + $0x970] sm:$0xff]  ;;  %v684_v9 = vld [vmem:[#allocation5 + $0x938] sm:$0xff] }
 0x155   : > { %1385 = vmatpush2.msra.mxu1 %v801_v11  ;;  %1309 = vmatprep.subr.mxu0 %v538_v12  ;;  %v427_v10 = vld [vmem:[#allocation5 + $0x130] sm:$0xff]  ;;  %v420_v12 = vld [vmem:[#allocation5 + $0xf8] sm:$0xff] }
 0x156   : > { %1386 = vmatprep.subr.mxu1 %v794_v13  ;;  %1310 = vmatpush2.msra.mxu0 %v537_v14  ;;  %v683_v11 = vld [vmem:[#allocation5 + $0x930] sm:$0xff]  ;;  %v676_v13 = vld [vmem:[#allocation5 + $0x8f8] sm:$0xff] }
 0x157   : > { %1387 = vmatpush2.msra.mxu1 %v793_v15  ;;  %1311 = vmatprep.subr.mxu0 %v530_v16  ;;  %v419_v14 = vld [vmem:[#allocation5 + $0xf0] sm:$0xff]  ;;  %v412_v16 = vld [vmem:[#allocation5 + $0xb8] sm:$0xff] }
 0x158   : > { %1388 = vmatprep.subr.mxu1 %v786_v17  ;;  %1312 = vmatpush2.msra.mxu0 %v529_v18  ;;  %v675_v15 = vld [vmem:[#allocation5 + $0x8f0] sm:$0xff]  ;;  %v668_v17 = vld [vmem:[#allocation5 + $0x8b8] sm:$0xff] }
 0x159   : > { %1389 = vmatpush2.msra.mxu1 %v785_v19  ;;  %1313 = vmatprep.subr.mxu0 %v522_v20  ;;  %v411_v18 = vld [vmem:[#allocation5 + $0xb0] sm:$0xff]  ;;  %v404_v20 = vld [vmem:[#allocation5 + $0x78] sm:$0xff] }
 0x15a   : > { %1390 = vmatprep.subr.mxu1 %v778_v21  ;;  %1314 = vmatpush2.msra.mxu0 %v521_v22  ;;  %v667_v19 = vld [vmem:[#allocation5 + $0x8b0] sm:$0xff]  ;;  %v660_v21 = vld [vmem:[#allocation5 + $0x878] sm:$0xff] }
 0x15b   : > { %1315 = vmatprep.mubr.f32.mxu0 %v5334_v24  ;;  %1391 = vmatpush2.msra.mxu1 %v777_v23  ;;  %v403_v22 = vld [vmem:[#allocation5 + $0x70] sm:$0xff] }
 0x15c   : > { %1316 = vmatmul.mubr.f32.vlgmr.msra.gmra.mxu0 %v5338_v2  ;;  %1392 = vmatprep.mubr.f32.mxu1 %v5342_v26  ;;  %v659_v23 = vld [vmem:[#allocation5 + $0x870] sm:$0xff] }
 0x15d   : > { %1405 = vmatprep.subr.mxu0 %v516_v63  ;;  %1482 = vmatprep.subr.mxu1 %v772_v1  ;;  %v396_v63 = vld [vmem:[#allocation5 + $0x38] sm:$0xff] }
 0x15e   : > { %1393 = vmatmul.mubr.f32.vlgmr.msra.gmra.mxu1 %v5346_v29  ;;  %1406 = vmatpush1.msra.mxu0 %v515_v25  ;;  %v652_v1 = vld [vmem:[#allocation5 + $0x838] sm:$0xff]  ;;  %v395_v25 = vld [vmem:[#allocation5 + $0x30] sm:$0xff] }
 0x15f   : > { %1483 = vmatpush1.msra.mxu1 %v771_v5  ;;  %1407 = vmatprep.subr.mxu0 %v508_v27  ;;  %v651_v5 = vld [vmem:[#allocation5 + $0x830] sm:$0xff]  ;;  %v644_v27 = vld [vmem:[#allocation5 + $0x7f8] sm:$0xff] }
 0x160   : > { %1484 = vmatprep.subr.mxu1 %v764_v28  ;;  %1321 = vmatprep.mubr.f32.mxu0 %v5310_v58  ;;  %v483_v58 = vld [vmem:[#allocation5 + $0x2f0] sm:$0xff]  ;;  %v900_v28 = vld [vmem:[#allocation5 + $0xff8] sm:$0xff] }
 0x161   : > { %1408 = vmatpush1.msra.mxu0 %v507_v30  ;;  %1485 = vmatpush1.msra.mxu1 %v763_v31  ;;  %v643_v30 = vld [vmem:[#allocation5 + $0x7f0] sm:$0xff] }
 0x162   : > { %1322 = vmatmul.mubr.f32.gmra.mxu0 %v5313_v61  ;;  %1409 = vmatprep.subr.mxu0 %v500_v32  ;;  %v476_v61 = vld [vmem:[#allocation5 + $0x2b8] sm:$0xff]  ;;  %v899_v31 = vld [vmem:[#allocation5 + $0xff0] sm:$0xff] }
 0x163   : > { %1486 = vmatprep.subr.mxu1 %v756_v33  ;;  %1398 = vmatprep.mubr.f32.mxu1 %v5317_v3  ;;  %v731_v3 = vld [vmem:[#allocation5 + $0xab0] sm:$0xff]  ;;  %v636_v32 = vld [vmem:[#allocation5 + $0x7b8] sm:$0xff] }
 0x164   : > { %1410 = vmatpush1.msra.mxu0 %v499_v34  ;;  %1487 = vmatpush1.msra.mxu1 %v755_v35  ;;  %v892_v33 = vld [vmem:[#allocation5 + $0xfb8] sm:$0xff]  ;;  %v635_v34 = vld [vmem:[#allocation5 + $0x7b0] sm:$0xff] }
 0x165   : > { %1411 = vmatprep.subr.mxu0 %v492_v36  ;;  %1399 = vmatmul.mubr.f32.gmra.mxu1 %v5321_v8  ;;  %v460_v8 = vld [vmem:[#allocation5 + $0x238] sm:$0xff]  ;;  %v891_v35 = vld [vmem:[#allocation5 + $0xfb0] sm:$0xff] }
 0x166   : > { %1488 = vmatprep.subr.mxu1 %v748_v37  ;;  %1412 = vmatpush1.msra.mxu0 %v491_v38  ;;  %v628_v36 = vld [vmem:[#allocation5 + $0x778] sm:$0xff]  ;;  %v627_v38 = vld [vmem:[#allocation5 + $0x770] sm:$0xff] }
 0x167   : > { %1489 = vmatpush1.msra.mxu1 %v747_v39  ;;  %1413 = vmatprep.subr.mxu0 %v484_v40  ;;  %v884_v37 = vld [vmem:[#allocation5 + $0xf78] sm:$0xff]  ;;  %v883_v39 = vld [vmem:[#allocation5 + $0xf70] sm:$0xff] }
 0x168   : > { %1490 = vmatprep.subr.mxu1 %v740_v41  ;;  %1414 = vmatpush1.msra.mxu0 %v483_v58  ;;  %v620_v40 = vld [vmem:[#allocation5 + $0x738] sm:$0xff]  ;;  %v619_v58 = vld [vmem:[#allocation5 + $0x730] sm:$0xff] }
 0x169   : > { %1491 = vmatpush1.msra.mxu1 %v739_v42  ;;  %1415 = vmatprep.subr.mxu0 %v476_v61  ;;  %v876_v41 = vld [vmem:[#allocation5 + $0xf38] sm:$0xff]  ;;  %v875_v42 = vld [vmem:[#allocation5 + $0xf30] sm:$0xff] }
 0x16a   : > { %1492 = vmatprep.subr.mxu1 %v732_v43  ;;  %1416 = vmatpush1.msra.mxu0 %v475_v44  ;;  %v612_v61 = vld [vmem:[#allocation5 + $0x6f8] sm:$0xff]  ;;  %v611_v44 = vld [vmem:[#allocation5 + $0x6f0] sm:$0xff] }
 0x16b   : > { %1493 = vmatpush1.msra.mxu1 %v731_v3  ;;  %1417 = vmatprep.subr.mxu0 %v468_v45  ;;  %v868_v43 = vld [vmem:[#allocation5 + $0xef8] sm:$0xff]  ;;  %v867_v3 = vld [vmem:[#allocation5 + $0xef0] sm:$0xff] }
 0x16c   : > { %1494 = vmatprep.subr.mxu1 %v724_v46  ;;  %1418 = vmatpush1.msra.mxu0 %v467_v47  ;;  %v604_v45 = vld [vmem:[#allocation5 + $0x6b8] sm:$0xff]  ;;  %v603_v47 = vld [vmem:[#allocation5 + $0x6b0] sm:$0xff] }
 0x16d   : > { %1495 = vmatpush1.msra.mxu1 %v723_v48  ;;  %1419 = vmatprep.subr.mxu0 %v460_v8  ;;  %v860_v46 = vld [vmem:[#allocation5 + $0xeb8] sm:$0xff]  ;;  %v859_v48 = vld [vmem:[#allocation5 + $0xeb0] sm:$0xff] }
 0x16e   : > { %1496 = vmatprep.subr.mxu1 %v716_v49  ;;  %1420 = vmatpush1.msra.mxu0 %v459_v50  ;;  %v596_v8 = vld [vmem:[#allocation5 + $0x678] sm:$0xff]  ;;  %v595_v50 = vld [vmem:[#allocation5 + $0x670] sm:$0xff] }
 0x16f   : > { %1497 = vmatpush1.msra.mxu1 %v715_v51  ;;  %1421 = vmatprep.subr.mxu0 %v452_v52  ;;  %v852_v49 = vld [vmem:[#allocation5 + $0xe78] sm:$0xff]  ;;  %v851_v51 = vld [vmem:[#allocation5 + $0xe70] sm:$0xff] }
 0x170   : > { %1498 = vmatprep.subr.mxu1 %v708_v53  ;;  %1422 = vmatpush1.msra.mxu0 %v451_v54  ;;  %v588_v52 = vld [vmem:[#allocation5 + $0x638] sm:$0xff]  ;;  %v903_v54 = vlaneseq }
 0x171   : > { %1499 = vmatpush1.msra.mxu1 %v707_v55  ;;  %1423 = vmatprep.subr.mxu0 %v444_v56  ;;  %v844_v53 = vld [vmem:[#allocation5 + $0xe38] sm:$0xff]  ;;  %v587_v55 = vld [vmem:[#allocation5 + $0x630] sm:$0xff] }
 0x172   : > { %1500 = vmatprep.subr.mxu1 %v700_v57  ;;  %1424 = vmatpush1.msra.mxu0 %v443_v59  ;;  %v843_v56 = vld [vmem:[#allocation5 + $0xe30] sm:$0xff]  ;;  %v580_v57 = vld [vmem:[#allocation5 + $0x5f8] sm:$0xff] }
 0x173   : > { %1501 = vmatpush1.msra.mxu1 %v699_v60  ;;  %1425 = vmatprep.subr.mxu0 %v436_v62  ;;  %v836_v59 = vld [vmem:[#allocation5 + $0xdf8] sm:$0xff]  ;;  %v579_v60 = vld [vmem:[#allocation5 + $0x5f0] sm:$0xff] }
 0x174   : > { %1502 = vmatprep.subr.mxu1 %v692_v0  ;;  %1426 = vmatpush1.msra.mxu0 %v435_v4  ;;  %v835_v62 = vld [vmem:[#allocation5 + $0xdf0] sm:$0xff]  ;;  %v572_v0 = vld [vmem:[#allocation5 + $0x5b8] sm:$0xff] }
 0x175   : > { %1503 = vmatpush1.msra.mxu1 %v691_v6  ;;  %1427 = vmatprep.subr.mxu0 %v428_v7  ;;  %v828_v4 = vld [vmem:[#allocation5 + $0xdb8] sm:$0xff]  ;;  %v5353_v6 = vshrl.u32 %v903_v54, 7  ;;  %v571_v7 = vld [vmem:[#allocation5 + $0x5b0] sm:$0xff] }
 0x176   : > { %1504 = vmatprep.subr.mxu1 %v684_v9  ;;  %1428 = vmatpush1.msra.mxu0 %v427_v10  ;;  %v827_v9 = vld [vmem:[#allocation5 + $0xdb0] sm:$0xff]  ;;  %v564_v10 = vld [vmem:[#allocation5 + $0x578] sm:$0xff] }
 0x177   : > { %1505 = vmatpush1.msra.mxu1 %v683_v11  ;;  %1429 = vmatprep.subr.mxu0 %v420_v12  ;;  %v820_v11 = vld [vmem:[#allocation5 + $0xd78] sm:$0xff]  ;;  %v563_v12 = vld [vmem:[#allocation5 + $0x570] sm:$0xff] }
 0x178   : > { %1506 = vmatprep.subr.mxu1 %v676_v13  ;;  %1430 = vmatpush1.msra.mxu0 %v419_v14  ;;  %v819_v13 = vld [vmem:[#allocation5 + $0xd70] sm:$0xff]  ;;  %v556_v14 = vld [vmem:[#allocation5 + $0x538] sm:$0xff] }
 0x179   : > { %1507 = vmatpush1.msra.mxu1 %v675_v15  ;;  %1431 = vmatprep.subr.mxu0 %v412_v16  ;;  %v812_v15 = vld [vmem:[#allocation5 + $0xd38] sm:$0xff]  ;;  %v909_v16 = vsub.s32 1, %v5353_v6  ;;  %v1936_v54 = vld [vmem:[#allocation8 + $0xb48] sm:$0xff] }
 0x17a   : > { %1508 = vmatprep.subr.mxu1 %v668_v17  ;;  %1432 = vmatpush1.msra.mxu0 %v411_v18  ;;  %v555_v17 = vld [vmem:[#allocation5 + $0x530] sm:$0xff] }
 0x17b   : > { %1509 = vmatpush1.msra.mxu1 %v667_v19  ;;  %1433 = vmatprep.subr.mxu0 %v404_v20  ;;  %v811_v18 = vld [vmem:[#allocation5 + $0xd30] sm:$0xff]  ;;  %v5356_v19 = vld [vmem:[#allocation7] sm:$0xff] }
 0x17c   : > { %1510 = vmatprep.subr.mxu1 %v660_v21  ;;  %1434 = vmatpush1.msra.mxu0 %v403_v22  ;;  %v548_v21 = vld [vmem:[#allocation5 + $0x4f8] sm:$0xff] }
 0x17d   : > { %1511 = vmatpush1.msra.mxu1 %v659_v23  ;;  %1435 = vmatprep.subr.mxu0 %v396_v63  ;;  %v804_v22 = vld [vmem:[#allocation5 + $0xcf8] sm:$0xff]  ;;  %v547_v23 = vld [vmem:[#allocation5 + $0x4f0] sm:$0xff] }
 0x17e   : > { %1512 = vmatprep.subr.mxu1 %v652_v1  ;;  %1436 = vmatpush1.msra.mxu0 %v395_v25  ;;  %v803_v63 = vld [vmem:[#allocation5 + $0xcf0] sm:$0xff]  ;;  %v540_v1 = vld [vmem:[#allocation5 + $0x4b8] sm:$0xff] }
 0x17f   : > { %1513 = vmatpush1.msra.mxu1 %v651_v5  ;;  %1437 = vmatprep.subr.mxu0 %v644_v27  ;;  %v796_v25 = vld [vmem:[#allocation5 + $0xcb8] sm:$0xff]  ;;  %v5363_v5 = vrot.slane %v5356_v19, %v909_v16  ;;  %v539_v27 = vld [vmem:[#allocation5 + $0x4b0] sm:$0xff] }
 0x180   : > { %1514 = vmatprep.subr.mxu1 %v900_v28  ;;  %1438 = vmatpush2.msra.mxu0 %v643_v30  ;;  %v795_v28 = vld [vmem:[#allocation5 + $0xcb0] sm:$0xff] }
 0x181   : > { %1515 = vmatpush2.msra.mxu1 %v899_v31  ;;  %1439 = vmatprep.subr.mxu0 %v636_v32  ;;  %v532_v32 = vld [vmem:[#allocation5 + $0x478] sm:$0xff] }
 0x182   : > { %1516 = vmatprep.subr.mxu1 %v892_v33  ;;  %1440 = vmatpush2.msra.mxu0 %v635_v34  ;;  %v788_v33 = vld [vmem:[#allocation5 + $0xc78] sm:$0xff]  ;;  %v531_v34 = vld [vmem:[#allocation5 + $0x470] sm:$0xff] }
 0x183   : > { %1517 = vmatpush2.msra.mxu1 %v891_v35  ;;  %1441 = vmatprep.subr.mxu0 %v628_v36  ;;  %v787_v35 = vld [vmem:[#allocation5 + $0xc70] sm:$0xff]  ;;  %v524_v36 = vld [vmem:[#allocation5 + $0x438] sm:$0xff] }
 0x184   : > { %1518 = vmatprep.subr.mxu1 %v884_v37  ;;  %1442 = vmatpush2.msra.mxu0 %v627_v38  ;;  %v780_v37 = vld [vmem:[#allocation5 + $0xc38] sm:$0xff] }
 0x185   : > { %1519 = vmatpush2.msra.mxu1 %v883_v39  ;;  %1443 = vmatprep.subr.mxu0 %v620_v40  ;;  %v523_v39 = vld [vmem:[#allocation5 + $0x430] sm:$0xff] }
 0x186   : > { %1520 = vmatprep.subr.mxu1 %v876_v41  ;;  %1444 = vmatpush2.msra.mxu0 %v619_v58  ;;  %v779_v41 = vld [vmem:[#allocation5 + $0xc30] sm:$0xff] }
 0x187   : > { %1521 = vmatpush2.msra.mxu1 %v875_v42  ;;  %1445 = vmatprep.subr.mxu0 %v612_v61  ;;  %v1696_v58 = vld [vmem:[#allocation8 + $0x3c8] sm:$0xff]  ;;  %v1695_v61 = vld [vmem:[#allocation8 + $0x3c0] sm:$0xff] }
 0x188   : > { %1522 = vmatprep.subr.mxu1 %v868_v43  ;;  %1446 = vmatpush2.msra.mxu0 %v611_v44  ;;  %v1688_v43 = vld [vmem:[#allocation8 + $0x388] sm:$0xff] }
 0x189   : > { %1523 = vmatpush2.msra.mxu1 %v867_v3  ;;  %1447 = vmatprep.subr.mxu0 %v604_v45  ;;  %v1952_v44 = vld [vmem:[#allocation8 + $0xbc8] sm:$0xff]  ;;  %v4772_v3 = vld [vmem:[%s5275_s12 + $0x28] sm:$0xff] }
 0x18a   : > { %1524 = vmatprep.subr.mxu1 %v860_v46  ;;  %1448 = vmatpush2.msra.mxu0 %v603_v47  ;;  %v1687_v45 = vld [vmem:[#allocation8 + $0x380] sm:$0xff]  ;;  %v1680_v46 = vld [vmem:[#allocation8 + $0x348] sm:$0xff]  ;;  %v4773_v47 = vld [vmem:[%s5275_s12 + $0x38] sm:$0xff] }
 0x18b   : > { %1525 = vmatpush2.msra.mxu1 %v859_v48  ;;  %1449 = vmatprep.subr.mxu0 %v596_v8  ;;  %v1951_v48 = vld [vmem:[#allocation8 + $0xbc0] sm:$0xff]  ;;  %v4775_v8 = vld [vmem:[%s5275_s12 + $0x20] sm:$0xff] }
 0x18c   : > { %1526 = vmatprep.subr.mxu1 %v852_v49  ;;  %1450 = vmatpush2.msra.mxu0 %v595_v50  ;;  %v1671_v49 = vld [vmem:[#allocation8 + $0x300] sm:$0xff]  ;;  %v1944_v50 = vld [vmem:[#allocation8 + $0xb88] sm:$0xff] }
 0x18d   : > { %1527 = vmatpush2.msra.mxu1 %v851_v51  ;;  %1451 = vmatprep.subr.mxu0 %v588_v52  ;;  %v1664_v51 = vld [vmem:[#allocation8 + $0x2c8] sm:$0xff]  ;;  %v1943_v52 = vld [vmem:[#allocation8 + $0xb80] sm:$0xff] }
 0x18e   : > { %1528 = vmatprep.subr.mxu1 %v844_v53  ;;  %1452 = vmatpush2.msra.mxu0 %v587_v55  ;;  %v1663_v53 = vld [vmem:[#allocation8 + $0x2c0] sm:$0xff]  ;;  %v1656_v55 = vld [vmem:[#allocation8 + $0x288] sm:$0xff] }
 0x18f   : > { %1529 = vmatpush2.msra.mxu1 %v843_v56  ;;  %1453 = vmatprep.subr.mxu0 %v580_v57  ;;  %v1935_v56 = vld [vmem:[#allocation8 + $0xb40] sm:$0xff] }
 0x190   : > { %1530 = vmatprep.subr.mxu1 %v836_v59  ;;  %1454 = vmatpush2.msra.mxu0 %v579_v60  ;;  %v1655_v57 = vld [vmem:[#allocation8 + $0x280] sm:$0xff]  ;;  %v1928_v59 = vld [vmem:[#allocation8 + $0xb08] sm:$0xff] }
 0x191   : > { %1531 = vmatpush2.msra.mxu1 %v835_v62  ;;  %1455 = vmatprep.subr.mxu0 %v572_v0  ;;  %v1648_v60 = vld [vmem:[#allocation8 + $0x248] sm:$0xff]  ;;  %v1927_v62 = vld [vmem:[#allocation8 + $0xb00] sm:$0xff] }
 0x192   : > { %1532 = vmatprep.subr.mxu1 %v828_v4  ;;  %1456 = vmatpush2.msra.mxu0 %v571_v7  ;;  %v1647_v0 = vld [vmem:[#allocation8 + $0x240] sm:$0xff]  ;;  %v1920_v4 = vld [vmem:[#allocation8 + $0xac8] sm:$0xff] }
 0x193   : > { %1533 = vmatpush2.msra.mxu1 %v827_v9  ;;  %1457 = vmatprep.subr.mxu0 %v564_v10  ;;  %v1640_v7 = vld [vmem:[#allocation8 + $0x208] sm:$0xff]  ;;  %v1919_v9 = vld [vmem:[#allocation8 + $0xac0] sm:$0xff] }
 0x194   : > { %1534 = vmatprep.subr.mxu1 %v820_v11  ;;  %v5358_v20 = vpop.f32.mrf.mxu0  ;;  %1458 = vmatpush2.msra.mxu0 %v563_v12  ;;  %v1639_v10 = vld [vmem:[#allocation8 + $0x200] sm:$0xff]  ;;  %v1912_v11 = vld [vmem:[#allocation8 + $0xa88] sm:$0xff] }
 0x195   : > { %1535 = vmatpush2.msra.mxu1 %v819_v13  ;;  %1459 = vmatprep.subr.mxu0 %v556_v14  ;;  %v1632_v12 = vld [vmem:[#allocation8 + $0x1c8] sm:$0xff]  ;;  %v1911_v13 = vld [vmem:[#allocation8 + $0xa80] sm:$0xff] }
 0x196   : > { %1536 = vmatprep.subr.mxu1 %v812_v15  ;;  %1460 = vmatpush2.msra.mxu0 %v555_v17  ;;  %v5365_v30 = vpop.f32.mrf.mxu1  ;;  %v1011_v31 = vpop.f32.mrf.mxu0  ;;  %v1631_v14 = vld [vmem:[#allocation8 + $0x1c0] sm:$0xff]  ;;  %v1904_v15 = vld [vmem:[#allocation8 + $0xa48] sm:$0xff] }
 0x197   : > { %1537 = vmatpush2.msra.mxu1 %v811_v18  ;;  %1461 = vmatprep.subr.mxu0 %v548_v21  ;;  %v1012_v38 = vadd.f32 %v1011_v31, %v5363_v5  ;;  %v1624_v17 = vld [vmem:[#allocation8 + $0x188] sm:$0xff]  ;;  %v1903_v18 = vld [vmem:[#allocation8 + $0xa40] sm:$0xff] }
 0x198   : > { %1538 = vmatprep.subr.mxu1 %v804_v22  ;;  %1462 = vmatpush2.msra.mxu0 %v547_v23  ;;  %v1088_v40 = vpop.f32.mrf.mxu1  ;;  %v1623_v21 = vld [vmem:[#allocation8 + $0x180] sm:$0xff]  ;;  %v1896_v22 = vld [vmem:[#allocation8 + $0xa08] sm:$0xff] }
 0x199   : > { %1539 = vmatpush2.msra.mxu1 %v803_v63  ;;  %1463 = vmatprep.subr.mxu0 %v540_v1  ;;  %v1089_v42 = vadd.f32 %v1088_v40, %v1012_v38  ;;  %v1616_v23 = vld [vmem:[#allocation8 + $0x148] sm:$0xff]  ;;  %v1895_v63 = vld [vmem:[#allocation8 + $0xa00] sm:$0xff] }
 0x19a   : > { %1540 = vmatprep.subr.mxu1 %v796_v25  ;;  %1464 = vmatpush2.msra.mxu0 %v539_v27  ;;  %v1615_v1 = vld [vmem:[#allocation8 + $0x140] sm:$0xff]  ;;  %v1888_v25 = vld [vmem:[#allocation8 + $0x9c8] sm:$0xff] }
 0x19b   : > { %1541 = vmatpush2.msra.mxu1 %v795_v28  ;;  %1465 = vmatprep.subr.mxu0 %v532_v32  ;;  %v1608_v27 = vld [vmem:[#allocation8 + $0x108] sm:$0xff]  ;;  %v1887_v28 = vld [vmem:[#allocation8 + $0x9c0] sm:$0xff] }
 0x19c   : > { %1542 = vmatprep.subr.mxu1 %v788_v33  ;;  %1466 = vmatpush2.msra.mxu0 %v531_v34  ;;  %v1607_v31 = vld [vmem:[#allocation8 + $0x100] sm:$0xff]  ;;  %v1880_v32 = vld [vmem:[#allocation8 + $0x988] sm:$0xff] }
 0x19d   : > { %1543 = vmatpush2.msra.mxu1 %v787_v35  ;;  %1467 = vmatprep.subr.mxu0 %v524_v36  ;;  %v1600_v33 = vld [vmem:[#allocation8 + $0xc8] sm:$0xff]  ;;  %v1879_v34 = vld [vmem:[#allocation8 + $0x980] sm:$0xff] }
 0x19e   : > { %1544 = vmatprep.subr.mxu1 %v780_v37  ;;  %1468 = vmatpush2.msra.mxu0 %v523_v39  ;;  %v1599_v35 = vld [vmem:[#allocation8 + $0xc0] sm:$0xff]  ;;  %v1872_v36 = vld [vmem:[#allocation8 + $0x948] sm:$0xff] }
 0x19f   : > { %1469 = vmatprep.mubr.f32.mxu0 %v5334_v24  ;;  %1545 = vmatpush2.msra.mxu1 %v779_v41  ;;  %v5373_v24 = vmax.f32 %v1089_v42, 0.0  ;;  %v1592_v37 = vld [vmem:[#allocation8 + $0x88] sm:$0xff]  ;;  %v1871_v38 = vld [vmem:[#allocation8 + $0x940] sm:$0xff] }
 0x1a0   : > { %1546 = vmatprep.mubr.f32.mxu1 %v5342_v26  ;;  %1470 = vmatmul.mubr.f32.vlgmr.msra.gmra.mxu0 %v5338_v2  ;;  %v1679_v26 = vld [vmem:[#allocation8 + $0x340] sm:$0xff]  ;;  %v4774_v2 = vld [vmem:[%s5275_s12 + $0x30] sm:$0xff] }
 0x1a1   : > { %1547 = vmatmul.mubr.f32.vlgmr.msra.gmra.mxu1 %v5346_v29  ;;  %2641 = vmatprep.subr.mxu0 %v1696_v58  ;;  %v1672_v29 = vld [vmem:[#allocation8 + $0x308] sm:$0xff]  ;;  %v1591_v39 = vld [vmem:[#allocation8 + $0x80] sm:$0xff] }
 0x1a2   : > { %1475 = vmatprep.mubr.f32.mxu0 %v4772_v3  ;;  %2642 = vmatpush1.msra.mxu0 %v1695_v61  ;;  %v1864_v40 = vld [vmem:[#allocation8 + $0x908] sm:$0xff]  ;;  %v1863_v58 = vld [vmem:[#allocation8 + $0x900] sm:$0xff] }
 0x1a3   : > { %1552 = vmatprep.mubr.f32.mxu1 %v4773_v47  ;;  %2643 = vmatprep.subr.mxu0 %v1688_v43  ;;  %v1584_v41 = vld [vmem:[#allocation8 + $0x48] sm:$0xff]  ;;  %v1583_v42 = vld [vmem:[#allocation8 + $0x40] sm:$0xff] }
 0x1a4   : > { %2718 = vmatprep.subr.mxu1 %v1952_v44  ;;  %2644 = vmatpush1.msra.mxu0 %v1687_v45  ;;  %v1856_v61 = vld [vmem:[#allocation8 + $0x8c8] sm:$0xff]  ;;  %v1855_v44 = vld [vmem:[#allocation8 + $0x8c0] sm:$0xff] }
 0x1a5   : > { %1553 = vmatmul.mubr.f32.gmra.mxu1 %v4774_v2  ;;  %1476 = vmatmul.mubr.f32.gmra.mxu0 %v4775_v8  ;;  %v1576_v43 = vld [vmem:[#allocation8 + $0x8] sm:$0xff]  ;;  %v1575_v3 = vld [vmem:[#allocation8] sm:$0xff] }
 0x1a6   : > { %2645 = vmatprep.subr.mxu0 %v1680_v46  ;;  %2705 = vmatprep.mubr.f32.mxu0 %v5373_v24  ;;  %v1848_v45 = vld [vmem:[#allocation8 + $0x888] sm:$0xff]  ;;  %v1847_v47 = vld [vmem:[#allocation8 + $0x880] sm:$0xff] }
 0x1a7   : > { %2646 = vmatpush1.msra.mxu0 %v1679_v26  ;;  %2719 = vmatpush1.msra.mxu1 %v1951_v48  ;;  %v1824_v46 = vld [vmem:[#allocation8 + $0x7c8] sm:$0xff]  ;;  %v1823_v26 = vld [vmem:[#allocation8 + $0x7c0] sm:$0xff] }
 0x1a8   : > { %2647 = vmatprep.subr.mxu0 %v1672_v29  ;;  %2720 = vmatprep.subr.mxu1 %v1944_v50  ;;  %v1840_v2 = vld [vmem:[#allocation8 + $0x848] sm:$0xff]  ;;  %v1839_v48 = vld [vmem:[#allocation8 + $0x840] sm:$0xff] }
 0x1a9   : > { %2648 = vmatpush1.msra.mxu0 %v1671_v49  ;;  %2721 = vmatpush1.msra.mxu1 %v1943_v52  ;;  %v1816_v29 = vld [vmem:[#allocation8 + $0x788] sm:$0xff]  ;;  %v1815_v8 = vld [vmem:[#allocation8 + $0x780] sm:$0xff] }
 0x1aa   : > { %2649 = vmatprep.subr.mxu0 %v1664_v51  ;;  %2722 = vmatprep.subr.mxu1 %v1936_v54  ;;  %v1832_v49 = vld [vmem:[#allocation8 + $0x808] sm:$0xff]  ;;  %v1831_v51 = vld [vmem:[#allocation8 + $0x800] sm:$0xff] }
 0x1ab   : > { %2650 = vmatpush1.msra.mxu0 %v1663_v53  ;;  %2723 = vmatpush1.msra.mxu1 %v1935_v56  ;;  %v1808_v50 = vld [vmem:[#allocation8 + $0x748] sm:$0xff]  ;;  %v1807_v52 = vld [vmem:[#allocation8 + $0x740] sm:$0xff] }
 0x1ac   : > { %2651 = vmatprep.subr.mxu0 %v1656_v55  ;;  %2724 = vmatprep.subr.mxu1 %v1928_v59  ;;  %v2080_v53 = vld [vmem:[#allocation8 + $0xfc8] sm:$0xff]  ;;  %v2079_v55 = vld [vmem:[#allocation8 + $0xfc0] sm:$0xff] }
 0x1ad   : > { %2652 = vmatpush1.msra.mxu0 %v1655_v57  ;;  %2725 = vmatpush1.msra.mxu1 %v1927_v62  ;;  %v1800_v54 = vld [vmem:[#allocation8 + $0x708] sm:$0xff]  ;;  %v1799_v56 = vld [vmem:[#allocation8 + $0x700] sm:$0xff] }
 0x1ae   : > { %2653 = vmatprep.subr.mxu0 %v1648_v60  ;;  %2726 = vmatprep.subr.mxu1 %v1920_v4  ;;  %v2072_v57 = vld [vmem:[#allocation8 + $0xf88] sm:$0xff]  ;;  %v2071_v60 = vld [vmem:[#allocation8 + $0xf80] sm:$0xff] }
 0x1af   : > { %2654 = vmatpush1.msra.mxu0 %v1647_v0  ;;  %2727 = vmatpush1.msra.mxu1 %v1919_v9  ;;  %v1792_v59 = vld [vmem:[#allocation8 + $0x6c8] sm:$0xff]  ;;  %v1791_v62 = vld [vmem:[#allocation8 + $0x6c0] sm:$0xff] }
 0x1b0   : > { %2655 = vmatprep.subr.mxu0 %v1640_v7  ;;  %2728 = vmatprep.subr.mxu1 %v1912_v11  ;;  %v2064_v0 = vld [vmem:[#allocation8 + $0xf48] sm:$0xff]  ;;  %v2063_v7 = vld [vmem:[#allocation8 + $0xf40] sm:$0xff] }
 0x1b1   : > { %2656 = vmatpush1.msra.mxu0 %v1639_v10  ;;  %2729 = vmatpush1.msra.mxu1 %v1911_v13  ;;  %v1784_v4 = vld [vmem:[#allocation8 + $0x688] sm:$0xff]  ;;  %v1783_v9 = vld [vmem:[#allocation8 + $0x680] sm:$0xff] }
 0x1b2   : > { %2657 = vmatprep.subr.mxu0 %v1632_v12  ;;  %2730 = vmatprep.subr.mxu1 %v1904_v15  ;;  %v2056_v10 = vld [vmem:[#allocation8 + $0xf08] sm:$0xff]  ;;  %v2055_v12 = vld [vmem:[#allocation8 + $0xf00] sm:$0xff] }
 0x1b3   : > { %2658 = vmatpush1.msra.mxu0 %v1631_v14  ;;  %2731 = vmatpush1.msra.mxu1 %v1903_v18  ;;  %v1776_v11 = vld [vmem:[#allocation8 + $0x648] sm:$0xff]  ;;  %v1775_v13 = vld [vmem:[#allocation8 + $0x640] sm:$0xff] }
 0x1b4   : > { %2659 = vmatprep.subr.mxu0 %v1624_v17  ;;  %2732 = vmatprep.subr.mxu1 %v1896_v22  ;;  %v2048_v14 = vld [vmem:[#allocation8 + $0xec8] sm:$0xff]  ;;  %v2047_v17 = vld [vmem:[#allocation8 + $0xec0] sm:$0xff] }
 0x1b5   : > { %2660 = vmatpush1.msra.mxu0 %v1623_v21  ;;  %2733 = vmatpush1.msra.mxu1 %v1895_v63  ;;  %v1768_v15 = vld [vmem:[#allocation8 + $0x608] sm:$0xff]  ;;  %v1767_v18 = vld [vmem:[#allocation8 + $0x600] sm:$0xff]  ;;  %v905_v63 = vsub.s32 0, %v5353_v6 }
 0x1b6   : > { %2661 = vmatprep.subr.mxu0 %v1616_v23  ;;  %2734 = vmatprep.subr.mxu1 %v1888_v25  ;;  %v2040_v21 = vld [vmem:[#allocation8 + $0xe88] sm:$0xff]  ;;  %v2039_v23 = vld [vmem:[#allocation8 + $0xe80] sm:$0xff] }
 0x1b7   : > { %2662 = vmatpush1.msra.mxu0 %v1615_v1  ;;  %2735 = vmatpush1.msra.mxu1 %v1887_v28  ;;  %v1760_v22 = vld [vmem:[#allocation8 + $0x5c8] sm:$0xff]  ;;  %v1759_v1 = vld [vmem:[#allocation8 + $0x5c0] sm:$0xff] }
 0x1b8   : > { %2663 = vmatprep.subr.mxu0 %v1608_v27  ;;  %2736 = vmatprep.subr.mxu1 %v1880_v32  ;;  %v2032_v25 = vld [vmem:[#allocation8 + $0xe48] sm:$0xff]  ;;  %v1751_v32 = vld [vmem:[#allocation8 + $0x580] sm:$0xff] }
 0x1b9   : > { %2664 = vmatpush1.msra.mxu0 %v1607_v31  ;;  %2737 = vmatpush1.msra.mxu1 %v1879_v34  ;;  %v1752_v28 = vld [vmem:[#allocation8 + $0x588] sm:$0xff]  ;;  %v2031_v31 = vld [vmem:[#allocation8 + $0xe40] sm:$0xff] }
 0x1ba   : > { %2665 = vmatprep.subr.mxu0 %v1600_v33  ;;  %2738 = vmatprep.subr.mxu1 %v1872_v36  ;;  %v2024_v33 = vld [vmem:[#allocation8 + $0xe08] sm:$0xff]  ;;  %v917_v36 = vsub.s32 3, %v5353_v6 }
 0x1bb   : > { %2666 = vmatpush1.msra.mxu0 %v1599_v35  ;;  %2739 = vmatpush1.msra.mxu1 %v1871_v38  ;;  %v1744_v34 = vld [vmem:[#allocation8 + $0x548] sm:$0xff]  ;;  %v2023_v35 = vld [vmem:[#allocation8 + $0xe00] sm:$0xff] }
 0x1bc   : > { %2667 = vmatprep.subr.mxu0 %v1592_v37  ;;  %2740 = vmatprep.subr.mxu1 %v1864_v40  ;;  %v906_v37 = vrot.slane %v5356_v19, %v905_v63  ;;  %v1743_v38 = vld [vmem:[#allocation8 + $0x540] sm:$0xff] }
 0x1bd   : > { %2668 = vmatpush1.msra.mxu0 %v1591_v39  ;;  %2741 = vmatpush1.msra.mxu1 %v1863_v58  ;;  %v2016_v39 = vld [vmem:[#allocation8 + $0xdc8] sm:$0xff] }
 0x1be   : > { %2669 = vmatprep.subr.mxu0 %v1584_v41  ;;  %2742 = vmatprep.subr.mxu1 %v1856_v61  ;;  %v1736_v58 = vld [vmem:[#allocation8 + $0x508] sm:$0xff]  ;;  %v913_v61 = vsub.s32 2, %v5353_v6 }
 0x1bf   : > { %2670 = vmatpush1.msra.mxu0 %v1583_v42  ;;  %2743 = vmatpush1.msra.mxu1 %v1855_v44  ;;  %v2015_v42 = vld [vmem:[#allocation8 + $0xdc0] sm:$0xff]  ;;  %v2008_v44 = vld [vmem:[#allocation8 + $0xd88] sm:$0xff] }
 0x1c0   : > { %2671 = vmatprep.subr.mxu0 %v1576_v43  ;;  %2744 = vmatprep.subr.mxu1 %v1848_v45  ;;  %v1735_v43 = vld [vmem:[#allocation8 + $0x500] sm:$0xff]  ;;  %v1728_v45 = vld [vmem:[#allocation8 + $0x4c8] sm:$0xff] }
 0x1c1   : > { %2672 = vmatpush1.msra.mxu0 %v1575_v3  ;;  %2745 = vmatpush1.msra.mxu1 %v1847_v47  ;;  %v2007_v47 = vld [vmem:[#allocation8 + $0xd80] sm:$0xff] }
 0x1c2   : > { %2673 = vmatprep.subr.mxu0 %v1824_v46  ;;  %2746 = vmatprep.subr.mxu1 %v1840_v2  ;;  %v1010_v2 = vadd.f32 %v5358_v20, %v906_v37 }
 0x1c3   : > { %2674 = vmatpush2.msra.mxu0 %v1823_v26  ;;  %2747 = vmatpush1.msra.mxu1 %v1839_v48  ;;  %v918_v26 = vrot.slane %v5356_v19, %v917_v36  ;;  %v2000_v48 = vld [vmem:[#allocation8 + $0xd48] sm:$0xff] }
 0x1c4   : > { %2675 = vmatprep.subr.mxu0 %v1816_v29  ;;  %2748 = vmatprep.subr.mxu1 %v1832_v49  ;;  %v1727_v29 = vld [vmem:[#allocation8 + $0x4c0] sm:$0xff]  ;;  %v1720_v49 = vld [vmem:[#allocation8 + $0x488] sm:$0xff] }
 0x1c5   : > { %2676 = vmatpush2.msra.mxu0 %v1815_v8  ;;  %2749 = vmatpush1.msra.mxu1 %v1831_v51 }
 0x1c6   : > { %2677 = vmatprep.subr.mxu0 %v1808_v50  ;;  %2750 = vmatprep.subr.mxu1 %v2080_v53  ;;  %v1999_v50 = vld [vmem:[#allocation8 + $0xd40] sm:$0xff]  ;;  %v1992_v53 = vld [vmem:[#allocation8 + $0xd08] sm:$0xff] }
 0x1c7   : > { %2678 = vmatpush2.msra.mxu0 %v1807_v52  ;;  %2751 = vmatpush2.msra.mxu1 %v2079_v55  ;;  %v1719_v52 = vld [vmem:[#allocation8 + $0x480] sm:$0xff]  ;;  %v1712_v55 = vld [vmem:[#allocation8 + $0x448] sm:$0xff] }
 0x1c8   : > { %2679 = vmatprep.subr.mxu0 %v1800_v54  ;;  %2752 = vmatprep.subr.mxu1 %v2072_v57  ;;  %v1991_v57 = vld [vmem:[#allocation8 + $0xd00] sm:$0xff] }
 0x1c9   : > { %2680 = vmatpush2.msra.mxu0 %v1799_v56  ;;  %2753 = vmatpush2.msra.mxu1 %v2071_v60  ;;  %v1087_v60 = vadd.f32 %v5365_v30, %v1010_v2  ;;  %v2183_v2 = vld [vmem:[#allocation8 + $0x1300] sm:$0xff] }
 0x1ca   : > { %2681 = vmatprep.subr.mxu0 %v1792_v59  ;;  %2754 = vmatprep.subr.mxu1 %v2064_v0  ;;  %v1984_v0 = vld [vmem:[#allocation8 + $0xcc8] sm:$0xff] }
 0x1cb   : > { %2682 = vmatpush2.msra.mxu0 %v1791_v62  ;;  %2755 = vmatpush2.msra.mxu1 %v2063_v7  ;;  %v1711_v62 = vld [vmem:[#allocation8 + $0x440] sm:$0xff] }
 0x1cc   : > { %2683 = vmatprep.subr.mxu0 %v1784_v4  ;;  %2756 = vmatprep.subr.mxu1 %v2056_v10  ;;  %v1704_v4 = vld [vmem:[#allocation8 + $0x408] sm:$0xff]  ;;  %v1983_v10 = vld [vmem:[#allocation8 + $0xcc0] sm:$0xff] }
 0x1cd   : > { %2684 = vmatpush2.msra.mxu0 %v1783_v9  ;;  %2757 = vmatpush2.msra.mxu1 %v2055_v12  ;;  %v1703_v12 = vld [vmem:[#allocation8 + $0x400] sm:$0xff] }
 0x1ce   : > { %2685 = vmatprep.subr.mxu0 %v1776_v11  ;;  %2758 = vmatprep.subr.mxu1 %v2048_v14  ;;  %v1976_v14 = vld [vmem:[#allocation8 + $0xc88] sm:$0xff] }
 0x1cf   : > { %2686 = vmatpush2.msra.mxu0 %v1775_v13  ;;  %2759 = vmatpush2.msra.mxu1 %v2047_v17  ;;  %v1975_v17 = vld [vmem:[#allocation8 + $0xc80] sm:$0xff] }
 0x1d0   : > { %2687 = vmatprep.subr.mxu0 %v1768_v15  ;;  %v1015_v27 = vpop.f32.mrf.mxu0  ;;  %2760 = vmatprep.subr.mxu1 %v2040_v21 }
 0x1d1   : > { %2688 = vmatpush2.msra.mxu0 %v1767_v18  ;;  %2761 = vmatpush2.msra.mxu1 %v2039_v23  ;;  %v1016_v51 = vadd.f32 %v1015_v27, %v906_v37  ;;  %v5396_v18 = vmax.f32 %v1087_v60, 0.0  ;;  %v1968_v23 = vld [vmem:[#allocation8 + $0xc48] sm:$0xff]  ;;  %v1967_v27 = vld [vmem:[#allocation8 + $0xc40] sm:$0xff] }
 0x1d2   : > { %2689 = vmatprep.subr.mxu0 %v1760_v22  ;;  %2762 = vmatprep.subr.mxu1 %v2032_v25  ;;  %v1017_v40 = vpop.f32.mrf.mxu0  ;;  %v2151_v60 = vld [vmem:[#allocation8 + $0x1200] sm:$0xff] }
 0x1d3   : > { %2690 = vmatpush2.msra.mxu0 %v1759_v1  ;;  %2763 = vmatpush2.msra.mxu1 %v2031_v31  ;;  %v1092_v41 = vpop.f32.mrf.mxu1  ;;  %v1018_v46 = vadd.f32 %v1017_v40, %v5363_v5  ;;  %v914_v5 = vrot.slane %v5356_v19, %v913_v61 }
 0x1d4   : > { %2691 = vmatprep.subr.mxu0 %v1752_v28  ;;  %2764 = vmatprep.subr.mxu1 %v2024_v33  ;;  %v1093_v11 = vadd.f32 %v1092_v41, %v1016_v51  ;;  %v2208_v33 = vld [vmem:[#allocation8 + $0x13c8] sm:$0xff] }
 0x1d5   : > { %2692 = vmatpush2.msra.mxu0 %v1751_v32  ;;  %2765 = vmatpush2.msra.mxu1 %v2023_v35  ;;  %v1094_v3 = vpop.f32.mrf.mxu1  ;;  %v1960_v32 = vld [vmem:[#allocation8 + $0xc08] sm:$0xff]  ;;  %v1959_v35 = vld [vmem:[#allocation8 + $0xc00] sm:$0xff] }
 0x1d6   : > { %2693 = vmatprep.subr.mxu0 %v1744_v34  ;;  %2766 = vmatprep.subr.mxu1 %v2016_v39  ;;  %v1095_v56 = vadd.f32 %v1094_v3, %v1018_v46  ;;  %v5400_v28 = vmax.f32 %v1093_v11, 0.0  ;;  %v2200_v41 = vld [vmem:[#allocation8 + $0x1388] sm:$0xff]  ;;  %v2191_v46 = vld [vmem:[#allocation8 + $0x1340] sm:$0xff] }
 0x1d7   : > { %2694 = vmatpush2.msra.mxu0 %v1743_v38  ;;  %2767 = vmatpush2.msra.mxu1 %v2015_v42  ;;  %v2207_v38 = vld [vmem:[#allocation8 + $0x13c0] sm:$0xff]  ;;  %v2192_v3 = vld [vmem:[#allocation8 + $0x1348] sm:$0xff] }
 0x1d8   : > { %2695 = vmatprep.subr.mxu0 %v1736_v58  ;;  %v1163_v8 = vpop.f32.mrf.mxu0  ;;  %2768 = vmatprep.subr.mxu1 %v2008_v44  ;;  %v5394_v15 = vmax.f32 %v1095_v56, 0.0  ;;  %v2464_v58 = vld [vmem:[#allocation8 + $0x1bc8] sm:$0xff]  ;;  %v2199_v42 = vld [vmem:[#allocation8 + $0x1380] sm:$0xff] }
 0x1d9   : > { %2696 = vmatpush2.msra.mxu0 %v1735_v43  ;;  %2769 = vmatpush2.msra.mxu1 %v2007_v47  ;;  %v1164_v7 = vadd.f32 %v1163_v8, %v914_v5  ;;  %v2184_v47 = vld [vmem:[#allocation8 + $0x1308] sm:$0xff]  ;;  %v2431_v56 = vld [vmem:[#allocation8 + $0x1ac0] sm:$0xff] }
 0x1da   : > { %2697 = vmatprep.subr.mxu0 %v1728_v45  ;;  %v1240_v54 = vpop.f32.mrf.mxu1  ;;  %v1165_v20 = vpop.f32.mrf.mxu0  ;;  %2770 = vmatprep.subr.mxu1 %v2000_v48  ;;  %v2463_v45 = vld [vmem:[#allocation8 + $0x1bc0] sm:$0xff]  ;;  %v2176_v48 = vld [vmem:[#allocation8 + $0x12c8] sm:$0xff] }
 0x1db   : > { %2698 = vmatpush2.msra.mxu0 %v1727_v29  ;;  %v1166_v59 = vadd.f32 %v1165_v20, %v918_v26  ;;  %2771 = vmatpush2.msra.mxu1 %v1999_v50  ;;  %v1241_v1 = vadd.f32 %v1240_v54, %v1164_v7  ;;  %v2455_v29 = vld [vmem:[#allocation8 + $0x1b80] sm:$0xff]  ;;  %v2448_v8 = vld [vmem:[#allocation8 + $0x1b48] sm:$0xff] }
 0x1dc   : > { %2699 = vmatprep.subr.mxu0 %v1720_v49  ;;  %v1242_v19 = vpop.f32.mrf.mxu1  ;;  %2772 = vmatprep.subr.mxu1 %v1992_v53  ;;  %v2175_v49 = vld [vmem:[#allocation8 + $0x12c0] sm:$0xff]  ;;  %v2440_v51 = vld [vmem:[#allocation8 + $0x1b08] sm:$0xff] }
 0x1dd   : > { %2700 = vmatpush2.msra.mxu0 %v1719_v52  ;;  %v1243_v9 = vadd.f32 %v1242_v19, %v1166_v59  ;;  %2773 = vmatpush2.msra.mxu1 %v1991_v57  ;;  %v5405_v39 = vmax.f32 %v1241_v1, 0.0  ;;  %v2447_v50 = vld [vmem:[#allocation8 + $0x1b40] sm:$0xff]  ;;  %v2160_v54 = vld [vmem:[#allocation8 + $0x1248] sm:$0xff] }
 0x1de   : > { %2701 = vmatprep.subr.mxu0 %v1712_v55  ;;  %v1169_v13 = vpop.f32.mrf.mxu0  ;;  %2774 = vmatprep.subr.mxu1 %v1984_v0  ;;  %v2167_v52 = vld [vmem:[#allocation8 + $0x1280] sm:$0xff]  ;;  %v2432_v20 = vld [vmem:[#allocation8 + $0x1ac8] sm:$0xff] }
 0x1df   : > { %2702 = vmatpush2.msra.mxu0 %v1711_v62  ;;  %v1170_v30 = vadd.f32 %v1169_v13, %v914_v5  ;;  %v5398_v21 = vmax.f32 %v1243_v9, 0.0  ;;  %2775 = vmatpush2.msra.mxu1 %v1983_v10  ;;  %v2168_v5 = vld [vmem:[#allocation8 + $0x1288] sm:$0xff]  ;;  %v2439_v53 = vld [vmem:[#allocation8 + $0x1b00] sm:$0xff] }
 0x1e0   : > { %2703 = vmatprep.subr.mxu0 %v1704_v4  ;;  %v1171_v22 = vpop.f32.mrf.mxu0  ;;  %2776 = vmatprep.subr.mxu1 %v1976_v14  ;;  %v2159_v55 = vld [vmem:[#allocation8 + $0x1240] sm:$0xff]  ;;  %v2152_v57 = vld [vmem:[#allocation8 + $0x1208] sm:$0xff] }
 0x1e1   : > { %2704 = vmatpush2.msra.mxu0 %v1703_v12  ;;  %v1172_v25 = vadd.f32 %v1171_v22, %v918_v26  ;;  %2777 = vmatpush2.msra.mxu1 %v1975_v17  ;;  %v1246_v31 = vpop.f32.mrf.mxu1  ;;  %v2456_v26 = vld [vmem:[#allocation8 + $0x1b88] sm:$0xff]  ;;  %v2423_v62 = vld [vmem:[#allocation8 + $0x1a80] sm:$0xff] }
 0x1e2   : > { %2706 = vmatmul.mubr.f32.vlgmr.msra.gmra.mxu0 %v5396_v18  ;;  %v1247_v34 = vadd.f32 %v1246_v31, %v1170_v30  ;;  %2778 = vmatprep.subr.mxu1 %v1968_v23  ;;  %v2424_v59 = vld [vmem:[#allocation8 + $0x1a88] sm:$0xff]  ;;  %v2143_v4 = vld [vmem:[#allocation8 + $0x11c0] sm:$0xff] }
 0x1e3   : > { %2711 = vmatprep.mubr.f32.mxu0 %v5394_v15  ;;  %2779 = vmatpush2.msra.mxu1 %v1967_v27  ;;  %v1248_v37 = vpop.f32.mrf.mxu1  ;;  %v2144_v0 = vld [vmem:[#allocation8 + $0x11c8] sm:$0xff]  ;;  %v2415_v7 = vld [vmem:[#allocation8 + $0x1a40] sm:$0xff] }
 0x1e4   : > { %2782 = vmatprep.mubr.f32.mxu1 %v5398_v21  ;;  %v1249_v40 = vadd.f32 %v1248_v37, %v1172_v25  ;;  %2780 = vmatprep.subr.mxu1 %v1960_v32  ;;  %v5408_v43 = vmax.f32 %v1247_v34, 0.0  ;;  %v2416_v19 = vld [vmem:[#allocation8 + $0x1a48] sm:$0xff]  ;;  %v2135_v11 = vld [vmem:[#allocation8 + $0x1180] sm:$0xff] }
 0x1e5   : > { %2795 = vmatprep.subr.mxu0 %v2208_v33  ;;  %2781 = vmatpush2.msra.mxu1 %v1959_v35  ;;  %v2136_v9 = vld [vmem:[#allocation8 + $0x1188] sm:$0xff]  ;;  %v2407_v12 = vld [vmem:[#allocation8 + $0x1a00] sm:$0xff] }
 0x1e6   : > { %2712 = vmatmul.mubr.f32.gmra.mxu0 %v5400_v28  ;;  %v5410_v44 = vmax.f32 %v1249_v40, 0.0  ;;  %2783 = vmatmul.mubr.f32.vlgmr.msra.gmra.mxu1 %v5405_v39  ;;  %v2408_v10 = vld [vmem:[#allocation8 + $0x1a08] sm:$0xff]  ;;  %v2127_v30 = vld [vmem:[#allocation8 + $0x1140] sm:$0xff] }
 0x1e7   : > { %2796 = vmatpush1.msra.mxu0 %v2207_v38  ;;  %2872 = vmatprep.subr.mxu1 %v2464_v58  ;;  %v2128_v13 = vld [vmem:[#allocation8 + $0x1148] sm:$0xff]  ;;  %v2399_v17 = vld [vmem:[#allocation8 + $0x19c0] sm:$0xff] }
 0x1e8   : > { %2797 = vmatprep.subr.mxu0 %v2200_v41  ;;  %2788 = vmatprep.mubr.f32.mxu1 %v5410_v44  ;;  %v2400_v14 = vld [vmem:[#allocation8 + $0x19c8] sm:$0xff]  ;;  %v2119_v1 = vld [vmem:[#allocation8 + $0x1100] sm:$0xff] }
 0x1e9   : > { %2798 = vmatpush1.msra.mxu0 %v2199_v42  ;;  %2873 = vmatpush1.msra.mxu1 %v2463_v45  ;;  %v2120_v22 = vld [vmem:[#allocation8 + $0x1108] sm:$0xff]  ;;  %v2391_v25 = vld [vmem:[#allocation8 + $0x1980] sm:$0xff] }
 0x1ea   : > { %2799 = vmatprep.subr.mxu0 %v2192_v3  ;;  %2789 = vmatmul.mubr.f32.gmra.mxu1 %v5408_v43  ;;  %v2392_v23 = vld [vmem:[#allocation8 + $0x1988] sm:$0xff]  ;;  %v2111_v32 = vld [vmem:[#allocation8 + $0x10c0] sm:$0xff] }
 0x1eb   : > { %2800 = vmatpush1.msra.mxu0 %v2191_v46  ;;  %2874 = vmatprep.subr.mxu1 %v2456_v26  ;;  %v2112_v27 = vld [vmem:[#allocation8 + $0x10c8] sm:$0xff]  ;;  %v2383_v33 = vld [vmem:[#allocation8 + $0x1940] sm:$0xff] }
 0x1ec   : > { %2801 = vmatprep.subr.mxu0 %v2184_v47  ;;  %2875 = vmatpush1.msra.mxu1 %v2455_v29  ;;  %v2384_v31 = vld [vmem:[#allocation8 + $0x1948] sm:$0xff]  ;;  %v2103_v37 = vld [vmem:[#allocation8 + $0x1080] sm:$0xff] }
 0x1ed   : > { %2802 = vmatpush1.msra.mxu0 %v2183_v2  ;;  %2876 = vmatprep.subr.mxu1 %v2448_v8  ;;  %v2104_v34 = vld [vmem:[#allocation8 + $0x1088] sm:$0xff]  ;;  %v2375_v38 = vld [vmem:[#allocation8 + $0x1900] sm:$0xff] }
 0x1ee   : > { %2803 = vmatprep.subr.mxu0 %v2176_v48  ;;  %2877 = vmatpush1.msra.mxu1 %v2447_v50  ;;  %v2376_v35 = vld [vmem:[#allocation8 + $0x1908] sm:$0xff]  ;;  %v2095_v58 = vld [vmem:[#allocation8 + $0x1040] sm:$0xff] }
 0x1ef   : > { %2804 = vmatpush1.msra.mxu0 %v2175_v49  ;;  %2878 = vmatprep.subr.mxu1 %v2440_v51  ;;  %v2096_v40 = vld [vmem:[#allocation8 + $0x1048] sm:$0xff]  ;;  %v2367_v42 = vld [vmem:[#allocation8 + $0x18c0] sm:$0xff] }
 0x1f0   : > { %2805 = vmatprep.subr.mxu0 %v2168_v5  ;;  %2879 = vmatpush1.msra.mxu1 %v2439_v53  ;;  %v2368_v41 = vld [vmem:[#allocation8 + $0x18c8] sm:$0xff]  ;;  %v2087_v46 = vld [vmem:[#allocation8 + $0x1000] sm:$0xff] }
 0x1f1   : > { %2806 = vmatpush1.msra.mxu0 %v2167_v52  ;;  %2880 = vmatprep.subr.mxu1 %v2432_v20  ;;  %v2088_v3 = vld [vmem:[#allocation8 + $0x1008] sm:$0xff]  ;;  %v2359_v47 = vld [vmem:[#allocation8 + $0x1880] sm:$0xff] }
 0x1f2   : > { %2807 = vmatprep.subr.mxu0 %v2160_v54  ;;  %2881 = vmatpush1.msra.mxu1 %v2431_v56  ;;  %v2360_v45 = vld [vmem:[#allocation8 + $0x1888] sm:$0xff]  ;;  %v2335_v29 = vld [vmem:[#allocation8 + $0x17c0] sm:$0xff] }
 0x1f3   : > { %2808 = vmatpush1.msra.mxu0 %v2159_v55  ;;  %2882 = vmatprep.subr.mxu1 %v2424_v59  ;;  %v2336_v26 = vld [vmem:[#allocation8 + $0x17c8] sm:$0xff]  ;;  %v2351_v48 = vld [vmem:[#allocation8 + $0x1840] sm:$0xff] }
 0x1f4   : > { %2809 = vmatprep.subr.mxu0 %v2152_v57  ;;  %2883 = vmatpush1.msra.mxu1 %v2423_v62  ;;  %v2352_v2 = vld [vmem:[#allocation8 + $0x1848] sm:$0xff]  ;;  %v2327_v50 = vld [vmem:[#allocation8 + $0x1780] sm:$0xff] }
 0x1f5   : > { %2810 = vmatpush1.msra.mxu0 %v2151_v60  ;;  %2884 = vmatprep.subr.mxu1 %v2416_v19  ;;  %v2328_v8 = vld [vmem:[#allocation8 + $0x1788] sm:$0xff]  ;;  %v2343_v5 = vld [vmem:[#allocation8 + $0x1800] sm:$0xff] }
 0x1f6   : > { %2811 = vmatprep.subr.mxu0 %v2144_v0  ;;  %2885 = vmatpush1.msra.mxu1 %v2415_v7  ;;  %v2344_v49 = vld [vmem:[#allocation8 + $0x1808] sm:$0xff]  ;;  %v2319_v53 = vld [vmem:[#allocation8 + $0x1740] sm:$0xff] }
 0x1f7   : > { %2812 = vmatpush1.msra.mxu0 %v2143_v4  ;;  %2886 = vmatprep.subr.mxu1 %v2408_v10  ;;  %v2320_v51 = vld [vmem:[#allocation8 + $0x1748] sm:$0xff]  ;;  %v2591_v54 = vld [vmem:[#allocation8 + $0x1fc0] sm:$0xff] }
 0x1f8   : > { %2813 = vmatprep.subr.mxu0 %v2136_v9  ;;  %2887 = vmatpush1.msra.mxu1 %v2407_v12  ;;  %v2592_v52 = vld [vmem:[#allocation8 + $0x1fc8] sm:$0xff]  ;;  %v2311_v56 = vld [vmem:[#allocation8 + $0x1700] sm:$0xff] }
 0x1f9   : > { %2814 = vmatpush1.msra.mxu0 %v2135_v11  ;;  %2888 = vmatprep.subr.mxu1 %v2400_v14  ;;  %v2312_v20 = vld [vmem:[#allocation8 + $0x1708] sm:$0xff]  ;;  %v2583_v57 = vld [vmem:[#allocation8 + $0x1f80] sm:$0xff] }
 0x1fa   : > { %2815 = vmatprep.subr.mxu0 %v2128_v13  ;;  %2889 = vmatpush1.msra.mxu1 %v2399_v17  ;;  %v2584_v55 = vld [vmem:[#allocation8 + $0x1f88] sm:$0xff]  ;;  %v2303_v62 = vld [vmem:[#allocation8 + $0x16c0] sm:$0xff] }
 0x1fb   : > { %2816 = vmatpush1.msra.mxu0 %v2127_v30  ;;  %2890 = vmatprep.subr.mxu1 %v2392_v23  ;;  %v2304_v59 = vld [vmem:[#allocation8 + $0x16c8] sm:$0xff]  ;;  %v2575_v0 = vld [vmem:[#allocation8 + $0x1f40] sm:$0xff] }
 0x1fc   : > { %2817 = vmatprep.subr.mxu0 %v2120_v22  ;;  %2891 = vmatpush1.msra.mxu1 %v2391_v25  ;;  %v2576_v60 = vld [vmem:[#allocation8 + $0x1f48] sm:$0xff]  ;;  %v2295_v7 = vld [vmem:[#allocation8 + $0x1680] sm:$0xff] }
 0x1fd   : > { %2818 = vmatpush1.msra.mxu0 %v2119_v1  ;;  %2892 = vmatprep.subr.mxu1 %v2384_v31  ;;  %v2296_v19 = vld [vmem:[#allocation8 + $0x1688] sm:$0xff]  ;;  %v2567_v9 = vld [vmem:[#allocation8 + $0x1f00] sm:$0xff] }
 0x1fe   : > { %2819 = vmatprep.subr.mxu0 %v2112_v27  ;;  %2893 = vmatpush1.msra.mxu1 %v2383_v33  ;;  %v2568_v4 = vld [vmem:[#allocation8 + $0x1f08] sm:$0xff]  ;;  %v2287_v12 = vld [vmem:[#allocation8 + $0x1640] sm:$0xff] }
 0x1ff   : > { %2820 = vmatpush1.msra.mxu0 %v2111_v32  ;;  %2894 = vmatprep.subr.mxu1 %v2376_v35  ;;  %v2288_v10 = vld [vmem:[#allocation8 + $0x1648] sm:$0xff]  ;;  %v2559_v13 = vld [vmem:[#allocation8 + $0x1ec0] sm:$0xff]  ;;  %v921_v32 = vsub.s32 4, %v5353_v6 }
 0x200   : > { %2821 = vmatprep.subr.mxu0 %v2104_v34  ;;  %2895 = vmatpush1.msra.mxu1 %v2375_v38  ;;  %v2560_v11 = vld [vmem:[#allocation8 + $0x1ec8] sm:$0xff]  ;;  %v2279_v17 = vld [vmem:[#allocation8 + $0x1600] sm:$0xff]  ;;  %v925_v38 = vsub.s32 5, %v5353_v6 }
 0x201   : > { %2822 = vmatpush1.msra.mxu0 %v2103_v37  ;;  %2896 = vmatprep.subr.mxu1 %v2368_v41  ;;  %v2280_v14 = vld [vmem:[#allocation8 + $0x1608] sm:$0xff]  ;;  %v2551_v22 = vld [vmem:[#allocation8 + $0x1e80] sm:$0xff] }
 0x202   : > { %2823 = vmatprep.subr.mxu0 %v2096_v40  ;;  %2897 = vmatpush1.msra.mxu1 %v2367_v42  ;;  %v2552_v30 = vld [vmem:[#allocation8 + $0x1e88] sm:$0xff]  ;;  %v2271_v25 = vld [vmem:[#allocation8 + $0x15c0] sm:$0xff] }
 0x203   : > { %2824 = vmatpush1.msra.mxu0 %v2095_v58  ;;  %2898 = vmatprep.subr.mxu1 %v2360_v45  ;;  %v2272_v23 = vld [vmem:[#allocation8 + $0x15c8] sm:$0xff]  ;;  %v2543_v27 = vld [vmem:[#allocation8 + $0x1e40] sm:$0xff] }
 0x204   : > { %2825 = vmatprep.subr.mxu0 %v2088_v3  ;;  %2899 = vmatpush1.msra.mxu1 %v2359_v47  ;;  %v2544_v1 = vld [vmem:[#allocation8 + $0x1e48] sm:$0xff]  ;;  %v2263_v34 = vld [vmem:[#allocation8 + $0x1580] sm:$0xff]  ;;  %v5417_v3 = vld [vmem:[#allocation7] sm:$0xff] }
 0x205   : > { %2826 = vmatpush1.msra.mxu0 %v2087_v46  ;;  %2900 = vmatprep.subr.mxu1 %v2352_v2  ;;  %v2264_v31 = vld [vmem:[#allocation8 + $0x1588] sm:$0xff]  ;;  %v2535_v35 = vld [vmem:[#allocation8 + $0x1e00] sm:$0xff]  ;;  %v922_v45 = vrot.slane %v5417_v3, %v921_v32 }
 0x206   : > { %2827 = vmatprep.subr.mxu0 %v2336_v26  ;;  %2901 = vmatpush1.msra.mxu1 %v2351_v48  ;;  %v2536_v33 = vld [vmem:[#allocation8 + $0x1e08] sm:$0xff]  ;;  %v2255_v41 = vld [vmem:[#allocation8 + $0x1540] sm:$0xff] }
 0x207   : > { %2828 = vmatpush2.msra.mxu0 %v2335_v29  ;;  %2902 = vmatprep.subr.mxu1 %v2344_v49  ;;  %v2256_v37 = vld [vmem:[#allocation8 + $0x1548] sm:$0xff]  ;;  %v2527_v58 = vld [vmem:[#allocation8 + $0x1dc0] sm:$0xff]  ;;  %v926_v29 = vrot.slane %v5417_v3, %v925_v38 }
 0x208   : > { %2829 = vmatprep.subr.mxu0 %v2328_v8  ;;  %2903 = vmatpush1.msra.mxu1 %v2343_v5  ;;  %v2528_v40 = vld [vmem:[#allocation8 + $0x1dc8] sm:$0xff]  ;;  %v2247_v47 = vld [vmem:[#allocation8 + $0x1500] sm:$0xff] }
 0x209   : > { %2830 = vmatpush2.msra.mxu0 %v2327_v50  ;;  %2904 = vmatprep.subr.mxu1 %v2592_v52  ;;  %v2248_v42 = vld [vmem:[#allocation8 + $0x1508] sm:$0xff]  ;;  %v2519_v26 = vld [vmem:[#allocation8 + $0x1d80] sm:$0xff] }
 0x20a   : > { %2831 = vmatprep.subr.mxu0 %v2320_v51  ;;  %2905 = vmatpush2.msra.mxu1 %v2591_v54  ;;  %v2520_v46 = vld [vmem:[#allocation8 + $0x1d88] sm:$0xff]  ;;  %v2239_v49 = vld [vmem:[#allocation8 + $0x14c0] sm:$0xff] }
 0x20b   : > { %2832 = vmatpush2.msra.mxu0 %v2319_v53  ;;  %2906 = vmatprep.subr.mxu1 %v2584_v55  ;;  %v2240_v2 = vld [vmem:[#allocation8 + $0x14c8] sm:$0xff]  ;;  %v2511_v50 = vld [vmem:[#allocation8 + $0x1d40] sm:$0xff] }
 0x20c   : > { %2833 = vmatprep.subr.mxu0 %v2312_v20  ;;  %2907 = vmatpush2.msra.mxu1 %v2583_v57  ;;  %v2512_v48 = vld [vmem:[#allocation8 + $0x1d48] sm:$0xff]  ;;  %v2231_v20 = vld [vmem:[#allocation8 + $0x1480] sm:$0xff] }
 0x20d   : > { %2834 = vmatpush2.msra.mxu0 %v2311_v56  ;;  %2908 = vmatprep.subr.mxu1 %v2576_v60  ;;  %v2232_v51 = vld [vmem:[#allocation8 + $0x1488] sm:$0xff]  ;;  %v2503_v55 = vld [vmem:[#allocation8 + $0x1d00] sm:$0xff] }
 0x20e   : > { %2835 = vmatprep.subr.mxu0 %v2304_v59  ;;  %2909 = vmatpush2.msra.mxu1 %v2575_v0  ;;  %v2504_v52 = vld [vmem:[#allocation8 + $0x1d08] sm:$0xff]  ;;  %v2223_v0 = vld [vmem:[#allocation8 + $0x1440] sm:$0xff] }
 0x20f   : > { %2836 = vmatpush2.msra.mxu0 %v2303_v62  ;;  %2910 = vmatprep.subr.mxu1 %v2568_v4  ;;  %v2224_v57 = vld [vmem:[#allocation8 + $0x1448] sm:$0xff] }
 0x210   : > { %2837 = vmatprep.subr.mxu0 %v2296_v19  ;;  %2911 = vmatpush2.msra.mxu1 %v2567_v9  ;;  %v2496_v59 = vld [vmem:[#allocation8 + $0x1cc8] sm:$0xff]  ;;  %v2495_v19 = vld [vmem:[#allocation8 + $0x1cc0] sm:$0xff] }
 0x211   : > { %2838 = vmatpush2.msra.mxu0 %v2295_v7  ;;  %2912 = vmatprep.subr.mxu1 %v2560_v11  ;;  %v2216_v7 = vld [vmem:[#allocation8 + $0x1408] sm:$0xff]  ;;  %v2215_v11 = vld [vmem:[#allocation8 + $0x1400] sm:$0xff] }
 0x212   : > { %2839 = vmatprep.subr.mxu0 %v2288_v10  ;;  %2913 = vmatpush2.msra.mxu1 %v2559_v13  ;;  %v2488_v9 = vld [vmem:[#allocation8 + $0x1c88] sm:$0xff] }
 0x213   : > { %2840 = vmatpush2.msra.mxu0 %v2287_v12  ;;  %2914 = vmatprep.subr.mxu1 %v2552_v30 }
 0x214   : > { %2841 = vmatprep.subr.mxu0 %v2280_v14  ;;  %2915 = vmatpush2.msra.mxu1 %v2551_v22  ;;  %v1698_v14 = vld [vmem:[#allocation8 + $0x3d8] sm:$0xff]  ;;  %v1697_v22 = vld [vmem:[#allocation8 + $0x3d0] sm:$0xff] }
 0x215   : > { %2842 = vmatpush2.msra.mxu0 %v2279_v17  ;;  %2916 = vmatprep.subr.mxu1 %v2544_v1 }
 0x216   : > { %2843 = vmatprep.subr.mxu0 %v2272_v23  ;;  %2917 = vmatpush2.msra.mxu1 %v2543_v27  ;;  %v2487_v23 = vld [vmem:[#allocation8 + $0x1c80] sm:$0xff]  ;;  %v2480_v27 = vld [vmem:[#allocation8 + $0x1c48] sm:$0xff] }
 0x217   : > { %2844 = vmatpush2.msra.mxu0 %v2271_v25  ;;  %2918 = vmatprep.subr.mxu1 %v2536_v33  ;;  %v1690_v25 = vld [vmem:[#allocation8 + $0x398] sm:$0xff]  ;;  %v1689_v33 = vld [vmem:[#allocation8 + $0x390] sm:$0xff] }
 0x218   : > { %2845 = vmatprep.subr.mxu0 %v2264_v31  ;;  %2919 = vmatpush2.msra.mxu1 %v2535_v35 }
 0x219   : > { %2846 = vmatpush2.msra.mxu0 %v2263_v34  ;;  %2920 = vmatprep.subr.mxu1 %v2528_v40  ;;  %v2479_v34 = vld [vmem:[#allocation8 + $0x1c40] sm:$0xff]  ;;  %v2472_v40 = vld [vmem:[#allocation8 + $0x1c08] sm:$0xff] }
 0x21a   : > { %2847 = vmatprep.subr.mxu0 %v2256_v37  ;;  %2921 = vmatpush2.msra.mxu1 %v2527_v58  ;;  %v1682_v37 = vld [vmem:[#allocation8 + $0x358] sm:$0xff]  ;;  %v1681_v58 = vld [vmem:[#allocation8 + $0x350] sm:$0xff] }
 0x21b   : > { %2848 = vmatpush2.msra.mxu0 %v2255_v41  ;;  %2922 = vmatprep.subr.mxu1 %v2520_v46  ;;  %v1674_v46 = vld [vmem:[#allocation8 + $0x318] sm:$0xff] }
 0x21c   : > { %2849 = vmatprep.subr.mxu0 %v2248_v42  ;;  %v1317_v8 = vpop.f32.mrf.mxu0  ;;  %2923 = vmatpush2.msra.mxu1 %v2519_v26  ;;  %v2471_v42 = vld [vmem:[#allocation8 + $0x1c00] sm:$0xff] }
 0x21d   : > { %v1318_v5 = vadd.f32 %v1317_v8, %v922_v45  ;;  %2850 = vmatpush2.msra.mxu0 %v2247_v47  ;;  %2924 = vmatprep.subr.mxu1 %v2512_v48  ;;  %v1954_v47 = vld [vmem:[#allocation8 + $0xbd8] sm:$0xff]  ;;  %v1665_v8 = vld [vmem:[#allocation8 + $0x2d0] sm:$0xff] }
 0x21e   : > { %v1394_v53 = vpop.f32.mrf.mxu1  ;;  %2851 = vmatprep.subr.mxu0 %v2240_v2  ;;  %v1319_v54 = vpop.f32.mrf.mxu0  ;;  %2925 = vmatpush2.msra.mxu1 %v2511_v50  ;;  %v1673_v2 = vld [vmem:[#allocation8 + $0x310] sm:$0xff]  ;;  %v1666_v48 = vld [vmem:[#allocation8 + $0x2d8] sm:$0xff] }
 0x21f   : > { %v1320_v56 = vadd.f32 %v1319_v54, %v926_v29  ;;  %2852 = vmatpush2.msra.mxu0 %v2239_v49  ;;  %v1395_v60 = vadd.f32 %v1394_v53, %v1318_v5  ;;  %2926 = vmatprep.subr.mxu1 %v2504_v52  ;;  %v1658_v49 = vld [vmem:[#allocation8 + $0x298] sm:$0xff]  ;;  %v1657_v50 = vld [vmem:[#allocation8 + $0x290] sm:$0xff] }
 0x220   : > { %v1396_v62 = vpop.f32.mrf.mxu1  ;;  %2853 = vmatprep.subr.mxu0 %v2232_v51  ;;  %2927 = vmatpush2.msra.mxu1 %v2503_v55  ;;  %v1650_v5 = vld [vmem:[#allocation8 + $0x258] sm:$0xff]  ;;  %v1649_v51 = vld [vmem:[#allocation8 + $0x250] sm:$0xff] }
 0x221   : > { %v1397_v4 = vadd.f32 %v1396_v62, %v1320_v56  ;;  %2854 = vmatpush2.msra.mxu0 %v2231_v20  ;;  %2928 = vmatprep.subr.mxu1 %v2496_v59  ;;  %v5427_v30 = vmax.f32 %v1395_v60, 0.0  ;;  %v1642_v52 = vld [vmem:[#allocation8 + $0x218] sm:$0xff]  ;;  %v1641_v53 = vld [vmem:[#allocation8 + $0x210] sm:$0xff] }
 0x222   : > { %v1323_v10 = vpop.f32.mrf.mxu0  ;;  %2855 = vmatprep.subr.mxu0 %v2224_v57  ;;  %2929 = vmatpush2.msra.mxu1 %v2495_v19  ;;  %v1634_v54 = vld [vmem:[#allocation8 + $0x1d8] sm:$0xff]  ;;  %v1633_v20 = vld [vmem:[#allocation8 + $0x1d0] sm:$0xff] }
 0x223   : > { %v5425_v12 = vmax.f32 %v1397_v4, 0.0  ;;  %v1324_v13 = vadd.f32 %v1323_v10, %v922_v45  ;;  %2856 = vmatpush2.msra.mxu0 %v2223_v0  ;;  %2930 = vmatprep.subr.mxu1 %v2488_v9  ;;  %v1626_v55 = vld [vmem:[#allocation8 + $0x198] sm:$0xff]  ;;  %v1625_v56 = vld [vmem:[#allocation8 + $0x190] sm:$0xff] }
 0x224   : > { %v1325_v17 = vpop.f32.mrf.mxu0  ;;  %2857 = vmatprep.subr.mxu0 %v2216_v7  ;;  %2931 = vmatpush2.msra.mxu1 %v2487_v23  ;;  %v1618_v57 = vld [vmem:[#allocation8 + $0x158] sm:$0xff]  ;;  %v1617_v59 = vld [vmem:[#allocation8 + $0x150] sm:$0xff] }
 0x225   : > { %v1326_v1 = vadd.f32 %v1325_v17, %v926_v29  ;;  %2858 = vmatpush2.msra.mxu0 %v2215_v11  ;;  %2859 = vmatprep.mubr.f32.mxu0 %v5425_v12  ;;  %v1400_v31 = vpop.f32.mrf.mxu1  ;;  %v1610_v60 = vld [vmem:[#allocation8 + $0x118] sm:$0xff]  ;;  %v1609_v62 = vld [vmem:[#allocation8 + $0x110] sm:$0xff] }
 0x226   : > { %2949 = vmatprep.subr.mxu0 %v1698_v14  ;;  %2860 = vmatmul.mubr.f32.vlgmr.msra.gmra.mxu0 %v5427_v30  ;;  %v1401_v35 = vadd.f32 %v1400_v31, %v1324_v13  ;;  %v1602_v0 = vld [vmem:[#allocation8 + $0xd8] sm:$0xff]  ;;  %v1601_v19 = vld [vmem:[#allocation8 + $0xd0] sm:$0xff] }
 0x227   : > { %2950 = vmatpush1.msra.mxu0 %v1697_v22  ;;  %v1402_v41 = vpop.f32.mrf.mxu1  ;;  %2932 = vmatprep.subr.mxu1 %v2480_v27  ;;  %v1594_v4 = vld [vmem:[#allocation8 + $0x98] sm:$0xff]  ;;  %v1593_v7 = vld [vmem:[#allocation8 + $0x90] sm:$0xff] }
 0x228   : > { %2951 = vmatprep.subr.mxu0 %v1690_v25  ;;  %v1403_v45 = vadd.f32 %v1402_v41, %v1326_v1  ;;  %2933 = vmatpush2.msra.mxu1 %v2479_v34  ;;  %v5431_v26 = vmax.f32 %v1401_v35, 0.0  ;;  %v1586_v9 = vld [vmem:[#allocation8 + $0x58] sm:$0xff]  ;;  %v1585_v10 = vld [vmem:[#allocation8 + $0x50] sm:$0xff] }
 0x229   : > { %2952 = vmatpush1.msra.mxu0 %v1689_v33  ;;  %2934 = vmatprep.subr.mxu1 %v2472_v40  ;;  %v1578_v11 = vld [vmem:[#allocation8 + $0x18] sm:$0xff]  ;;  %v1577_v13 = vld [vmem:[#allocation8 + $0x10] sm:$0xff] }
 0x22a   : > { %2953 = vmatprep.subr.mxu0 %v1682_v37  ;;  %v5433_v29 = vmax.f32 %v1403_v45, 0.0  ;;  %2935 = vmatpush2.msra.mxu1 %v2471_v42  ;;  %v1826_v14 = vld [vmem:[#allocation8 + $0x7d8] sm:$0xff]  ;;  %v1825_v17 = vld [vmem:[#allocation8 + $0x7d0] sm:$0xff] }
 0x22b   : > { %2954 = vmatpush1.msra.mxu0 %v1681_v58  ;;  %3026 = vmatprep.subr.mxu1 %v1954_v47  ;;  %v1818_v22 = vld [vmem:[#allocation8 + $0x798] sm:$0xff]  ;;  %v1817_v23 = vld [vmem:[#allocation8 + $0x790] sm:$0xff] }
 0x22c   : > { %2955 = vmatprep.subr.mxu0 %v1674_v46  ;;  %2865 = vmatprep.mubr.f32.mxu0 %v5433_v29  ;;  %v1810_v1 = vld [vmem:[#allocation8 + $0x758] sm:$0xff]  ;;  %v1809_v25 = vld [vmem:[#allocation8 + $0x750] sm:$0xff] }
 0x22d   : > { %2956 = vmatpush1.msra.mxu0 %v1673_v2  ;;  %v1802_v27 = vld [vmem:[#allocation8 + $0x718] sm:$0xff]  ;;  %v1801_v31 = vld [vmem:[#allocation8 + $0x710] sm:$0xff] }
 0x22e   : > { %2866 = vmatmul.mubr.f32.gmra.mxu0 %v5431_v26  ;;  %2957 = vmatprep.subr.mxu0 %v1666_v48  ;;  %v1794_v33 = vld [vmem:[#allocation8 + $0x6d8] sm:$0xff]  ;;  %v1793_v34 = vld [vmem:[#allocation8 + $0x6d0] sm:$0xff] }
 0x22f   : > { %3013 = vmatprep.mubr.f32.mxu0 %v5373_v24  ;;  %2958 = vmatpush1.msra.mxu0 %v1665_v8  ;;  %v1786_v35 = vld [vmem:[#allocation8 + $0x698] sm:$0xff]  ;;  %v1785_v37 = vld [vmem:[#allocation8 + $0x690] sm:$0xff] }
 0x230   : > { %2959 = vmatprep.subr.mxu0 %v1658_v49  ;;  %v1778_v40 = vld [vmem:[#allocation8 + $0x658] sm:$0xff]  ;;  %v1777_v41 = vld [vmem:[#allocation8 + $0x650] sm:$0xff] }
 0x231   : > { %2960 = vmatpush1.msra.mxu0 %v1657_v50  ;;  %v1770_v58 = vld [vmem:[#allocation8 + $0x618] sm:$0xff]  ;;  %v1769_v42 = vld [vmem:[#allocation8 + $0x610] sm:$0xff]  ;;  %v929_v50 = vsub.s32 6, %v5353_v6 }
 0x232   : > { %2961 = vmatprep.subr.mxu0 %v1650_v5  ;;  %v1762_v45 = vld [vmem:[#allocation8 + $0x5d8] sm:$0xff]  ;;  %v1761_v46 = vld [vmem:[#allocation8 + $0x5d0] sm:$0xff] }
 0x233   : > { %2962 = vmatpush1.msra.mxu0 %v1649_v51  ;;  %v1754_v47 = vld [vmem:[#allocation8 + $0x598] sm:$0xff]  ;;  %v1753_v2 = vld [vmem:[#allocation8 + $0x590] sm:$0xff] }
 0x234   : > { %2963 = vmatprep.subr.mxu0 %v1642_v52  ;;  %v1746_v48 = vld [vmem:[#allocation8 + $0x558] sm:$0xff]  ;;  %v1745_v8 = vld [vmem:[#allocation8 + $0x550] sm:$0xff]  ;;  %v933_v52 = vsub.s32 7, %v5353_v6 }
 0x235   : > { %2964 = vmatpush1.msra.mxu0 %v1641_v53  ;;  %v1738_v49 = vld [vmem:[#allocation8 + $0x518] sm:$0xff]  ;;  %v1737_v5 = vld [vmem:[#allocation8 + $0x510] sm:$0xff] }
 0x236   : > { %2965 = vmatprep.subr.mxu0 %v1634_v54  ;;  %v1730_v51 = vld [vmem:[#allocation8 + $0x4d8] sm:$0xff]  ;;  %v1729_v53 = vld [vmem:[#allocation8 + $0x4d0] sm:$0xff] }
 0x237   : > { %2966 = vmatpush1.msra.mxu0 %v1633_v20  ;;  %v1722_v54 = vld [vmem:[#allocation8 + $0x498] sm:$0xff]  ;;  %v930_v20 = vrot.slane %v5417_v3, %v929_v50 }
 0x238   : > { %2967 = vmatprep.subr.mxu0 %v1626_v55  ;;  %v1721_v55 = vld [vmem:[#allocation8 + $0x490] sm:$0xff] }
 0x239   : > { %2968 = vmatpush1.msra.mxu0 %v1625_v56  ;;  %v1714_v56 = vld [vmem:[#allocation8 + $0x458] sm:$0xff] }
 0x23a   : > { %2969 = vmatprep.subr.mxu0 %v1618_v57  ;;  %v934_v57 = vrot.slane %v5417_v3, %v933_v52  ;;  %v2202_v3 = vld [vmem:[#allocation8 + $0x1398] sm:$0xff] }
 0x23b   : > { %2970 = vmatpush1.msra.mxu0 %v1617_v59  ;;  %v1713_v59 = vld [vmem:[#allocation8 + $0x450] sm:$0xff] }
 0x23c   : > { %2971 = vmatprep.subr.mxu0 %v1610_v60 }
 0x23d   : > { %2972 = vmatpush1.msra.mxu0 %v1609_v62 }
 0x23e   : > { %2973 = vmatprep.subr.mxu0 %v1602_v0  ;;  %v1706_v0 = vld [vmem:[#allocation8 + $0x418] sm:$0xff] }
 0x23f   : > { %2974 = vmatpush1.msra.mxu0 %v1601_v19 }
 0x240   : > { %2975 = vmatprep.subr.mxu0 %v1594_v4  ;;  %v1705_v4 = vld [vmem:[#allocation8 + $0x410] sm:$0xff] }
 0x241   : > { %2976 = vmatpush1.msra.mxu0 %v1593_v7 }
 0x242   : > { %2977 = vmatprep.subr.mxu0 %v1586_v9 }
 0x243   : > { %2978 = vmatpush1.msra.mxu0 %v1585_v10  ;;  %v2210_v10 = vld [vmem:[#allocation8 + $0x13d8] sm:$0xff] }
 0x244   : > { %2979 = vmatprep.subr.mxu0 %v1578_v11 }
 0x245   : > { %2980 = vmatpush1.msra.mxu0 %v1577_v13  ;;  %v2209_v13 = vld [vmem:[#allocation8 + $0x13d0] sm:$0xff] }
 0x246   : > { %2981 = vmatprep.subr.mxu0 %v1826_v14 }
 0x247   : > { %2982 = vmatpush2.msra.mxu0 %v1825_v17 }
 0x248   : > { %2983 = vmatprep.subr.mxu0 %v1818_v22 }
 0x249   : > { %2984 = vmatpush2.msra.mxu0 %v1817_v23 }
 0x24a   : > { %2985 = vmatprep.subr.mxu0 %v1810_v1  ;;  %v2201_v1 = vld [vmem:[#allocation8 + $0x1390] sm:$0xff] }
 0x24b   : > { %2986 = vmatpush2.msra.mxu0 %v1809_v25 }
 0x24c   : > { %2987 = vmatprep.subr.mxu0 %v1802_v27 }
 0x24d   : > { %2988 = vmatpush2.msra.mxu0 %v1801_v31 }
 0x24e   : > { %2989 = vmatprep.subr.mxu0 %v1794_v33 }
 0x24f   : > { %2990 = vmatpush2.msra.mxu0 %v1793_v34  ;;  %v2194_v34 = vld [vmem:[#allocation8 + $0x1358] sm:$0xff] }
 0x250   : > { %2991 = vmatprep.subr.mxu0 %v1786_v35 }
 0x251   : > { %2992 = vmatpush2.msra.mxu0 %v1785_v37 }
 0x252   : > { %2993 = vmatprep.subr.mxu0 %v1778_v40 }
 0x253   : > { %2994 = vmatpush2.msra.mxu0 %v1777_v41  ;;  %v1953_v41 = vld [vmem:[#allocation8 + $0xbd0] sm:$0xff] }
 0x254   : > { %2995 = vmatprep.subr.mxu0 %v1770_v58  ;;  %v2193_v58 = vld [vmem:[#allocation8 + $0x1350] sm:$0xff] }
 0x255   : > { %2996 = vmatpush2.msra.mxu0 %v1769_v42  ;;  %v1946_v42 = vld [vmem:[#allocation8 + $0xb98] sm:$0xff] }
 0x256   : > { %2997 = vmatprep.subr.mxu0 %v1762_v45 }
 0x257   : > { %2998 = vmatpush2.msra.mxu0 %v1761_v46  ;;  %v1945_v46 = vld [vmem:[#allocation8 + $0xb90] sm:$0xff] }
 0x258   : > { %2999 = vmatprep.subr.mxu0 %v1754_v47  ;;  %v2186_v47 = vld [vmem:[#allocation8 + $0x1318] sm:$0xff] }
 0x259   : > { %3000 = vmatpush2.msra.mxu0 %v1753_v2 }
 0x25a   : > { %3001 = vmatprep.subr.mxu0 %v1746_v48  ;;  %v1938_v48 = vld [vmem:[#allocation8 + $0xb58] sm:$0xff] }
 0x25b   : > { %3002 = vmatpush2.msra.mxu0 %v1745_v8 }
 0x25c   : > { %3003 = vmatprep.subr.mxu0 %v1738_v49  ;;  %v2185_v49 = vld [vmem:[#allocation8 + $0x1310] sm:$0xff] }
 0x25d   : > { %3004 = vmatpush2.msra.mxu0 %v1737_v5  ;;  %v1937_v5 = vld [vmem:[#allocation8 + $0xb50] sm:$0xff] }
 0x25e   : > { %3005 = vmatprep.subr.mxu0 %v1730_v51  ;;  %v1930_v51 = vld [vmem:[#allocation8 + $0xb18] sm:$0xff] }
 0x25f   : > { %3006 = vmatpush2.msra.mxu0 %v1729_v53  ;;  %v2178_v53 = vld [vmem:[#allocation8 + $0x12d8] sm:$0xff] }
 0x260   : > { %3007 = vmatprep.subr.mxu0 %v1722_v54  ;;  %v1471_v60 = vpop.f32.mrf.mxu0  ;;  %v1929_v54 = vld [vmem:[#allocation8 + $0xb10] sm:$0xff] }
 0x261   : > { %v1548_v62 = vpop.f32.mrf.mxu1  ;;  %3008 = vmatpush2.msra.mxu0 %v1721_v55  ;;  %v1472_v19 = vadd.f32 %v1471_v60, %v930_v20  ;;  %v1922_v55 = vld [vmem:[#allocation8 + $0xad8] sm:$0xff] }
 0x262   : > { %3009 = vmatprep.subr.mxu0 %v1714_v56  ;;  %v1473_v7 = vpop.f32.mrf.mxu0  ;;  %v2170_v56 = vld [vmem:[#allocation8 + $0x1298] sm:$0xff] }
 0x263   : > { %v1550_v9 = vpop.f32.mrf.mxu1  ;;  %3010 = vmatpush2.msra.mxu0 %v1713_v59  ;;  %v1474_v11 = vadd.f32 %v1473_v7, %v934_v57  ;;  %v1549_v14 = vadd.f32 %v1548_v62, %v1472_v19  ;;  %v2169_v59 = vld [vmem:[#allocation8 + $0x1290] sm:$0xff]  ;;  %v1914_v60 = vld [vmem:[#allocation8 + $0xa98] sm:$0xff] }
 0x264   : > { %3011 = vmatprep.subr.mxu0 %v1706_v0  ;;  %v2162_v62 = vld [vmem:[#allocation8 + $0x1258] sm:$0xff]  ;;  %v1913_v0 = vld [vmem:[#allocation8 + $0xa90] sm:$0xff] }
 0x265   : > { %v1554_v17 = vpop.f32.mrf.mxu1  ;;  %3012 = vmatpush2.msra.mxu0 %v1705_v4  ;;  %v1551_v22 = vadd.f32 %v1550_v9, %v1474_v11  ;;  %v1477_v23 = vpop.f32.mrf.mxu0  ;;  %v5450_v35 = vmax.f32 %v1549_v14, 0.0  ;;  %v2161_v19 = vld [vmem:[#allocation8 + $0x1250] sm:$0xff]  ;;  %v1906_v4 = vld [vmem:[#allocation8 + $0xa58] sm:$0xff] }
 0x266   : > { %3014 = vmatmul.mubr.f32.vlgmr.msra.gmra.mxu0 %v5396_v18  ;;  %3103 = vmatprep.subr.mxu0 %v2210_v10  ;;  %v1478_v25 = vadd.f32 %v1477_v23, %v930_v20  ;;  %v2177_v20 = vld [vmem:[#allocation8 + $0x12d0] sm:$0xff]  ;;  %v2154_v7 = vld [vmem:[#allocation8 + $0x1218] sm:$0xff] }
 0x267   : > { %3019 = vmatprep.mubr.f32.mxu0 %v5394_v15  ;;  %3104 = vmatpush1.msra.mxu0 %v2209_v13  ;;  %v5448_v27 = vmax.f32 %v1551_v22, 0.0  ;;  %v1479_v31 = vpop.f32.mrf.mxu0  ;;  %v1556_v33 = vpop.f32.mrf.mxu1  ;;  %v1905_v9 = vld [vmem:[#allocation8 + $0xa50] sm:$0xff]  ;;  %v1898_v11 = vld [vmem:[#allocation8 + $0xa18] sm:$0xff] }
 0x268   : > { %3105 = vmatprep.subr.mxu0 %v2202_v3  ;;  %v1480_v37 = vadd.f32 %v1479_v31, %v934_v57  ;;  %v1555_v40 = vadd.f32 %v1554_v17, %v1478_v25  ;;  %v1921_v57 = vld [vmem:[#allocation8 + $0xad0] sm:$0xff]  ;;  %v2146_v13 = vld [vmem:[#allocation8 + $0x11d8] sm:$0xff] }
 0x269   : > { %3106 = vmatpush1.msra.mxu0 %v2201_v1  ;;  %2936 = vmatprep.mubr.f32.mxu1 %v5448_v27  ;;  %v2153_v10 = vld [vmem:[#allocation8 + $0x1210] sm:$0xff]  ;;  %v1890_v3 = vld [vmem:[#allocation8 + $0x9d8] sm:$0xff] }
 0x26a   : > { %3020 = vmatmul.mubr.f32.gmra.mxu0 %v5400_v28  ;;  %v1557_v45 = vadd.f32 %v1556_v33, %v1480_v37  ;;  %2937 = vmatmul.mubr.f32.vlgmr.msra.gmra.mxu1 %v5450_v35  ;;  %v5455_v2 = vmax.f32 %v1555_v40, 0.0  ;;  %v1897_v14 = vld [vmem:[#allocation8 + $0xa10] sm:$0xff]  ;;  %v2138_v22 = vld [vmem:[#allocation8 + $0x1198] sm:$0xff] }
 0x26b   : > { %3107 = vmatprep.subr.mxu0 %v2194_v34  ;;  %3027 = vmatpush1.msra.mxu1 %v1953_v41  ;;  %v2145_v17 = vld [vmem:[#allocation8 + $0x11d0] sm:$0xff]  ;;  %v1882_v25 = vld [vmem:[#allocation8 + $0x998] sm:$0xff] }
 0x26c   : > { %3108 = vmatpush1.msra.mxu0 %v2193_v58  ;;  %v5457_v8 = vmax.f32 %v1557_v45, 0.0  ;;  %3028 = vmatprep.subr.mxu1 %v1946_v42  ;;  %v1889_v23 = vld [vmem:[#allocation8 + $0x9d0] sm:$0xff]  ;;  %v2130_v31 = vld [vmem:[#allocation8 + $0x1158] sm:$0xff] }
 0x26d   : > { %3167 = vmatprep.mubr.f32.mxu0 %v5425_v12  ;;  %3029 = vmatpush1.msra.mxu1 %v1945_v46  ;;  %v2137_v1 = vld [vmem:[#allocation8 + $0x1190] sm:$0xff]  ;;  %v1874_v37 = vld [vmem:[#allocation8 + $0x958] sm:$0xff] }
 0x26e   : > { %3109 = vmatprep.subr.mxu0 %v2186_v47  ;;  %2942 = vmatprep.mubr.f32.mxu1 %v5457_v8  ;;  %v1881_v33 = vld [vmem:[#allocation8 + $0x990] sm:$0xff]  ;;  %v2122_v40 = vld [vmem:[#allocation8 + $0x1118] sm:$0xff] }
 0x26f   : > { %3030 = vmatprep.subr.mxu1 %v1938_v48  ;;  %2943 = vmatmul.mubr.f32.gmra.mxu1 %v5455_v2  ;;  %v2129_v34 = vld [vmem:[#allocation8 + $0x1150] sm:$0xff]  ;;  %v1866_v42 = vld [vmem:[#allocation8 + $0x918] sm:$0xff] }
 0x270   : > { %3110 = vmatpush1.msra.mxu0 %v2185_v49  ;;  %3031 = vmatpush1.msra.mxu1 %v1937_v5  ;;  %v1873_v41 = vld [vmem:[#allocation8 + $0x950] sm:$0xff]  ;;  %v2114_v45 = vld [vmem:[#allocation8 + $0x10d8] sm:$0xff] }
 0x271   : > { %3090 = vmatprep.mubr.f32.mxu1 %v5398_v21  ;;  %3032 = vmatprep.subr.mxu1 %v1930_v51  ;;  %v2121_v58 = vld [vmem:[#allocation8 + $0x1110] sm:$0xff]  ;;  %v1858_v48 = vld [vmem:[#allocation8 + $0x8d8] sm:$0xff] }
 0x272   : > { %3111 = vmatprep.subr.mxu0 %v2178_v53  ;;  %3033 = vmatpush1.msra.mxu1 %v1929_v54  ;;  %v1865_v46 = vld [vmem:[#allocation8 + $0x910] sm:$0xff]  ;;  %v2106_v49 = vld [vmem:[#allocation8 + $0x1098] sm:$0xff] }
 0x273   : > { %3112 = vmatpush1.msra.mxu0 %v2177_v20  ;;  %3034 = vmatprep.subr.mxu1 %v1922_v55  ;;  %v2113_v47 = vld [vmem:[#allocation8 + $0x10d0] sm:$0xff]  ;;  %v1850_v53 = vld [vmem:[#allocation8 + $0x898] sm:$0xff] }
 0x274   : > { %3113 = vmatprep.subr.mxu0 %v2170_v56  ;;  %3035 = vmatpush1.msra.mxu1 %v1921_v57  ;;  %v1857_v5 = vld [vmem:[#allocation8 + $0x8d0] sm:$0xff]  ;;  %v2098_v54 = vld [vmem:[#allocation8 + $0x1058] sm:$0xff] }
 0x275   : > { %3114 = vmatpush1.msra.mxu0 %v2169_v59  ;;  %3036 = vmatprep.subr.mxu1 %v1914_v60  ;;  %v2105_v51 = vld [vmem:[#allocation8 + $0x1090] sm:$0xff]  ;;  %v1842_v56 = vld [vmem:[#allocation8 + $0x858] sm:$0xff] }
 0x276   : > { %3115 = vmatprep.subr.mxu0 %v2162_v62  ;;  %3037 = vmatpush1.msra.mxu1 %v1913_v0  ;;  %v1849_v20 = vld [vmem:[#allocation8 + $0x890] sm:$0xff]  ;;  %v2090_v57 = vld [vmem:[#allocation8 + $0x1018] sm:$0xff] }
 0x277   : > { %3116 = vmatpush1.msra.mxu0 %v2161_v19  ;;  %3038 = vmatprep.subr.mxu1 %v1906_v4  ;;  %v2097_v55 = vld [vmem:[#allocation8 + $0x1050] sm:$0xff]  ;;  %v1834_v62 = vld [vmem:[#allocation8 + $0x818] sm:$0xff] }
 0x278   : > { %3117 = vmatprep.subr.mxu0 %v2154_v7  ;;  %3039 = vmatpush1.msra.mxu1 %v1905_v9  ;;  %v1841_v59 = vld [vmem:[#allocation8 + $0x850] sm:$0xff]  ;;  %v2338_v0 = vld [vmem:[#allocation8 + $0x17d8] sm:$0xff] }
 0x279   : > { %3118 = vmatpush1.msra.mxu0 %v2153_v10  ;;  %3040 = vmatprep.subr.mxu1 %v1898_v11  ;;  %v2089_v60 = vld [vmem:[#allocation8 + $0x1010] sm:$0xff]  ;;  %v2082_v7 = vld [vmem:[#allocation8 + $0xfd8] sm:$0xff] }
 0x27a   : > { %3119 = vmatprep.subr.mxu0 %v2146_v13  ;;  %3041 = vmatpush1.msra.mxu1 %v1897_v14  ;;  %v1833_v19 = vld [vmem:[#allocation8 + $0x810] sm:$0xff]  ;;  %v2330_v9 = vld [vmem:[#allocation8 + $0x1798] sm:$0xff] }
 0x27b   : > { %3120 = vmatpush1.msra.mxu0 %v2145_v17  ;;  %3042 = vmatprep.subr.mxu1 %v1890_v3  ;;  %v2337_v4 = vld [vmem:[#allocation8 + $0x17d0] sm:$0xff]  ;;  %v2074_v13 = vld [vmem:[#allocation8 + $0xf98] sm:$0xff] }
 0x27c   : > { %3121 = vmatprep.subr.mxu0 %v2138_v22  ;;  %3043 = vmatpush1.msra.mxu1 %v1889_v23  ;;  %v2081_v10 = vld [vmem:[#allocation8 + $0xfd0] sm:$0xff]  ;;  %v2322_v14 = vld [vmem:[#allocation8 + $0x1758] sm:$0xff] }
 0x27d   : > { %3122 = vmatpush1.msra.mxu0 %v2137_v1  ;;  %3044 = vmatprep.subr.mxu1 %v1882_v25  ;;  %v2329_v11 = vld [vmem:[#allocation8 + $0x1790] sm:$0xff]  ;;  %v2066_v22 = vld [vmem:[#allocation8 + $0xf58] sm:$0xff] }
 0x27e   : > { %3123 = vmatprep.subr.mxu0 %v2130_v31  ;;  %3045 = vmatpush1.msra.mxu1 %v1881_v33  ;;  %v2073_v17 = vld [vmem:[#allocation8 + $0xf90] sm:$0xff]  ;;  %v2314_v23 = vld [vmem:[#allocation8 + $0x1718] sm:$0xff] }
 0x27f   : > { %3124 = vmatpush1.msra.mxu0 %v2129_v34  ;;  %3046 = vmatprep.subr.mxu1 %v1874_v37  ;;  %v2321_v3 = vld [vmem:[#allocation8 + $0x1750] sm:$0xff]  ;;  %v2058_v31 = vld [vmem:[#allocation8 + $0xf18] sm:$0xff] }
 0x280   : > { %3125 = vmatprep.subr.mxu0 %v2122_v40  ;;  %3047 = vmatpush1.msra.mxu1 %v1873_v41  ;;  %v2065_v1 = vld [vmem:[#allocation8 + $0xf50] sm:$0xff]  ;;  %v2306_v33 = vld [vmem:[#allocation8 + $0x16d8] sm:$0xff] }
 0x281   : > { %3126 = vmatpush1.msra.mxu0 %v2121_v58  ;;  %3048 = vmatprep.subr.mxu1 %v1866_v42  ;;  %v2313_v25 = vld [vmem:[#allocation8 + $0x1710] sm:$0xff]  ;;  %v2050_v40 = vld [vmem:[#allocation8 + $0xed8] sm:$0xff] }
 0x282   : > { %3127 = vmatprep.subr.mxu0 %v2114_v45  ;;  %3049 = vmatpush1.msra.mxu1 %v1865_v46  ;;  %v2057_v34 = vld [vmem:[#allocation8 + $0xf10] sm:$0xff]  ;;  %v2298_v41 = vld [vmem:[#allocation8 + $0x1698] sm:$0xff] }
 0x283   : > { %3128 = vmatpush1.msra.mxu0 %v2113_v47  ;;  %3050 = vmatprep.subr.mxu1 %v1858_v48  ;;  %v2305_v37 = vld [vmem:[#allocation8 + $0x16d0] sm:$0xff]  ;;  %v2042_v45 = vld [vmem:[#allocation8 + $0xe98] sm:$0xff] }
 0x284   : > { %3129 = vmatprep.subr.mxu0 %v2106_v49  ;;  %3051 = vmatpush1.msra.mxu1 %v1857_v5  ;;  %v2049_v58 = vld [vmem:[#allocation8 + $0xed0] sm:$0xff]  ;;  %v2290_v46 = vld [vmem:[#allocation8 + $0x1658] sm:$0xff] }
 0x285   : > { %3130 = vmatpush1.msra.mxu0 %v2105_v51  ;;  %3052 = vmatprep.subr.mxu1 %v1850_v53  ;;  %v2297_v42 = vld [vmem:[#allocation8 + $0x1690] sm:$0xff]  ;;  %v2034_v49 = vld [vmem:[#allocation8 + $0xe58] sm:$0xff] }
 0x286   : > { %3131 = vmatprep.subr.mxu0 %v2098_v54  ;;  %3053 = vmatpush1.msra.mxu1 %v1849_v20  ;;  %v2041_v47 = vld [vmem:[#allocation8 + $0xe90] sm:$0xff]  ;;  %v2282_v5 = vld [vmem:[#allocation8 + $0x1618] sm:$0xff] }
 0x287   : > { %3132 = vmatpush1.msra.mxu0 %v2097_v55  ;;  %3054 = vmatprep.subr.mxu1 %v1842_v56  ;;  %v2289_v48 = vld [vmem:[#allocation8 + $0x1650] sm:$0xff]  ;;  %v2026_v54 = vld [vmem:[#allocation8 + $0xe18] sm:$0xff] }
 0x288   : > { %3133 = vmatprep.subr.mxu0 %v2090_v57  ;;  %3055 = vmatpush1.msra.mxu1 %v1841_v59  ;;  %v2033_v51 = vld [vmem:[#allocation8 + $0xe50] sm:$0xff]  ;;  %v2274_v20 = vld [vmem:[#allocation8 + $0x15d8] sm:$0xff] }
 0x289   : > { %3134 = vmatpush1.msra.mxu0 %v2089_v60  ;;  %3056 = vmatprep.subr.mxu1 %v1834_v62  ;;  %v2281_v53 = vld [vmem:[#allocation8 + $0x1610] sm:$0xff]  ;;  %v2018_v57 = vld [vmem:[#allocation8 + $0xdd8] sm:$0xff] }
 0x28a   : > { %3135 = vmatprep.subr.mxu0 %v2338_v0  ;;  %3057 = vmatpush1.msra.mxu1 %v1833_v19  ;;  %v2025_v55 = vld [vmem:[#allocation8 + $0xe10] sm:$0xff]  ;;  %v2266_v59 = vld [vmem:[#allocation8 + $0x1598] sm:$0xff] }
 0x28b   : > { %3136 = vmatpush2.msra.mxu0 %v2337_v4  ;;  %3058 = vmatprep.subr.mxu1 %v2082_v7  ;;  %v2273_v56 = vld [vmem:[#allocation8 + $0x15d0] sm:$0xff]  ;;  %v2010_v0 = vld [vmem:[#allocation8 + $0xd98] sm:$0xff] }
 0x28c   : > { %3137 = vmatprep.subr.mxu0 %v2330_v9  ;;  %3059 = vmatpush2.msra.mxu1 %v2081_v10  ;;  %v2017_v60 = vld [vmem:[#allocation8 + $0xdd0] sm:$0xff]  ;;  %v2258_v19 = vld [vmem:[#allocation8 + $0x1558] sm:$0xff] }
 0x28d   : > { %3138 = vmatpush2.msra.mxu0 %v2329_v11  ;;  %3060 = vmatprep.subr.mxu1 %v2074_v13  ;;  %v2265_v62 = vld [vmem:[#allocation8 + $0x1590] sm:$0xff]  ;;  %v2002_v9 = vld [vmem:[#allocation8 + $0xd58] sm:$0xff] }
 0x28e   : > { %3139 = vmatprep.subr.mxu0 %v2322_v14  ;;  %3061 = vmatpush2.msra.mxu1 %v2073_v17  ;;  %v2009_v4 = vld [vmem:[#allocation8 + $0xd90] sm:$0xff]  ;;  %v2250_v10 = vld [vmem:[#allocation8 + $0x1518] sm:$0xff] }
 0x28f   : > { %3140 = vmatpush2.msra.mxu0 %v2321_v3  ;;  %3062 = vmatprep.subr.mxu1 %v2066_v22  ;;  %v2257_v7 = vld [vmem:[#allocation8 + $0x1550] sm:$0xff]  ;;  %v1994_v14 = vld [vmem:[#allocation8 + $0xd18] sm:$0xff] }
 0x290   : > { %3141 = vmatprep.subr.mxu0 %v2314_v23  ;;  %3063 = vmatpush2.msra.mxu1 %v2065_v1  ;;  %v2001_v11 = vld [vmem:[#allocation8 + $0xd50] sm:$0xff]  ;;  %v2242_v17 = vld [vmem:[#allocation8 + $0x14d8] sm:$0xff] }
 0x291   : > { %3142 = vmatpush2.msra.mxu0 %v2313_v25  ;;  %3064 = vmatprep.subr.mxu1 %v2058_v31  ;;  %v2249_v13 = vld [vmem:[#allocation8 + $0x1510] sm:$0xff]  ;;  %v1986_v23 = vld [vmem:[#allocation8 + $0xcd8] sm:$0xff] }
 0x292   : > { %3143 = vmatprep.subr.mxu0 %v2306_v33  ;;  %3065 = vmatpush2.msra.mxu1 %v2057_v34  ;;  %v1993_v3 = vld [vmem:[#allocation8 + $0xd10] sm:$0xff]  ;;  %v2234_v1 = vld [vmem:[#allocation8 + $0x1498] sm:$0xff] }
 0x293   : > { %3144 = vmatpush2.msra.mxu0 %v2305_v37  ;;  %3066 = vmatprep.subr.mxu1 %v2050_v40  ;;  %v2241_v22 = vld [vmem:[#allocation8 + $0x14d0] sm:$0xff]  ;;  %v1978_v33 = vld [vmem:[#allocation8 + $0xc98] sm:$0xff] }
 0x294   : > { %3145 = vmatprep.subr.mxu0 %v2298_v41  ;;  %3067 = vmatpush2.msra.mxu1 %v2049_v58  ;;  %v1985_v25 = vld [vmem:[#allocation8 + $0xcd0] sm:$0xff]  ;;  %v2226_v34 = vld [vmem:[#allocation8 + $0x1458] sm:$0xff] }
 0x295   : > { %3146 = vmatpush2.msra.mxu0 %v2297_v42  ;;  %3068 = vmatprep.subr.mxu1 %v2042_v45  ;;  %v2233_v31 = vld [vmem:[#allocation8 + $0x1490] sm:$0xff]  ;;  %v1970_v41 = vld [vmem:[#allocation8 + $0xc58] sm:$0xff] }
 0x296   : > { %3147 = vmatprep.subr.mxu0 %v2290_v46  ;;  %3069 = vmatpush2.msra.mxu1 %v2041_v47  ;;  %v1977_v37 = vld [vmem:[#allocation8 + $0xc90] sm:$0xff]  ;;  %v2218_v58 = vld [vmem:[#allocation8 + $0x1418] sm:$0xff] }
 0x297   : > { %3148 = vmatpush2.msra.mxu0 %v2289_v48  ;;  %3070 = vmatprep.subr.mxu1 %v2034_v49  ;;  %v2225_v40 = vld [vmem:[#allocation8 + $0x1450] sm:$0xff]  ;;  %v1962_v46 = vld [vmem:[#allocation8 + $0xc18] sm:$0xff]  ;;  %v1700_v48 = vld [vmem:[#allocation8 + $0x3e8] sm:$0xff] }
 0x298   : > { %3149 = vmatprep.subr.mxu0 %v2282_v5  ;;  %3071 = vmatpush2.msra.mxu1 %v2033_v51  ;;  %v1969_v42 = vld [vmem:[#allocation8 + $0xc50] sm:$0xff]  ;;  %v2466_v49 = vld [vmem:[#allocation8 + $0x1bd8] sm:$0xff]  ;;  %v1699_v51 = vld [vmem:[#allocation8 + $0x3e0] sm:$0xff] }
 0x299   : > { %3150 = vmatpush2.msra.mxu0 %v2281_v53  ;;  %3072 = vmatprep.subr.mxu1 %v2026_v54  ;;  %v2217_v45 = vld [vmem:[#allocation8 + $0x1410] sm:$0xff]  ;;  %v2458_v53 = vld [vmem:[#allocation8 + $0x1b98] sm:$0xff]  ;;  %v1692_v54 = vld [vmem:[#allocation8 + $0x3a8] sm:$0xff] }
 0x29a   : > { %3151 = vmatprep.subr.mxu0 %v2274_v20  ;;  %3073 = vmatpush2.msra.mxu1 %v2025_v55  ;;  %v1961_v47 = vld [vmem:[#allocation8 + $0xc10] sm:$0xff]  ;;  %v1691_v55 = vld [vmem:[#allocation8 + $0x3a0] sm:$0xff] }
 0x29b   : > { %3152 = vmatpush2.msra.mxu0 %v2273_v56  ;;  %3074 = vmatprep.subr.mxu1 %v2018_v57  ;;  %v2465_v5 = vld [vmem:[#allocation8 + $0x1bd0] sm:$0xff]  ;;  %v2450_v56 = vld [vmem:[#allocation8 + $0x1b58] sm:$0xff]  ;;  %v1684_v57 = vld [vmem:[#allocation8 + $0x368] sm:$0xff] }
 0x29c   : > { %3153 = vmatprep.subr.mxu0 %v2266_v59  ;;  %3075 = vmatpush2.msra.mxu1 %v2017_v60  ;;  %v2457_v20 = vld [vmem:[#allocation8 + $0x1b90] sm:$0xff]  ;;  %v1683_v60 = vld [vmem:[#allocation8 + $0x360] sm:$0xff] }
 0x29d   : > { %3154 = vmatpush2.msra.mxu0 %v2265_v62  ;;  %3076 = vmatprep.subr.mxu1 %v2010_v0  ;;  %v2449_v59 = vld [vmem:[#allocation8 + $0x1b50] sm:$0xff]  ;;  %v2442_v62 = vld [vmem:[#allocation8 + $0x1b18] sm:$0xff]  ;;  %v1676_v0 = vld [vmem:[#allocation8 + $0x328] sm:$0xff] }
 0x29e   : > { %3155 = vmatprep.subr.mxu0 %v2258_v19  ;;  %3077 = vmatpush2.msra.mxu1 %v2009_v4  ;;  %v2441_v19 = vld [vmem:[#allocation8 + $0x1b10] sm:$0xff]  ;;  %v1675_v4 = vld [vmem:[#allocation8 + $0x320] sm:$0xff] }
 0x29f   : > { %3156 = vmatpush2.msra.mxu0 %v2257_v7  ;;  %3078 = vmatprep.subr.mxu1 %v2002_v9  ;;  %v2434_v7 = vld [vmem:[#allocation8 + $0x1ad8] sm:$0xff]  ;;  %v1668_v9 = vld [vmem:[#allocation8 + $0x2e8] sm:$0xff] }
 0x2a0   : > { %3157 = vmatprep.subr.mxu0 %v2250_v10  ;;  %3079 = vmatpush2.msra.mxu1 %v2001_v11  ;;  %v2433_v10 = vld [vmem:[#allocation8 + $0x1ad0] sm:$0xff]  ;;  %v1667_v11 = vld [vmem:[#allocation8 + $0x2e0] sm:$0xff] }
 0x2a1   : > { %3158 = vmatpush2.msra.mxu0 %v2249_v13  ;;  %3080 = vmatprep.subr.mxu1 %v1994_v14  ;;  %v2426_v13 = vld [vmem:[#allocation8 + $0x1a98] sm:$0xff]  ;;  %v1660_v14 = vld [vmem:[#allocation8 + $0x2a8] sm:$0xff] }
 0x2a2   : > { %3159 = vmatprep.subr.mxu0 %v2242_v17  ;;  %3081 = vmatpush2.msra.mxu1 %v1993_v3  ;;  %v2425_v17 = vld [vmem:[#allocation8 + $0x1a90] sm:$0xff]  ;;  %v1659_v3 = vld [vmem:[#allocation8 + $0x2a0] sm:$0xff] }
 0x2a3   : > { %3160 = vmatpush2.msra.mxu0 %v2241_v22  ;;  %3082 = vmatprep.subr.mxu1 %v1986_v23  ;;  %v2418_v22 = vld [vmem:[#allocation8 + $0x1a58] sm:$0xff]  ;;  %v1652_v23 = vld [vmem:[#allocation8 + $0x268] sm:$0xff] }
 0x2a4   : > { %3161 = vmatprep.subr.mxu0 %v2234_v1  ;;  %3083 = vmatpush2.msra.mxu1 %v1985_v25  ;;  %v2417_v1 = vld [vmem:[#allocation8 + $0x1a50] sm:$0xff]  ;;  %v1651_v25 = vld [vmem:[#allocation8 + $0x260] sm:$0xff] }
 0x2a5   : > { %3162 = vmatpush2.msra.mxu0 %v2233_v31  ;;  %3084 = vmatprep.subr.mxu1 %v1978_v33  ;;  %v2410_v31 = vld [vmem:[#allocation8 + $0x1a18] sm:$0xff]  ;;  %v1644_v33 = vld [vmem:[#allocation8 + $0x228] sm:$0xff] }
 0x2a6   : > { %3163 = vmatprep.subr.mxu0 %v2226_v34  ;;  %3085 = vmatpush2.msra.mxu1 %v1977_v37  ;;  %v2409_v34 = vld [vmem:[#allocation8 + $0x1a10] sm:$0xff]  ;;  %v1643_v37 = vld [vmem:[#allocation8 + $0x220] sm:$0xff] }
 0x2a7   : > { %3164 = vmatpush2.msra.mxu0 %v2225_v40  ;;  %3086 = vmatprep.subr.mxu1 %v1970_v41  ;;  %v2402_v40 = vld [vmem:[#allocation8 + $0x19d8] sm:$0xff]  ;;  %v1636_v41 = vld [vmem:[#allocation8 + $0x1e8] sm:$0xff] }
 0x2a8   : > { %3165 = vmatprep.subr.mxu0 %v2218_v58  ;;  %3087 = vmatpush2.msra.mxu1 %v1969_v42  ;;  %v2401_v58 = vld [vmem:[#allocation8 + $0x19d0] sm:$0xff]  ;;  %v1635_v42 = vld [vmem:[#allocation8 + $0x1e0] sm:$0xff] }
 0x2a9   : > { %3166 = vmatpush2.msra.mxu0 %v2217_v45  ;;  %3088 = vmatprep.subr.mxu1 %v1962_v46  ;;  %v2394_v45 = vld [vmem:[#allocation8 + $0x1998] sm:$0xff]  ;;  %v1628_v46 = vld [vmem:[#allocation8 + $0x1a8] sm:$0xff] }
 0x2aa   : > { %3168 = vmatmul.mubr.f32.vlgmr.msra.gmra.mxu0 %v5427_v30  ;;  %3089 = vmatpush2.msra.mxu1 %v1961_v47  ;;  %v2393_v47 = vld [vmem:[#allocation8 + $0x1990] sm:$0xff] }
 0x2ab   : > { %3257 = vmatprep.subr.mxu0 %v1700_v48  ;;  %3091 = vmatmul.mubr.f32.vlgmr.msra.gmra.mxu1 %v5405_v39  ;;  %v1627_v48 = vld [vmem:[#allocation8 + $0x1a0] sm:$0xff] }
 0x2ac   : > { %3180 = vmatprep.subr.mxu1 %v2466_v49  ;;  %3096 = vmatprep.mubr.f32.mxu1 %v5410_v44  ;;  %v2386_v49 = vld [vmem:[#allocation8 + $0x1958] sm:$0xff] }
 0x2ad   : > { %3173 = vmatprep.mubr.f32.mxu0 %v5433_v29  ;;  %3181 = vmatpush1.msra.mxu1 %v2465_v5  ;;  %v1620_v5 = vld [vmem:[#allocation8 + $0x168] sm:$0xff] }
 0x2ae   : > { %3258 = vmatpush1.msra.mxu0 %v1699_v51  ;;  %3182 = vmatprep.subr.mxu1 %v2458_v53  ;;  %v2385_v51 = vld [vmem:[#allocation8 + $0x1950] sm:$0xff]  ;;  %v1619_v53 = vld [vmem:[#allocation8 + $0x160] sm:$0xff] }
 0x2af   : > { %3259 = vmatprep.subr.mxu0 %v1692_v54  ;;  %3183 = vmatpush1.msra.mxu1 %v2457_v20  ;;  %v2378_v54 = vld [vmem:[#allocation8 + $0x1918] sm:$0xff]  ;;  %v1612_v20 = vld [vmem:[#allocation8 + $0x128] sm:$0xff] }
 0x2b0   : > { %3260 = vmatpush1.msra.mxu0 %v1691_v55  ;;  %3097 = vmatmul.mubr.f32.gmra.mxu1 %v5408_v43  ;;  %v2377_v55 = vld [vmem:[#allocation8 + $0x1910] sm:$0xff] }
 0x2b1   : > { %3174 = vmatmul.mubr.f32.gmra.mxu0 %v5431_v26  ;;  %3184 = vmatprep.subr.mxu1 %v2450_v56  ;;  %v1611_v56 = vld [vmem:[#allocation8 + $0x120] sm:$0xff] }
 0x2b2   : > { %3261 = vmatprep.subr.mxu0 %v1684_v57  ;;  %3185 = vmatpush1.msra.mxu1 %v2449_v59  ;;  %v2370_v57 = vld [vmem:[#allocation8 + $0x18d8] sm:$0xff]  ;;  %v1604_v59 = vld [vmem:[#allocation8 + $0xe8] sm:$0xff] }
 0x2b3   : > { %3244 = vmatprep.mubr.f32.mxu1 %v5448_v27  ;;  %3262 = vmatpush1.msra.mxu0 %v1683_v60  ;;  %v2369_v60 = vld [vmem:[#allocation8 + $0x18d0] sm:$0xff] }
 0x2b4   : > { %3321 = vmatprep.mubr.f32.mxu0 %v5373_v24  ;;  %3186 = vmatprep.subr.mxu1 %v2442_v62  ;;  %v1603_v62 = vld [vmem:[#allocation8 + $0xe0] sm:$0xff] }
 0x2b5   : > { %3263 = vmatprep.subr.mxu0 %v1676_v0  ;;  %3187 = vmatpush1.msra.mxu1 %v2441_v19  ;;  %v2362_v0 = vld [vmem:[#allocation8 + $0x1898] sm:$0xff]  ;;  %v1596_v19 = vld [vmem:[#allocation8 + $0xa8] sm:$0xff] }
 0x2b6   : > { %3264 = vmatpush1.msra.mxu0 %v1675_v4  ;;  %3188 = vmatprep.subr.mxu1 %v2434_v7  ;;  %v2361_v4 = vld [vmem:[#allocation8 + $0x1890] sm:$0xff]  ;;  %v1595_v7 = vld [vmem:[#allocation8 + $0xa0] sm:$0xff] }
 0x2b7   : > { %3265 = vmatprep.subr.mxu0 %v1668_v9  ;;  %3189 = vmatpush1.msra.mxu1 %v2433_v10  ;;  %v2354_v9 = vld [vmem:[#allocation8 + $0x1858] sm:$0xff]  ;;  %v1588_v10 = vld [vmem:[#allocation8 + $0x68] sm:$0xff] }
 0x2b8   : > { %3266 = vmatpush1.msra.mxu0 %v1667_v11  ;;  %3190 = vmatprep.subr.mxu1 %v2426_v13  ;;  %v2353_v11 = vld [vmem:[#allocation8 + $0x1850] sm:$0xff]  ;;  %v1587_v13 = vld [vmem:[#allocation8 + $0x60] sm:$0xff] }
 0x2b9   : > { %3267 = vmatprep.subr.mxu0 %v1660_v14  ;;  %3191 = vmatpush1.msra.mxu1 %v2425_v17  ;;  %v2346_v14 = vld [vmem:[#allocation8 + $0x1818] sm:$0xff]  ;;  %v1580_v17 = vld [vmem:[#allocation8 + $0x28] sm:$0xff] }
 0x2ba   : > { %3268 = vmatpush1.msra.mxu0 %v1659_v3  ;;  %3192 = vmatprep.subr.mxu1 %v2418_v22  ;;  %v2345_v3 = vld [vmem:[#allocation8 + $0x1810] sm:$0xff]  ;;  %v1579_v22 = vld [vmem:[#allocation8 + $0x20] sm:$0xff] }
 0x2bb   : > { %3269 = vmatprep.subr.mxu0 %v1652_v23  ;;  %3193 = vmatpush1.msra.mxu1 %v2417_v1  ;;  %v2594_v23 = vld [vmem:[#allocation8 + $0x1fd8] sm:$0xff]  ;;  %v1828_v1 = vld [vmem:[#allocation8 + $0x7e8] sm:$0xff] }
 0x2bc   : > { %3270 = vmatpush1.msra.mxu0 %v1651_v25  ;;  %3194 = vmatprep.subr.mxu1 %v2410_v31  ;;  %v2593_v25 = vld [vmem:[#allocation8 + $0x1fd0] sm:$0xff]  ;;  %v1827_v31 = vld [vmem:[#allocation8 + $0x7e0] sm:$0xff] }
 0x2bd   : > { %3271 = vmatprep.subr.mxu0 %v1644_v33  ;;  %3195 = vmatpush1.msra.mxu1 %v2409_v34  ;;  %v2586_v33 = vld [vmem:[#allocation8 + $0x1f98] sm:$0xff]  ;;  %v1820_v34 = vld [vmem:[#allocation8 + $0x7a8] sm:$0xff] }
 0x2be   : > { %3272 = vmatpush1.msra.mxu0 %v1643_v37  ;;  %3196 = vmatprep.subr.mxu1 %v2402_v40  ;;  %v2585_v37 = vld [vmem:[#allocation8 + $0x1f90] sm:$0xff]  ;;  %v1819_v40 = vld [vmem:[#allocation8 + $0x7a0] sm:$0xff] }
 0x2bf   : > { %3273 = vmatprep.subr.mxu0 %v1636_v41  ;;  %3197 = vmatpush1.msra.mxu1 %v2401_v58  ;;  %v2578_v41 = vld [vmem:[#allocation8 + $0x1f58] sm:$0xff]  ;;  %v1812_v58 = vld [vmem:[#allocation8 + $0x768] sm:$0xff] }
 0x2c0   : > { %3274 = vmatpush1.msra.mxu0 %v1635_v42  ;;  %3198 = vmatprep.subr.mxu1 %v2394_v45  ;;  %v2577_v42 = vld [vmem:[#allocation8 + $0x1f50] sm:$0xff]  ;;  %v1811_v45 = vld [vmem:[#allocation8 + $0x760] sm:$0xff] }
 0x2c1   : > { %3275 = vmatprep.subr.mxu0 %v1628_v46  ;;  %3199 = vmatpush1.msra.mxu1 %v2393_v47  ;;  %v2570_v46 = vld [vmem:[#allocation8 + $0x1f18] sm:$0xff]  ;;  %v1804_v47 = vld [vmem:[#allocation8 + $0x728] sm:$0xff] }
 0x2c2   : > { %3276 = vmatpush1.msra.mxu0 %v1627_v48  ;;  %3200 = vmatprep.subr.mxu1 %v2386_v49  ;;  %v2569_v48 = vld [vmem:[#allocation8 + $0x1f10] sm:$0xff]  ;;  %v1803_v49 = vld [vmem:[#allocation8 + $0x720] sm:$0xff] }
 0x2c3   : > { %3277 = vmatprep.subr.mxu0 %v1620_v5  ;;  %3201 = vmatpush1.msra.mxu1 %v2385_v51  ;;  %v2562_v5 = vld [vmem:[#allocation8 + $0x1ed8] sm:$0xff]  ;;  %v1796_v51 = vld [vmem:[#allocation8 + $0x6e8] sm:$0xff] }
 0x2c4   : > { %3278 = vmatpush1.msra.mxu0 %v1619_v53  ;;  %3202 = vmatprep.subr.mxu1 %v2378_v54  ;;  %v2561_v53 = vld [vmem:[#allocation8 + $0x1ed0] sm:$0xff]  ;;  %v1795_v54 = vld [vmem:[#allocation8 + $0x6e0] sm:$0xff] }
 0x2c5   : > { %3279 = vmatprep.subr.mxu0 %v1612_v20  ;;  %3203 = vmatpush1.msra.mxu1 %v2377_v55  ;;  %v2554_v20 = vld [vmem:[#allocation8 + $0x1e98] sm:$0xff]  ;;  %v1788_v55 = vld [vmem:[#allocation8 + $0x6a8] sm:$0xff] }
 0x2c6   : > { %3280 = vmatpush1.msra.mxu0 %v1611_v56  ;;  %3204 = vmatprep.subr.mxu1 %v2370_v57  ;;  %v2553_v56 = vld [vmem:[#allocation8 + $0x1e90] sm:$0xff]  ;;  %v1787_v57 = vld [vmem:[#allocation8 + $0x6a0] sm:$0xff] }
 0x2c7   : > { %3281 = vmatprep.subr.mxu0 %v1604_v59  ;;  %3205 = vmatpush1.msra.mxu1 %v2369_v60  ;;  %v2546_v59 = vld [vmem:[#allocation8 + $0x1e58] sm:$0xff]  ;;  %v1780_v60 = vld [vmem:[#allocation8 + $0x668] sm:$0xff] }
 0x2c8   : > { %3282 = vmatpush1.msra.mxu0 %v1603_v62  ;;  %3206 = vmatprep.subr.mxu1 %v2362_v0  ;;  %v2545_v62 = vld [vmem:[#allocation8 + $0x1e50] sm:$0xff]  ;;  %v1779_v0 = vld [vmem:[#allocation8 + $0x660] sm:$0xff] }
 0x2c9   : > { %3283 = vmatprep.subr.mxu0 %v1596_v19  ;;  %3207 = vmatpush1.msra.mxu1 %v2361_v4  ;;  %v2538_v19 = vld [vmem:[#allocation8 + $0x1e18] sm:$0xff]  ;;  %v1772_v4 = vld [vmem:[#allocation8 + $0x628] sm:$0xff] }
 0x2ca   : > { %3284 = vmatpush1.msra.mxu0 %v1595_v7  ;;  %3208 = vmatprep.subr.mxu1 %v2354_v9  ;;  %v2537_v7 = vld [vmem:[#allocation8 + $0x1e10] sm:$0xff]  ;;  %v1771_v9 = vld [vmem:[#allocation8 + $0x620] sm:$0xff] }
 0x2cb   : > { %3285 = vmatprep.subr.mxu0 %v1588_v10  ;;  %3209 = vmatpush1.msra.mxu1 %v2353_v11  ;;  %v2530_v10 = vld [vmem:[#allocation8 + $0x1dd8] sm:$0xff]  ;;  %v1764_v11 = vld [vmem:[#allocation8 + $0x5e8] sm:$0xff] }
 0x2cc   : > { %3286 = vmatpush1.msra.mxu0 %v1587_v13  ;;  %3210 = vmatprep.subr.mxu1 %v2346_v14  ;;  %v2529_v13 = vld [vmem:[#allocation8 + $0x1dd0] sm:$0xff]  ;;  %v1763_v14 = vld [vmem:[#allocation8 + $0x5e0] sm:$0xff] }
 0x2cd   : > { %3287 = vmatprep.subr.mxu0 %v1580_v17  ;;  %3211 = vmatpush1.msra.mxu1 %v2345_v3  ;;  %v2522_v17 = vld [vmem:[#allocation8 + $0x1d98] sm:$0xff]  ;;  %v1756_v3 = vld [vmem:[#allocation8 + $0x5a8] sm:$0xff] }
 0x2ce   : > { %3288 = vmatpush1.msra.mxu0 %v1579_v22  ;;  %3212 = vmatprep.subr.mxu1 %v2594_v23  ;;  %v2521_v22 = vld [vmem:[#allocation8 + $0x1d90] sm:$0xff]  ;;  %v1755_v23 = vld [vmem:[#allocation8 + $0x5a0] sm:$0xff] }
 0x2cf   : > { %3289 = vmatprep.subr.mxu0 %v1828_v1  ;;  %3213 = vmatpush2.msra.mxu1 %v2593_v25  ;;  %v2514_v1 = vld [vmem:[#allocation8 + $0x1d58] sm:$0xff]  ;;  %v1748_v25 = vld [vmem:[#allocation8 + $0x568] sm:$0xff] }
 0x2d0   : > { %3290 = vmatpush2.msra.mxu0 %v1827_v31  ;;  %3214 = vmatprep.subr.mxu1 %v2586_v33  ;;  %v2513_v31 = vld [vmem:[#allocation8 + $0x1d50] sm:$0xff]  ;;  %v1747_v33 = vld [vmem:[#allocation8 + $0x560] sm:$0xff] }
 0x2d1   : > { %3291 = vmatprep.subr.mxu0 %v1820_v34  ;;  %3215 = vmatpush2.msra.mxu1 %v2585_v37  ;;  %v2506_v34 = vld [vmem:[#allocation8 + $0x1d18] sm:$0xff]  ;;  %v1740_v37 = vld [vmem:[#allocation8 + $0x528] sm:$0xff] }
 0x2d2   : > { %3292 = vmatpush2.msra.mxu0 %v1819_v40  ;;  %3216 = vmatprep.subr.mxu1 %v2578_v41  ;;  %v2505_v40 = vld [vmem:[#allocation8 + $0x1d10] sm:$0xff]  ;;  %v1739_v41 = vld [vmem:[#allocation8 + $0x520] sm:$0xff] }
 0x2d3   : > { %3293 = vmatprep.subr.mxu0 %v1812_v58  ;;  %3217 = vmatpush2.msra.mxu1 %v2577_v42  ;;  %v2498_v58 = vld [vmem:[#allocation8 + $0x1cd8] sm:$0xff]  ;;  %v1732_v42 = vld [vmem:[#allocation8 + $0x4e8] sm:$0xff] }
 0x2d4   : > { %3294 = vmatpush2.msra.mxu0 %v1811_v45  ;;  %3218 = vmatprep.subr.mxu1 %v2570_v46  ;;  %v2497_v45 = vld [vmem:[#allocation8 + $0x1cd0] sm:$0xff]  ;;  %v1731_v46 = vld [vmem:[#allocation8 + $0x4e0] sm:$0xff] }
 0x2d5   : > { %3295 = vmatprep.subr.mxu0 %v1804_v47  ;;  %3219 = vmatpush2.msra.mxu1 %v2569_v48  ;;  %v2490_v47 = vld [vmem:[#allocation8 + $0x1c98] sm:$0xff]  ;;  %v1724_v48 = vld [vmem:[#allocation8 + $0x4a8] sm:$0xff] }
 0x2d6   : > { %3296 = vmatpush2.msra.mxu0 %v1803_v49  ;;  %3220 = vmatprep.subr.mxu1 %v2562_v5  ;;  %v2489_v49 = vld [vmem:[#allocation8 + $0x1c90] sm:$0xff]  ;;  %v1723_v5 = vld [vmem:[#allocation8 + $0x4a0] sm:$0xff] }
 0x2d7   : > { %3297 = vmatprep.subr.mxu0 %v1796_v51  ;;  %3221 = vmatpush2.msra.mxu1 %v2561_v53  ;;  %v2482_v51 = vld [vmem:[#allocation8 + $0x1c58] sm:$0xff]  ;;  %v1716_v53 = vld [vmem:[#allocation8 + $0x468] sm:$0xff] }
 0x2d8   : > { %3298 = vmatpush2.msra.mxu0 %v1795_v54  ;;  %3222 = vmatprep.subr.mxu1 %v2554_v20  ;;  %v2481_v54 = vld [vmem:[#allocation8 + $0x1c50] sm:$0xff]  ;;  %v1715_v20 = vld [vmem:[#allocation8 + $0x460] sm:$0xff] }
 0x2d9   : > { %3299 = vmatprep.subr.mxu0 %v1788_v55  ;;  %3223 = vmatpush2.msra.mxu1 %v2553_v56  ;;  %v2474_v55 = vld [vmem:[#allocation8 + $0x1c18] sm:$0xff]  ;;  %v1708_v56 = vld [vmem:[#allocation8 + $0x428] sm:$0xff] }
 0x2da   : > { %3300 = vmatpush2.msra.mxu0 %v1787_v57  ;;  %3224 = vmatprep.subr.mxu1 %v2546_v59  ;;  %v2473_v57 = vld [vmem:[#allocation8 + $0x1c10] sm:$0xff]  ;;  %v1707_v59 = vld [vmem:[#allocation8 + $0x420] sm:$0xff] }
 0x2db   : > { %3301 = vmatprep.subr.mxu0 %v1780_v60  ;;  %3225 = vmatpush2.msra.mxu1 %v2545_v62  ;;  %v1956_v60 = vld [vmem:[#allocation8 + $0xbe8] sm:$0xff] }
 0x2dc   : > { %3302 = vmatpush2.msra.mxu0 %v1779_v0  ;;  %3226 = vmatprep.subr.mxu1 %v2538_v19  ;;  %v2212_v62 = vld [vmem:[#allocation8 + $0x13e8] sm:$0xff]  ;;  %v1955_v0 = vld [vmem:[#allocation8 + $0xbe0] sm:$0xff] }
 0x2dd   : > { %3303 = vmatprep.subr.mxu0 %v1772_v4  ;;  %3227 = vmatpush2.msra.mxu1 %v2537_v7  ;;  %v2211_v19 = vld [vmem:[#allocation8 + $0x13e0] sm:$0xff]  ;;  %v1948_v4 = vld [vmem:[#allocation8 + $0xba8] sm:$0xff] }
 0x2de   : > { %3304 = vmatpush2.msra.mxu0 %v1771_v9  ;;  %3228 = vmatprep.subr.mxu1 %v2530_v10  ;;  %v2204_v7 = vld [vmem:[#allocation8 + $0x13a8] sm:$0xff]  ;;  %v1947_v9 = vld [vmem:[#allocation8 + $0xba0] sm:$0xff] }
 0x2df   : > { %3305 = vmatprep.subr.mxu0 %v1764_v11  ;;  %3229 = vmatpush2.msra.mxu1 %v2529_v13  ;;  %v2203_v10 = vld [vmem:[#allocation8 + $0x13a0] sm:$0xff]  ;;  %v1940_v11 = vld [vmem:[#allocation8 + $0xb68] sm:$0xff] }
 0x2e0   : > { %3306 = vmatpush2.msra.mxu0 %v1763_v14  ;;  %3230 = vmatprep.subr.mxu1 %v2522_v17  ;;  %v2196_v13 = vld [vmem:[#allocation8 + $0x1368] sm:$0xff]  ;;  %v1939_v14 = vld [vmem:[#allocation8 + $0xb60] sm:$0xff] }
 0x2e1   : > { %3307 = vmatprep.subr.mxu0 %v1756_v3  ;;  %3231 = vmatpush2.msra.mxu1 %v2521_v22  ;;  %v2195_v17 = vld [vmem:[#allocation8 + $0x1360] sm:$0xff]  ;;  %v1932_v3 = vld [vmem:[#allocation8 + $0xb28] sm:$0xff] }
 0x2e2   : > { %3308 = vmatpush2.msra.mxu0 %v1755_v23  ;;  %3232 = vmatprep.subr.mxu1 %v2514_v1  ;;  %v2188_v22 = vld [vmem:[#allocation8 + $0x1328] sm:$0xff]  ;;  %v1931_v23 = vld [vmem:[#allocation8 + $0xb20] sm:$0xff] }
 0x2e3   : > { %3309 = vmatprep.subr.mxu0 %v1748_v25  ;;  %3233 = vmatpush2.msra.mxu1 %v2513_v31  ;;  %v2187_v1 = vld [vmem:[#allocation8 + $0x1320] sm:$0xff]  ;;  %v1924_v25 = vld [vmem:[#allocation8 + $0xae8] sm:$0xff] }
 0x2e4   : > { %3310 = vmatpush2.msra.mxu0 %v1747_v33  ;;  %3234 = vmatprep.subr.mxu1 %v2506_v34  ;;  %v2180_v31 = vld [vmem:[#allocation8 + $0x12e8] sm:$0xff]  ;;  %v1923_v33 = vld [vmem:[#allocation8 + $0xae0] sm:$0xff] }
 0x2e5   : > { %3311 = vmatprep.subr.mxu0 %v1740_v37  ;;  %3235 = vmatpush2.msra.mxu1 %v2505_v40  ;;  %v2179_v34 = vld [vmem:[#allocation8 + $0x12e0] sm:$0xff]  ;;  %v1916_v37 = vld [vmem:[#allocation8 + $0xaa8] sm:$0xff] }
 0x2e6   : > { %3312 = vmatpush2.msra.mxu0 %v1739_v41  ;;  %3236 = vmatprep.subr.mxu1 %v2498_v58  ;;  %v2172_v40 = vld [vmem:[#allocation8 + $0x12a8] sm:$0xff]  ;;  %v1915_v41 = vld [vmem:[#allocation8 + $0xaa0] sm:$0xff] }
 0x2e7   : > { %3313 = vmatprep.subr.mxu0 %v1732_v42  ;;  %3237 = vmatpush2.msra.mxu1 %v2497_v45  ;;  %v2171_v58 = vld [vmem:[#allocation8 + $0x12a0] sm:$0xff]  ;;  %v1908_v42 = vld [vmem:[#allocation8 + $0xa68] sm:$0xff] }
 0x2e8   : > { %3314 = vmatpush2.msra.mxu0 %v1731_v46  ;;  %3238 = vmatprep.subr.mxu1 %v2490_v47  ;;  %v2164_v45 = vld [vmem:[#allocation8 + $0x1268] sm:$0xff]  ;;  %v1907_v46 = vld [vmem:[#allocation8 + $0xa60] sm:$0xff] }
 0x2e9   : > { %3315 = vmatprep.subr.mxu0 %v1724_v48  ;;  %3239 = vmatpush2.msra.mxu1 %v2489_v49  ;;  %v2163_v47 = vld [vmem:[#allocation8 + $0x1260] sm:$0xff]  ;;  %v1900_v48 = vld [vmem:[#allocation8 + $0xa28] sm:$0xff] }
 0x2ea   : > { %3316 = vmatpush2.msra.mxu0 %v1723_v5  ;;  %3240 = vmatprep.subr.mxu1 %v2482_v51  ;;  %v2156_v49 = vld [vmem:[#allocation8 + $0x1228] sm:$0xff]  ;;  %v1899_v5 = vld [vmem:[#allocation8 + $0xa20] sm:$0xff] }
 0x2eb   : > { %3317 = vmatprep.subr.mxu0 %v1716_v53  ;;  %3241 = vmatpush2.msra.mxu1 %v2481_v54  ;;  %v2155_v51 = vld [vmem:[#allocation8 + $0x1220] sm:$0xff]  ;;  %v1892_v53 = vld [vmem:[#allocation8 + $0x9e8] sm:$0xff] }
 0x2ec   : > { %3318 = vmatpush2.msra.mxu0 %v1715_v20  ;;  %3242 = vmatprep.subr.mxu1 %v2474_v55  ;;  %v2148_v54 = vld [vmem:[#allocation8 + $0x11e8] sm:$0xff]  ;;  %v1891_v20 = vld [vmem:[#allocation8 + $0x9e0] sm:$0xff] }
 0x2ed   : > { %3319 = vmatprep.subr.mxu0 %v1708_v56  ;;  %3243 = vmatpush2.msra.mxu1 %v2473_v57  ;;  %v2147_v55 = vld [vmem:[#allocation8 + $0x11e0] sm:$0xff]  ;;  %v1884_v56 = vld [vmem:[#allocation8 + $0x9a8] sm:$0xff] }
 0x2ee   : > { %3320 = vmatpush2.msra.mxu0 %v1707_v59  ;;  %3245 = vmatmul.mubr.f32.vlgmr.msra.gmra.mxu1 %v5450_v35  ;;  %v2140_v57 = vld [vmem:[#allocation8 + $0x11a8] sm:$0xff]  ;;  %v1883_v59 = vld [vmem:[#allocation8 + $0x9a0] sm:$0xff] }
 0x2ef   : > { %3322 = vmatmul.mubr.f32.vlgmr.msra.gmra.mxu0 %v5396_v18  ;;  %3334 = vmatprep.subr.mxu1 %v1956_v60  ;;  %v2139_v60 = vld [vmem:[#allocation8 + $0x11a0] sm:$0xff] }
 0x2f0   : > { %3411 = vmatprep.subr.mxu0 %v2212_v62  ;;  %3250 = vmatprep.mubr.f32.mxu1 %v5457_v8  ;;  %v1876_v62 = vld [vmem:[#allocation8 + $0x968] sm:$0xff] }
 0x2f1   : > { %3327 = vmatprep.mubr.f32.mxu0 %v5394_v15  ;;  %3335 = vmatpush1.msra.mxu1 %v1955_v0  ;;  %v2132_v0 = vld [vmem:[#allocation8 + $0x1168] sm:$0xff] }
 0x2f2   : > { %3412 = vmatpush1.msra.mxu0 %v2211_v19  ;;  %3336 = vmatprep.subr.mxu1 %v1948_v4  ;;  %v1875_v19 = vld [vmem:[#allocation8 + $0x960] sm:$0xff] }
 0x2f3   : > { %3413 = vmatprep.subr.mxu0 %v2204_v7  ;;  %3337 = vmatpush1.msra.mxu1 %v1947_v9  ;;  %v2131_v4 = vld [vmem:[#allocation8 + $0x1160] sm:$0xff]  ;;  %v1868_v7 = vld [vmem:[#allocation8 + $0x928] sm:$0xff] }
 0x2f4   : > { %3414 = vmatpush1.msra.mxu0 %v2203_v10  ;;  %3251 = vmatmul.mubr.f32.gmra.mxu1 %v5455_v2  ;;  %v2124_v9 = vld [vmem:[#allocation8 + $0x1128] sm:$0xff]  ;;  %v1867_v10 = vld [vmem:[#allocation8 + $0x920] sm:$0xff] }
 0x2f5   : > { %3328 = vmatmul.mubr.f32.gmra.mxu0 %v5400_v28  ;;  %3338 = vmatprep.subr.mxu1 %v1940_v11  ;;  %v2123_v11 = vld [vmem:[#allocation8 + $0x1120] sm:$0xff] }
 0x2f6   : > { %3415 = vmatprep.subr.mxu0 %v2196_v13  ;;  %3339 = vmatpush1.msra.mxu1 %v1939_v14  ;;  %v1860_v13 = vld [vmem:[#allocation8 + $0x8e8] sm:$0xff] }
 0x2f7   : > { %3398 = vmatprep.mubr.f32.mxu1 %v5398_v21  ;;  %3416 = vmatpush1.msra.mxu0 %v2195_v17  ;;  %v2116_v14 = vld [vmem:[#allocation8 + $0x10e8] sm:$0xff]  ;;  %v1859_v17 = vld [vmem:[#allocation8 + $0x8e0] sm:$0xff] }
 0x2f8   : > { %3475 = vmatprep.mubr.f32.mxu0 %v5425_v12  ;;  %3340 = vmatprep.subr.mxu1 %v1932_v3  ;;  %v2115_v3 = vld [vmem:[#allocation8 + $0x10e0] sm:$0xff] }
 0x2f9   : > { %3417 = vmatprep.subr.mxu0 %v2188_v22  ;;  %3341 = vmatpush1.msra.mxu1 %v1931_v23  ;;  %v1852_v22 = vld [vmem:[#allocation8 + $0x8a8] sm:$0xff] }
 0x2fa   : > { %3418 = vmatpush1.msra.mxu0 %v2187_v1  ;;  %3342 = vmatprep.subr.mxu1 %v1924_v25  ;;  %v2108_v23 = vld [vmem:[#allocation8 + $0x10a8] sm:$0xff]  ;;  %v1851_v1 = vld [vmem:[#allocation8 + $0x8a0] sm:$0xff] }
 0x2fb   : > { %3419 = vmatprep.subr.mxu0 %v2180_v31  ;;  %3343 = vmatpush1.msra.mxu1 %v1923_v33  ;;  %v2107_v25 = vld [vmem:[#allocation8 + $0x10a0] sm:$0xff]  ;;  %v1844_v31 = vld [vmem:[#allocation8 + $0x868] sm:$0xff] }
 0x2fc   : > { %3420 = vmatpush1.msra.mxu0 %v2179_v34  ;;  %3344 = vmatprep.subr.mxu1 %v1916_v37  ;;  %v2100_v33 = vld [vmem:[#allocation8 + $0x1068] sm:$0xff]  ;;  %v1843_v34 = vld [vmem:[#allocation8 + $0x860] sm:$0xff] }
 0x2fd   : > { %3421 = vmatprep.subr.mxu0 %v2172_v40  ;;  %3345 = vmatpush1.msra.mxu1 %v1915_v41  ;;  %v2099_v37 = vld [vmem:[#allocation8 + $0x1060] sm:$0xff]  ;;  %v1836_v40 = vld [vmem:[#allocation8 + $0x828] sm:$0xff] }
 0x2fe   : > { %3422 = vmatpush1.msra.mxu0 %v2171_v58  ;;  %3346 = vmatprep.subr.mxu1 %v1908_v42  ;;  %v2092_v41 = vld [vmem:[#allocation8 + $0x1028] sm:$0xff]  ;;  %v1835_v58 = vld [vmem:[#allocation8 + $0x820] sm:$0xff] }
 0x2ff   : > { %3423 = vmatprep.subr.mxu0 %v2164_v45  ;;  %3347 = vmatpush1.msra.mxu1 %v1907_v46  ;;  %v2091_v42 = vld [vmem:[#allocation8 + $0x1020] sm:$0xff]  ;;  %v2084_v45 = vld [vmem:[#allocation8 + $0xfe8] sm:$0xff] }
 0x300   : > { %3424 = vmatpush1.msra.mxu0 %v2163_v47  ;;  %3348 = vmatprep.subr.mxu1 %v1900_v48  ;;  %v2340_v46 = vld [vmem:[#allocation8 + $0x17e8] sm:$0xff]  ;;  %v2083_v47 = vld [vmem:[#allocation8 + $0xfe0] sm:$0xff] }
 0x301   : > { %3425 = vmatprep.subr.mxu0 %v2156_v49  ;;  %3349 = vmatpush1.msra.mxu1 %v1899_v5  ;;  %v2339_v48 = vld [vmem:[#allocation8 + $0x17e0] sm:$0xff]  ;;  %v2076_v49 = vld [vmem:[#allocation8 + $0xfa8] sm:$0xff] }
 0x302   : > { %3426 = vmatpush1.msra.mxu0 %v2155_v51  ;;  %3350 = vmatprep.subr.mxu1 %v1892_v53  ;;  %v2332_v5 = vld [vmem:[#allocation8 + $0x17a8] sm:$0xff]  ;;  %v2075_v51 = vld [vmem:[#allocation8 + $0xfa0] sm:$0xff] }
 0x303   : > { %3427 = vmatprep.subr.mxu0 %v2148_v54  ;;  %3351 = vmatpush1.msra.mxu1 %v1891_v20  ;;  %v2331_v53 = vld [vmem:[#allocation8 + $0x17a0] sm:$0xff]  ;;  %v2068_v54 = vld [vmem:[#allocation8 + $0xf68] sm:$0xff] }
 0x304   : > { %3428 = vmatpush1.msra.mxu0 %v2147_v55  ;;  %3352 = vmatprep.subr.mxu1 %v1884_v56  ;;  %v2324_v20 = vld [vmem:[#allocation8 + $0x1768] sm:$0xff]  ;;  %v2067_v55 = vld [vmem:[#allocation8 + $0xf60] sm:$0xff] }
 0x305   : > { %3429 = vmatprep.subr.mxu0 %v2140_v57  ;;  %3353 = vmatpush1.msra.mxu1 %v1883_v59  ;;  %v2323_v56 = vld [vmem:[#allocation8 + $0x1760] sm:$0xff]  ;;  %v2060_v57 = vld [vmem:[#allocation8 + $0xf28] sm:$0xff] }
 0x306   : > { %3430 = vmatpush1.msra.mxu0 %v2139_v60  ;;  %3354 = vmatprep.subr.mxu1 %v1876_v62  ;;  %v2316_v59 = vld [vmem:[#allocation8 + $0x1728] sm:$0xff]  ;;  %v2059_v60 = vld [vmem:[#allocation8 + $0xf20] sm:$0xff] }
 0x307   : > { %3431 = vmatprep.subr.mxu0 %v2132_v0  ;;  %3355 = vmatpush1.msra.mxu1 %v1875_v19  ;;  %v2315_v62 = vld [vmem:[#allocation8 + $0x1720] sm:$0xff]  ;;  %v2052_v0 = vld [vmem:[#allocation8 + $0xee8] sm:$0xff] }
 0x308   : > { %3432 = vmatpush1.msra.mxu0 %v2131_v4  ;;  %3356 = vmatprep.subr.mxu1 %v1868_v7  ;;  %v2308_v19 = vld [vmem:[#allocation8 + $0x16e8] sm:$0xff]  ;;  %v2051_v4 = vld [vmem:[#allocation8 + $0xee0] sm:$0xff] }
 0x309   : > { %3433 = vmatprep.subr.mxu0 %v2124_v9  ;;  %3357 = vmatpush1.msra.mxu1 %v1867_v10  ;;  %v2307_v7 = vld [vmem:[#allocation8 + $0x16e0] sm:$0xff]  ;;  %v2044_v9 = vld [vmem:[#allocation8 + $0xea8] sm:$0xff] }
 0x30a   : > { %3434 = vmatpush1.msra.mxu0 %v2123_v11  ;;  %3358 = vmatprep.subr.mxu1 %v1860_v13  ;;  %v2300_v10 = vld [vmem:[#allocation8 + $0x16a8] sm:$0xff]  ;;  %v2043_v11 = vld [vmem:[#allocation8 + $0xea0] sm:$0xff] }
 0x30b   : > { %3435 = vmatprep.subr.mxu0 %v2116_v14  ;;  %3359 = vmatpush1.msra.mxu1 %v1859_v17  ;;  %v2299_v13 = vld [vmem:[#allocation8 + $0x16a0] sm:$0xff]  ;;  %v2036_v14 = vld [vmem:[#allocation8 + $0xe68] sm:$0xff] }
 0x30c   : > { %3436 = vmatpush1.msra.mxu0 %v2115_v3  ;;  %3360 = vmatprep.subr.mxu1 %v1852_v22  ;;  %v2292_v17 = vld [vmem:[#allocation8 + $0x1668] sm:$0xff]  ;;  %v2035_v3 = vld [vmem:[#allocation8 + $0xe60] sm:$0xff] }
 0x30d   : > { %3437 = vmatprep.subr.mxu0 %v2108_v23  ;;  %3361 = vmatpush1.msra.mxu1 %v1851_v1  ;;  %v2291_v22 = vld [vmem:[#allocation8 + $0x1660] sm:$0xff]  ;;  %v2028_v23 = vld [vmem:[#allocation8 + $0xe28] sm:$0xff] }
 0x30e   : > { %3438 = vmatpush1.msra.mxu0 %v2107_v25  ;;  %3362 = vmatprep.subr.mxu1 %v1844_v31  ;;  %v2284_v1 = vld [vmem:[#allocation8 + $0x1628] sm:$0xff]  ;;  %v2027_v25 = vld [vmem:[#allocation8 + $0xe20] sm:$0xff] }
 0x30f   : > { %3439 = vmatprep.subr.mxu0 %v2100_v33  ;;  %3363 = vmatpush1.msra.mxu1 %v1843_v34  ;;  %v2283_v31 = vld [vmem:[#allocation8 + $0x1620] sm:$0xff]  ;;  %v2020_v33 = vld [vmem:[#allocation8 + $0xde8] sm:$0xff] }
 0x310   : > { %3440 = vmatpush1.msra.mxu0 %v2099_v37  ;;  %3364 = vmatprep.subr.mxu1 %v1836_v40  ;;  %v2276_v34 = vld [vmem:[#allocation8 + $0x15e8] sm:$0xff]  ;;  %v2019_v37 = vld [vmem:[#allocation8 + $0xde0] sm:$0xff] }
 0x311   : > { %3441 = vmatprep.subr.mxu0 %v2092_v41  ;;  %3365 = vmatpush1.msra.mxu1 %v1835_v58  ;;  %v2275_v40 = vld [vmem:[#allocation8 + $0x15e0] sm:$0xff]  ;;  %v2012_v41 = vld [vmem:[#allocation8 + $0xda8] sm:$0xff] }
 0x312   : > { %3442 = vmatpush1.msra.mxu0 %v2091_v42  ;;  %3366 = vmatprep.subr.mxu1 %v2084_v45  ;;  %v2268_v58 = vld [vmem:[#allocation8 + $0x15a8] sm:$0xff]  ;;  %v2011_v42 = vld [vmem:[#allocation8 + $0xda0] sm:$0xff] }
 0x313   : > { %3443 = vmatprep.subr.mxu0 %v2340_v46  ;;  %3367 = vmatpush2.msra.mxu1 %v2083_v47  ;;  %v2267_v45 = vld [vmem:[#allocation8 + $0x15a0] sm:$0xff]  ;;  %v2004_v46 = vld [vmem:[#allocation8 + $0xd68] sm:$0xff] }
 0x314   : > { %3444 = vmatpush2.msra.mxu0 %v2339_v48  ;;  %3368 = vmatprep.subr.mxu1 %v2076_v49  ;;  %v2260_v47 = vld [vmem:[#allocation8 + $0x1568] sm:$0xff]  ;;  %v2003_v48 = vld [vmem:[#allocation8 + $0xd60] sm:$0xff] }
 0x315   : > { %3445 = vmatprep.subr.mxu0 %v2332_v5  ;;  %3369 = vmatpush2.msra.mxu1 %v2075_v51  ;;  %v2259_v49 = vld [vmem:[#allocation8 + $0x1560] sm:$0xff]  ;;  %v1996_v5 = vld [vmem:[#allocation8 + $0xd28] sm:$0xff] }
 0x316   : > { %3446 = vmatpush2.msra.mxu0 %v2331_v53  ;;  %3370 = vmatprep.subr.mxu1 %v2068_v54  ;;  %v2252_v51 = vld [vmem:[#allocation8 + $0x1528] sm:$0xff]  ;;  %v1995_v53 = vld [vmem:[#allocation8 + $0xd20] sm:$0xff] }
 0x317   : > { %3447 = vmatprep.subr.mxu0 %v2324_v20  ;;  %3371 = vmatpush2.msra.mxu1 %v2067_v55  ;;  %v2251_v54 = vld [vmem:[#allocation8 + $0x1520] sm:$0xff]  ;;  %v1988_v20 = vld [vmem:[#allocation8 + $0xce8] sm:$0xff] }
 0x318   : > { %3448 = vmatpush2.msra.mxu0 %v2323_v56  ;;  %3372 = vmatprep.subr.mxu1 %v2060_v57  ;;  %v2244_v55 = vld [vmem:[#allocation8 + $0x14e8] sm:$0xff]  ;;  %v1987_v56 = vld [vmem:[#allocation8 + $0xce0] sm:$0xff] }
 0x319   : > { %3449 = vmatprep.subr.mxu0 %v2316_v59  ;;  %3373 = vmatpush2.msra.mxu1 %v2059_v60  ;;  %v2243_v57 = vld [vmem:[#allocation8 + $0x14e0] sm:$0xff]  ;;  %v1980_v59 = vld [vmem:[#allocation8 + $0xca8] sm:$0xff] }
 0x31a   : > { %3450 = vmatpush2.msra.mxu0 %v2315_v62  ;;  %3374 = vmatprep.subr.mxu1 %v2052_v0  ;;  %v2236_v60 = vld [vmem:[#allocation8 + $0x14a8] sm:$0xff]  ;;  %v1979_v62 = vld [vmem:[#allocation8 + $0xca0] sm:$0xff] }
 0x31b   : > { %3451 = vmatprep.subr.mxu0 %v2308_v19  ;;  %3375 = vmatpush2.msra.mxu1 %v2051_v4  ;;  %v2235_v0 = vld [vmem:[#allocation8 + $0x14a0] sm:$0xff]  ;;  %v1972_v19 = vld [vmem:[#allocation8 + $0xc68] sm:$0xff] }
 0x31c   : > { %3452 = vmatpush2.msra.mxu0 %v2307_v7  ;;  %3376 = vmatprep.subr.mxu1 %v2044_v9  ;;  %v2228_v4 = vld [vmem:[#allocation8 + $0x1468] sm:$0xff]  ;;  %v1971_v7 = vld [vmem:[#allocation8 + $0xc60] sm:$0xff] }
 0x31d   : > { %3453 = vmatprep.subr.mxu0 %v2300_v10  ;;  %3377 = vmatpush2.msra.mxu1 %v2043_v11  ;;  %v2227_v9 = vld [vmem:[#allocation8 + $0x1460] sm:$0xff]  ;;  %v1964_v10 = vld [vmem:[#allocation8 + $0xc28] sm:$0xff] }
 0x31e   : > { %3454 = vmatpush2.msra.mxu0 %v2299_v13  ;;  %3378 = vmatprep.subr.mxu1 %v2036_v14  ;;  %v2220_v11 = vld [vmem:[#allocation8 + $0x1428] sm:$0xff]  ;;  %v1963_v13 = vld [vmem:[#allocation8 + $0xc20] sm:$0xff] }
 0x31f   : > { %3455 = vmatprep.subr.mxu0 %v2292_v17  ;;  %3379 = vmatpush2.msra.mxu1 %v2035_v3  ;;  %v2219_v14 = vld [vmem:[#allocation8 + $0x1420] sm:$0xff]  ;;  %v2468_v17 = vld [vmem:[#allocation8 + $0x1be8] sm:$0xff]  ;;  %v1702_v3 = vld [vmem:[#allocation8 + $0x3f8] sm:$0xff] }
 0x320   : > { %3456 = vmatpush2.msra.mxu0 %v2291_v22  ;;  %3380 = vmatprep.subr.mxu1 %v2028_v23  ;;  %v2467_v22 = vld [vmem:[#allocation8 + $0x1be0] sm:$0xff]  ;;  %v1701_v23 = vld [vmem:[#allocation8 + $0x3f0] sm:$0xff] }
 0x321   : > { %3457 = vmatprep.subr.mxu0 %v2284_v1  ;;  %3381 = vmatpush2.msra.mxu1 %v2027_v25  ;;  %v2460_v1 = vld [vmem:[#allocation8 + $0x1ba8] sm:$0xff]  ;;  %v1694_v25 = vld [vmem:[#allocation8 + $0x3b8] sm:$0xff] }
 0x322   : > { %3458 = vmatpush2.msra.mxu0 %v2283_v31  ;;  %3382 = vmatprep.subr.mxu1 %v2020_v33  ;;  %v2459_v31 = vld [vmem:[#allocation8 + $0x1ba0] sm:$0xff]  ;;  %v1693_v33 = vld [vmem:[#allocation8 + $0x3b0] sm:$0xff] }
 0x323   : > { %3459 = vmatprep.subr.mxu0 %v2276_v34  ;;  %3383 = vmatpush2.msra.mxu1 %v2019_v37  ;;  %v2452_v34 = vld [vmem:[#allocation8 + $0x1b68] sm:$0xff]  ;;  %v1686_v37 = vld [vmem:[#allocation8 + $0x378] sm:$0xff] }
 0x324   : > { %3460 = vmatpush2.msra.mxu0 %v2275_v40  ;;  %3384 = vmatprep.subr.mxu1 %v2012_v41  ;;  %v2451_v40 = vld [vmem:[#allocation8 + $0x1b60] sm:$0xff]  ;;  %v1685_v41 = vld [vmem:[#allocation8 + $0x370] sm:$0xff] }
 0x325   : > { %3461 = vmatprep.subr.mxu0 %v2268_v58  ;;  %3385 = vmatpush2.msra.mxu1 %v2011_v42  ;;  %v2444_v58 = vld [vmem:[#allocation8 + $0x1b28] sm:$0xff]  ;;  %v1678_v42 = vld [vmem:[#allocation8 + $0x338] sm:$0xff] }
 0x326   : > { %3462 = vmatpush2.msra.mxu0 %v2267_v45  ;;  %3386 = vmatprep.subr.mxu1 %v2004_v46  ;;  %v2443_v45 = vld [vmem:[#allocation8 + $0x1b20] sm:$0xff]  ;;  %v1677_v46 = vld [vmem:[#allocation8 + $0x330] sm:$0xff] }
 0x327   : > { %3463 = vmatprep.subr.mxu0 %v2260_v47  ;;  %3387 = vmatpush2.msra.mxu1 %v2003_v48  ;;  %v2436_v47 = vld [vmem:[#allocation8 + $0x1ae8] sm:$0xff]  ;;  %v1670_v48 = vld [vmem:[#allocation8 + $0x2f8] sm:$0xff] }
 0x328   : > { %3464 = vmatpush2.msra.mxu0 %v2259_v49  ;;  %3388 = vmatprep.subr.mxu1 %v1996_v5  ;;  %v2435_v49 = vld [vmem:[#allocation8 + $0x1ae0] sm:$0xff]  ;;  %v1669_v5 = vld [vmem:[#allocation8 + $0x2f0] sm:$0xff] }
 0x329   : > { %3465 = vmatprep.subr.mxu0 %v2252_v51  ;;  %3389 = vmatpush2.msra.mxu1 %v1995_v53  ;;  %v2428_v51 = vld [vmem:[#allocation8 + $0x1aa8] sm:$0xff]  ;;  %v1662_v53 = vld [vmem:[#allocation8 + $0x2b8] sm:$0xff] }
 0x32a   : > { %3466 = vmatpush2.msra.mxu0 %v2251_v54  ;;  %3390 = vmatprep.subr.mxu1 %v1988_v20  ;;  %v2427_v54 = vld [vmem:[#allocation8 + $0x1aa0] sm:$0xff]  ;;  %v1661_v20 = vld [vmem:[#allocation8 + $0x2b0] sm:$0xff] }
 0x32b   : > { %3467 = vmatprep.subr.mxu0 %v2244_v55  ;;  %3391 = vmatpush2.msra.mxu1 %v1987_v56  ;;  %v2420_v55 = vld [vmem:[#allocation8 + $0x1a68] sm:$0xff]  ;;  %v1654_v56 = vld [vmem:[#allocation8 + $0x278] sm:$0xff] }
 0x32c   : > { %3468 = vmatpush2.msra.mxu0 %v2243_v57  ;;  %3392 = vmatprep.subr.mxu1 %v1980_v59  ;;  %v1653_v57 = vld [vmem:[#allocation8 + $0x270] sm:$0xff]  ;;  %v2412_v59 = vld [vmem:[#allocation8 + $0x1a28] sm:$0xff] }
 0x32d   : > { %3469 = vmatprep.subr.mxu0 %v2236_v60  ;;  %3393 = vmatpush2.msra.mxu1 %v1979_v62  ;;  %v1646_v60 = vld [vmem:[#allocation8 + $0x238] sm:$0xff]  ;;  %v2411_v62 = vld [vmem:[#allocation8 + $0x1a20] sm:$0xff] }
 0x32e   : > { %3470 = vmatpush2.msra.mxu0 %v2235_v0  ;;  %3394 = vmatprep.subr.mxu1 %v1972_v19  ;;  %v1645_v0 = vld [vmem:[#allocation8 + $0x230] sm:$0xff]  ;;  %v2404_v19 = vld [vmem:[#allocation8 + $0x19e8] sm:$0xff] }
 0x32f   : > { %3471 = vmatprep.subr.mxu0 %v2228_v4  ;;  %3395 = vmatpush2.msra.mxu1 %v1971_v7  ;;  %v1638_v4 = vld [vmem:[#allocation8 + $0x1f8] sm:$0xff]  ;;  %v2403_v7 = vld [vmem:[#allocation8 + $0x19e0] sm:$0xff] }
 0x330   : > { %3472 = vmatpush2.msra.mxu0 %v2227_v9  ;;  %3396 = vmatprep.subr.mxu1 %v1964_v10  ;;  %v1637_v9 = vld [vmem:[#allocation8 + $0x1f0] sm:$0xff]  ;;  %v2396_v10 = vld [vmem:[#allocation8 + $0x19a8] sm:$0xff] }
 0x331   : > { %3473 = vmatprep.subr.mxu0 %v2220_v11  ;;  %3397 = vmatpush2.msra.mxu1 %v1963_v13  ;;  %v1630_v11 = vld [vmem:[#allocation8 + $0x1b8] sm:$0xff]  ;;  %v2395_v13 = vld [vmem:[#allocation8 + $0x19a0] sm:$0xff] }
 0x332   : > { %3474 = vmatpush2.msra.mxu0 %v2219_v14  ;;  %3399 = vmatmul.mubr.f32.vlgmr.msra.gmra.mxu1 %v5405_v39  ;;  %v1629_v14 = vld [vmem:[#allocation8 + $0x1b0] sm:$0xff] }
 0x333   : > { %3476 = vmatmul.mubr.f32.vlgmr.msra.gmra.mxu0 %v5427_v30  ;;  %3488 = vmatprep.subr.mxu1 %v2468_v17  ;;  %v2388_v17 = vld [vmem:[#allocation8 + $0x1968] sm:$0xff] }
 0x334   : > { %3565 = vmatprep.subr.mxu0 %v1702_v3  ;;  %3404 = vmatprep.mubr.f32.mxu1 %v5410_v44  ;;  %v1622_v3 = vld [vmem:[#allocation8 + $0x178] sm:$0xff] }
 0x335   : > { %3481 = vmatprep.mubr.f32.mxu0 %v5433_v29  ;;  %3489 = vmatpush1.msra.mxu1 %v2467_v22  ;;  %v2387_v22 = vld [vmem:[#allocation8 + $0x1960] sm:$0xff] }
 0x336   : > { %3566 = vmatpush1.msra.mxu0 %v1701_v23  ;;  %3490 = vmatprep.subr.mxu1 %v2460_v1  ;;  %v1621_v23 = vld [vmem:[#allocation8 + $0x170] sm:$0xff]  ;;  %v2380_v1 = vld [vmem:[#allocation8 + $0x1928] sm:$0xff] }
 0x337   : > { %3567 = vmatprep.subr.mxu0 %v1694_v25  ;;  %3491 = vmatpush1.msra.mxu1 %v2459_v31  ;;  %v1614_v25 = vld [vmem:[#allocation8 + $0x138] sm:$0xff]  ;;  %v2379_v31 = vld [vmem:[#allocation8 + $0x1920] sm:$0xff] }
 0x338   : > { %3568 = vmatpush1.msra.mxu0 %v1693_v33  ;;  %3405 = vmatmul.mubr.f32.gmra.mxu1 %v5408_v43  ;;  %v1613_v33 = vld [vmem:[#allocation8 + $0x130] sm:$0xff] }
 0x339   : > { %3482 = vmatmul.mubr.f32.gmra.mxu0 %v5431_v26  ;;  %3492 = vmatprep.subr.mxu1 %v2452_v34  ;;  %v2372_v34 = vld [vmem:[#allocation8 + $0x18e8] sm:$0xff] }
 0x33a   : > { %3569 = vmatprep.subr.mxu0 %v1686_v37  ;;  %3493 = vmatpush1.msra.mxu1 %v2451_v40  ;;  %v1606_v37 = vld [vmem:[#allocation8 + $0xf8] sm:$0xff]  ;;  %v2371_v40 = vld [vmem:[#allocation8 + $0x18e0] sm:$0xff] }
 0x33b   : > { %3552 = vmatprep.mubr.f32.mxu1 %v5448_v27  ;;  %3570 = vmatpush1.msra.mxu0 %v1685_v41  ;;  %v1605_v41 = vld [vmem:[#allocation8 + $0xf0] sm:$0xff] }
 0x33c   : > { %3629 = vmatprep.mubr.f32.mxu0 %v5373_v24  ;;  %3494 = vmatprep.subr.mxu1 %v2444_v58  ;;  %v2419_v24 = vld [vmem:[#allocation8 + $0x1a60] sm:$0xff]  ;;  %v2364_v58 = vld [vmem:[#allocation8 + $0x18a8] sm:$0xff] }
 0x33d   : > { %3571 = vmatprep.subr.mxu0 %v1678_v42  ;;  %3495 = vmatpush1.msra.mxu1 %v2443_v45  ;;  %v1598_v42 = vld [vmem:[#allocation8 + $0xb8] sm:$0xff]  ;;  %v2363_v45 = vld [vmem:[#allocation8 + $0x18a0] sm:$0xff] }
 0x33e   : > { %3572 = vmatpush1.msra.mxu0 %v1677_v46  ;;  %3496 = vmatprep.subr.mxu1 %v2436_v47  ;;  %v1597_v46 = vld [vmem:[#allocation8 + $0xb0] sm:$0xff]  ;;  %v2356_v47 = vld [vmem:[#allocation8 + $0x1868] sm:$0xff] }
 0x33f   : > { %3573 = vmatprep.subr.mxu0 %v1670_v48  ;;  %3497 = vmatpush1.msra.mxu1 %v2435_v49  ;;  %v1590_v48 = vld [vmem:[#allocation8 + $0x78] sm:$0xff]  ;;  %v2355_v49 = vld [vmem:[#allocation8 + $0x1860] sm:$0xff] }
 0x340   : > { %3574 = vmatpush1.msra.mxu0 %v1669_v5  ;;  %3498 = vmatprep.subr.mxu1 %v2428_v51  ;;  %v1589_v5 = vld [vmem:[#allocation8 + $0x70] sm:$0xff]  ;;  %v2348_v51 = vld [vmem:[#allocation8 + $0x1828] sm:$0xff] }
 0x341   : > { %3575 = vmatprep.subr.mxu0 %v1662_v53  ;;  %3499 = vmatpush1.msra.mxu1 %v2427_v54  ;;  %v1582_v53 = vld [vmem:[#allocation8 + $0x38] sm:$0xff]  ;;  %v2347_v54 = vld [vmem:[#allocation8 + $0x1820] sm:$0xff] }
 0x342   : > { %3576 = vmatpush1.msra.mxu0 %v1661_v20  ;;  %3500 = vmatprep.subr.mxu1 %v2420_v55  ;;  %v1581_v20 = vld [vmem:[#allocation8 + $0x30] sm:$0xff]  ;;  %v2596_v55 = vld [vmem:[#allocation8 + $0x1fe8] sm:$0xff] }
 0x343   : > { %3577 = vmatprep.subr.mxu0 %v1654_v56  ;;  %3501 = vmatpush1.msra.mxu1 %v2419_v24  ;;  %v1830_v56 = vld [vmem:[#allocation8 + $0x7f8] sm:$0xff]  ;;  %v2595_v24 = vld [vmem:[#allocation8 + $0x1fe0] sm:$0xff] }
 0x344   : > { %3578 = vmatpush1.msra.mxu0 %v1653_v57  ;;  %3502 = vmatprep.subr.mxu1 %v2412_v59  ;;  %v1829_v57 = vld [vmem:[#allocation8 + $0x7f0] sm:$0xff]  ;;  %v2588_v59 = vld [vmem:[#allocation8 + $0x1fa8] sm:$0xff] }
 0x345   : > { %3579 = vmatprep.subr.mxu0 %v1646_v60  ;;  %3503 = vmatpush1.msra.mxu1 %v2411_v62  ;;  %v1822_v60 = vld [vmem:[#allocation8 + $0x7b8] sm:$0xff]  ;;  %v2587_v62 = vld [vmem:[#allocation8 + $0x1fa0] sm:$0xff] }
 0x346   : > { %3580 = vmatpush1.msra.mxu0 %v1645_v0  ;;  %3504 = vmatprep.subr.mxu1 %v2404_v19  ;;  %v1821_v0 = vld [vmem:[#allocation8 + $0x7b0] sm:$0xff]  ;;  %v2580_v19 = vld [vmem:[#allocation8 + $0x1f68] sm:$0xff] }
 0x347   : > { %3581 = vmatprep.subr.mxu0 %v1638_v4  ;;  %3505 = vmatpush1.msra.mxu1 %v2403_v7  ;;  %v1814_v4 = vld [vmem:[#allocation8 + $0x778] sm:$0xff]  ;;  %v2579_v7 = vld [vmem:[#allocation8 + $0x1f60] sm:$0xff] }
 0x348   : > { %3582 = vmatpush1.msra.mxu0 %v1637_v9  ;;  %3506 = vmatprep.subr.mxu1 %v2396_v10  ;;  %v1813_v9 = vld [vmem:[#allocation8 + $0x770] sm:$0xff]  ;;  %v2572_v10 = vld [vmem:[#allocation8 + $0x1f28] sm:$0xff] }
 0x349   : > { %3583 = vmatprep.subr.mxu0 %v1630_v11  ;;  %3507 = vmatpush1.msra.mxu1 %v2395_v13  ;;  %v1806_v11 = vld [vmem:[#allocation8 + $0x738] sm:$0xff]  ;;  %v2571_v13 = vld [vmem:[#allocation8 + $0x1f20] sm:$0xff] }
 0x34a   : > { %3584 = vmatpush1.msra.mxu0 %v1629_v14  ;;  %3508 = vmatprep.subr.mxu1 %v2388_v17  ;;  %v1805_v14 = vld [vmem:[#allocation8 + $0x730] sm:$0xff]  ;;  %v2564_v17 = vld [vmem:[#allocation8 + $0x1ee8] sm:$0xff] }
 0x34b   : > { %3585 = vmatprep.subr.mxu0 %v1622_v3  ;;  %3509 = vmatpush1.msra.mxu1 %v2387_v22  ;;  %v1798_v3 = vld [vmem:[#allocation8 + $0x6f8] sm:$0xff]  ;;  %v2563_v22 = vld [vmem:[#allocation8 + $0x1ee0] sm:$0xff] }
 0x34c   : > { %3586 = vmatpush1.msra.mxu0 %v1621_v23  ;;  %3510 = vmatprep.subr.mxu1 %v2380_v1  ;;  %v1797_v23 = vld [vmem:[#allocation8 + $0x6f0] sm:$0xff]  ;;  %v2556_v1 = vld [vmem:[#allocation8 + $0x1ea8] sm:$0xff] }
 0x34d   : > { %3587 = vmatprep.subr.mxu0 %v1614_v25  ;;  %3511 = vmatpush1.msra.mxu1 %v2379_v31  ;;  %v1790_v25 = vld [vmem:[#allocation8 + $0x6b8] sm:$0xff]  ;;  %v2555_v31 = vld [vmem:[#allocation8 + $0x1ea0] sm:$0xff] }
 0x34e   : > { %3588 = vmatpush1.msra.mxu0 %v1613_v33  ;;  %3512 = vmatprep.subr.mxu1 %v2372_v34  ;;  %v1789_v33 = vld [vmem:[#allocation8 + $0x6b0] sm:$0xff]  ;;  %v2548_v34 = vld [vmem:[#allocation8 + $0x1e68] sm:$0xff] }
 0x34f   : > { %3589 = vmatprep.subr.mxu0 %v1606_v37  ;;  %3513 = vmatpush1.msra.mxu1 %v2371_v40  ;;  %v1782_v37 = vld [vmem:[#allocation8 + $0x678] sm:$0xff]  ;;  %v2547_v40 = vld [vmem:[#allocation8 + $0x1e60] sm:$0xff] }
 0x350   : > { %3590 = vmatpush1.msra.mxu0 %v1605_v41  ;;  %3514 = vmatprep.subr.mxu1 %v2364_v58  ;;  %v1781_v41 = vld [vmem:[#allocation8 + $0x670] sm:$0xff]  ;;  %v2540_v58 = vld [vmem:[#allocation8 + $0x1e28] sm:$0xff] }
 0x351   : > { %3591 = vmatprep.subr.mxu0 %v1598_v42  ;;  %3515 = vmatpush1.msra.mxu1 %v2363_v45  ;;  %v1774_v42 = vld [vmem:[#allocation8 + $0x638] sm:$0xff]  ;;  %v2539_v45 = vld [vmem:[#allocation8 + $0x1e20] sm:$0xff] }
 0x352   : > { %3592 = vmatpush1.msra.mxu0 %v1597_v46  ;;  %3516 = vmatprep.subr.mxu1 %v2356_v47  ;;  %v1773_v46 = vld [vmem:[#allocation8 + $0x630] sm:$0xff]  ;;  %v2532_v47 = vld [vmem:[#allocation8 + $0x1de8] sm:$0xff] }
 0x353   : > { %3593 = vmatprep.subr.mxu0 %v1590_v48  ;;  %3517 = vmatpush1.msra.mxu1 %v2355_v49  ;;  %v1766_v48 = vld [vmem:[#allocation8 + $0x5f8] sm:$0xff]  ;;  %v2531_v49 = vld [vmem:[#allocation8 + $0x1de0] sm:$0xff] }
 0x354   : > { %3594 = vmatpush1.msra.mxu0 %v1589_v5  ;;  %3518 = vmatprep.subr.mxu1 %v2348_v51  ;;  %v1765_v5 = vld [vmem:[#allocation8 + $0x5f0] sm:$0xff]  ;;  %v2524_v51 = vld [vmem:[#allocation8 + $0x1da8] sm:$0xff] }
 0x355   : > { %3595 = vmatprep.subr.mxu0 %v1582_v53  ;;  %3519 = vmatpush1.msra.mxu1 %v2347_v54  ;;  %v1758_v53 = vld [vmem:[#allocation8 + $0x5b8] sm:$0xff]  ;;  %v2523_v54 = vld [vmem:[#allocation8 + $0x1da0] sm:$0xff] }
 0x356   : > { %3596 = vmatpush1.msra.mxu0 %v1581_v20  ;;  %3520 = vmatprep.subr.mxu1 %v2596_v55  ;;  %v1757_v20 = vld [vmem:[#allocation8 + $0x5b0] sm:$0xff]  ;;  %v2516_v55 = vld [vmem:[#allocation8 + $0x1d68] sm:$0xff] }
 0x357   : > { %3597 = vmatprep.subr.mxu0 %v1830_v56  ;;  %3521 = vmatpush2.msra.mxu1 %v2595_v24  ;;  %v1750_v56 = vld [vmem:[#allocation8 + $0x578] sm:$0xff]  ;;  %v2515_v24 = vld [vmem:[#allocation8 + $0x1d60] sm:$0xff] }
 0x358   : > { %3598 = vmatpush2.msra.mxu0 %v1829_v57  ;;  %3522 = vmatprep.subr.mxu1 %v2588_v59  ;;  %v1749_v57 = vld [vmem:[#allocation8 + $0x570] sm:$0xff]  ;;  %v2508_v59 = vld [vmem:[#allocation8 + $0x1d28] sm:$0xff] }
 0x359   : > { %3599 = vmatprep.subr.mxu0 %v1822_v60  ;;  %3523 = vmatpush2.msra.mxu1 %v2587_v62  ;;  %v1742_v60 = vld [vmem:[#allocation8 + $0x538] sm:$0xff]  ;;  %v2507_v62 = vld [vmem:[#allocation8 + $0x1d20] sm:$0xff] }
 0x35a   : > { %3600 = vmatpush2.msra.mxu0 %v1821_v0  ;;  %3524 = vmatprep.subr.mxu1 %v2580_v19  ;;  %v1741_v0 = vld [vmem:[#allocation8 + $0x530] sm:$0xff]  ;;  %v2500_v19 = vld [vmem:[#allocation8 + $0x1ce8] sm:$0xff] }
 0x35b   : > { %3601 = vmatprep.subr.mxu0 %v1814_v4  ;;  %3525 = vmatpush2.msra.mxu1 %v2579_v7  ;;  %v1734_v4 = vld [vmem:[#allocation8 + $0x4f8] sm:$0xff]  ;;  %v2499_v7 = vld [vmem:[#allocation8 + $0x1ce0] sm:$0xff] }
 0x35c   : > { %3602 = vmatpush2.msra.mxu0 %v1813_v9  ;;  %3526 = vmatprep.subr.mxu1 %v2572_v10  ;;  %v1733_v9 = vld [vmem:[#allocation8 + $0x4f0] sm:$0xff]  ;;  %v2492_v10 = vld [vmem:[#allocation8 + $0x1ca8] sm:$0xff] }
 0x35d   : > { %3603 = vmatprep.subr.mxu0 %v1806_v11  ;;  %3527 = vmatpush2.msra.mxu1 %v2571_v13  ;;  %v1726_v11 = vld [vmem:[#allocation8 + $0x4b8] sm:$0xff]  ;;  %v2491_v13 = vld [vmem:[#allocation8 + $0x1ca0] sm:$0xff] }
 0x35e   : > { %3604 = vmatpush2.msra.mxu0 %v1805_v14  ;;  %3528 = vmatprep.subr.mxu1 %v2564_v17  ;;  %v1725_v14 = vld [vmem:[#allocation8 + $0x4b0] sm:$0xff]  ;;  %v2484_v17 = vld [vmem:[#allocation8 + $0x1c68] sm:$0xff] }
 0x35f   : > { %3605 = vmatprep.subr.mxu0 %v1798_v3  ;;  %3529 = vmatpush2.msra.mxu1 %v2563_v22  ;;  %v1718_v3 = vld [vmem:[#allocation8 + $0x478] sm:$0xff]  ;;  %v2483_v22 = vld [vmem:[#allocation8 + $0x1c60] sm:$0xff] }
 0x360   : > { %3606 = vmatpush2.msra.mxu0 %v1797_v23  ;;  %3530 = vmatprep.subr.mxu1 %v2556_v1  ;;  %v1717_v23 = vld [vmem:[#allocation8 + $0x470] sm:$0xff]  ;;  %v2476_v1 = vld [vmem:[#allocation8 + $0x1c28] sm:$0xff] }
 0x361   : > { %3607 = vmatprep.subr.mxu0 %v1790_v25  ;;  %3531 = vmatpush2.msra.mxu1 %v2555_v31  ;;  %v1710_v25 = vld [vmem:[#allocation8 + $0x438] sm:$0xff]  ;;  %v2475_v31 = vld [vmem:[#allocation8 + $0x1c20] sm:$0xff] }
 0x362   : > { %3608 = vmatpush2.msra.mxu0 %v1789_v33  ;;  %3532 = vmatprep.subr.mxu1 %v2548_v34  ;;  %v1709_v33 = vld [vmem:[#allocation8 + $0x430] sm:$0xff]  ;;  %v1958_v34 = vld [vmem:[#allocation8 + $0xbf8] sm:$0xff] }
 0x363   : > { %3609 = vmatprep.subr.mxu0 %v1782_v37  ;;  %3533 = vmatpush2.msra.mxu1 %v2547_v40  ;;  %v2214_v37 = vld [vmem:[#allocation8 + $0x13f8] sm:$0xff]  ;;  %v1957_v40 = vld [vmem:[#allocation8 + $0xbf0] sm:$0xff] }
 0x364   : > { %3610 = vmatpush2.msra.mxu0 %v1781_v41  ;;  %3534 = vmatprep.subr.mxu1 %v2540_v58  ;;  %v2213_v41 = vld [vmem:[#allocation8 + $0x13f0] sm:$0xff]  ;;  %v1950_v58 = vld [vmem:[#allocation8 + $0xbb8] sm:$0xff] }
 0x365   : > { %3611 = vmatprep.subr.mxu0 %v1774_v42  ;;  %3535 = vmatpush2.msra.mxu1 %v2539_v45  ;;  %v2206_v42 = vld [vmem:[#allocation8 + $0x13b8] sm:$0xff]  ;;  %v1949_v45 = vld [vmem:[#allocation8 + $0xbb0] sm:$0xff] }
 0x366   : > { %3612 = vmatpush2.msra.mxu0 %v1773_v46  ;;  %3536 = vmatprep.subr.mxu1 %v2532_v47  ;;  %v2205_v46 = vld [vmem:[#allocation8 + $0x13b0] sm:$0xff]  ;;  %v1942_v47 = vld [vmem:[#allocation8 + $0xb78] sm:$0xff] }
 0x367   : > { %3613 = vmatprep.subr.mxu0 %v1766_v48  ;;  %3537 = vmatpush2.msra.mxu1 %v2531_v49  ;;  %v2198_v48 = vld [vmem:[#allocation8 + $0x1378] sm:$0xff]  ;;  %v2197_v49 = vld [vmem:[#allocation8 + $0x1370] sm:$0xff] }
 0x368   : > { %3614 = vmatpush2.msra.mxu0 %v1765_v5  ;;  %3538 = vmatprep.subr.mxu1 %v2524_v51  ;;  %v1934_v5 = vld [vmem:[#allocation8 + $0xb38] sm:$0xff]  ;;  %v1933_v51 = vld [vmem:[#allocation8 + $0xb30] sm:$0xff] }
 0x369   : > { %3615 = vmatprep.subr.mxu0 %v1758_v53  ;;  %3539 = vmatpush2.msra.mxu1 %v2523_v54  ;;  %v2189_v53 = vld [vmem:[#allocation8 + $0x1330] sm:$0xff]  ;;  %v1926_v54 = vld [vmem:[#allocation8 + $0xaf8] sm:$0xff] }
 0x36a   : > { %3616 = vmatpush2.msra.mxu0 %v1757_v20  ;;  %3540 = vmatprep.subr.mxu1 %v2516_v55  ;;  %v2182_v20 = vld [vmem:[#allocation8 + $0x12f8] sm:$0xff]  ;;  %v1925_v55 = vld [vmem:[#allocation8 + $0xaf0] sm:$0xff] }
 0x36b   : > { %3617 = vmatprep.subr.mxu0 %v1750_v56  ;;  %3541 = vmatpush2.msra.mxu1 %v2515_v24  ;;  %v2181_v56 = vld [vmem:[#allocation8 + $0x12f0] sm:$0xff]  ;;  %v2174_v24 = vld [vmem:[#allocation8 + $0x12b8] sm:$0xff] }
 0x36c   : > { %3618 = vmatpush2.msra.mxu0 %v1749_v57  ;;  %3542 = vmatprep.subr.mxu1 %v2508_v59  ;;  %v1917_v57 = vld [vmem:[#allocation8 + $0xab0] sm:$0xff] }
 0x36d   : > { %3619 = vmatprep.subr.mxu0 %v1742_v60  ;;  %3543 = vmatpush2.msra.mxu1 %v2507_v62  ;;  %v2173_v59 = vld [vmem:[#allocation8 + $0x12b0] sm:$0xff]  ;;  %v2166_v60 = vld [vmem:[#allocation8 + $0x1278] sm:$0xff] }
 0x36e   : > { %3620 = vmatpush2.msra.mxu0 %v1741_v0  ;;  %3544 = vmatprep.subr.mxu1 %v2500_v19  ;;  %v2165_v62 = vld [vmem:[#allocation8 + $0x1270] sm:$0xff]  ;;  %v1902_v0 = vld [vmem:[#allocation8 + $0xa38] sm:$0xff] }
 0x36f   : > { %3621 = vmatprep.subr.mxu0 %v1734_v4  ;;  %3545 = vmatpush2.msra.mxu1 %v2499_v7  ;;  %v2158_v19 = vld [vmem:[#allocation8 + $0x1238] sm:$0xff]  ;;  %v1901_v4 = vld [vmem:[#allocation8 + $0xa30] sm:$0xff] }
 0x370   : > { %3622 = vmatpush2.msra.mxu0 %v1733_v9  ;;  %3546 = vmatprep.subr.mxu1 %v2492_v10  ;;  %v2157_v7 = vld [vmem:[#allocation8 + $0x1230] sm:$0xff]  ;;  %v1894_v9 = vld [vmem:[#allocation8 + $0x9f8] sm:$0xff] }
 0x371   : > { %3623 = vmatprep.subr.mxu0 %v1726_v11  ;;  %3547 = vmatpush2.msra.mxu1 %v2491_v13  ;;  %v2150_v10 = vld [vmem:[#allocation8 + $0x11f8] sm:$0xff]  ;;  %v1893_v11 = vld [vmem:[#allocation8 + $0x9f0] sm:$0xff] }
 0x372   : > { %3624 = vmatpush2.msra.mxu0 %v1725_v14  ;;  %3548 = vmatprep.subr.mxu1 %v2484_v17  ;;  %v2149_v13 = vld [vmem:[#allocation8 + $0x11f0] sm:$0xff]  ;;  %v1886_v14 = vld [vmem:[#allocation8 + $0x9b8] sm:$0xff] }
 0x373   : > { %3625 = vmatprep.subr.mxu0 %v1718_v3  ;;  %3549 = vmatpush2.msra.mxu1 %v2483_v22  ;;  %v2142_v17 = vld [vmem:[#allocation8 + $0x11b8] sm:$0xff]  ;;  %v1885_v3 = vld [vmem:[#allocation8 + $0x9b0] sm:$0xff] }
 0x374   : > { %3626 = vmatpush2.msra.mxu0 %v1717_v23  ;;  %3550 = vmatprep.subr.mxu1 %v2476_v1  ;;  %v2141_v22 = vld [vmem:[#allocation8 + $0x11b0] sm:$0xff]  ;;  %v1878_v23 = vld [vmem:[#allocation8 + $0x978] sm:$0xff] }
 0x375   : > { %3627 = vmatprep.subr.mxu0 %v1710_v25  ;;  %3551 = vmatpush2.msra.mxu1 %v2475_v31  ;;  %v2134_v1 = vld [vmem:[#allocation8 + $0x1178] sm:$0xff]  ;;  %v1877_v25 = vld [vmem:[#allocation8 + $0x970] sm:$0xff] }
 0x376   : > { %3628 = vmatpush2.msra.mxu0 %v1709_v33  ;;  %3553 = vmatmul.mubr.f32.vlgmr.msra.gmra.mxu1 %v5450_v35  ;;  %v2133_v31 = vld [vmem:[#allocation8 + $0x1170] sm:$0xff]  ;;  %v1870_v33 = vld [vmem:[#allocation8 + $0x938] sm:$0xff] }
 0x377   : > { %3630 = vmatmul.mubr.f32.vlgmr.msra.gmra.mxu0 %v5396_v18  ;;  %3642 = vmatprep.subr.mxu1 %v1958_v34  ;;  %v1941_v18 = vld [vmem:[#allocation8 + $0xb70] sm:$0xff]  ;;  %v2126_v34 = vld [vmem:[#allocation8 + $0x1138] sm:$0xff] }
 0x378   : > { %3719 = vmatprep.subr.mxu0 %v2214_v37  ;;  %3558 = vmatprep.mubr.f32.mxu1 %v5457_v8  ;;  %v1869_v37 = vld [vmem:[#allocation8 + $0x930] sm:$0xff] }
 0x379   : > { %3635 = vmatprep.mubr.f32.mxu0 %v5394_v15  ;;  %3643 = vmatpush1.msra.mxu1 %v1957_v40  ;;  %v2190_v15 = vld [vmem:[#allocation8 + $0x1338] sm:$0xff]  ;;  %v2125_v40 = vld [vmem:[#allocation8 + $0x1130] sm:$0xff] }
 0x37a   : > { %3720 = vmatpush1.msra.mxu0 %v2213_v41  ;;  %3644 = vmatprep.subr.mxu1 %v1950_v58  ;;  %v1862_v41 = vld [vmem:[#allocation8 + $0x8f8] sm:$0xff] }
 0x37b   : > { %3721 = vmatprep.subr.mxu0 %v2206_v42  ;;  %3645 = vmatpush1.msra.mxu1 %v1949_v45  ;;  %v2118_v58 = vld [vmem:[#allocation8 + $0x10f8] sm:$0xff]  ;;  %v1861_v42 = vld [vmem:[#allocation8 + $0x8f0] sm:$0xff] }
 0x37c   : > { %3722 = vmatpush1.msra.mxu0 %v2205_v46  ;;  %3559 = vmatmul.mubr.f32.gmra.mxu1 %v5455_v2  ;;  %v2117_v45 = vld [vmem:[#allocation8 + $0x10f0] sm:$0xff]  ;;  %v1854_v46 = vld [vmem:[#allocation8 + $0x8b8] sm:$0xff] }
 0x37d   : > { %3636 = vmatmul.mubr.f32.gmra.mxu0 %v5400_v28  ;;  %3646 = vmatprep.subr.mxu1 %v1942_v47  ;;  %v1918_v28 = vld [vmem:[#allocation8 + $0xab8] sm:$0xff] }
 0x37e   : > { %3723 = vmatprep.subr.mxu0 %v2198_v48  ;;  %3647 = vmatpush1.msra.mxu1 %v1941_v18  ;;  %v2110_v47 = vld [vmem:[#allocation8 + $0x10b8] sm:$0xff]  ;;  %v1853_v48 = vld [vmem:[#allocation8 + $0x8b0] sm:$0xff] }
 0x37f   : > { %3706 = vmatprep.mubr.f32.mxu1 %v5398_v21  ;;  %3724 = vmatpush1.msra.mxu0 %v2197_v49  ;;  %v1910_v21 = vld [vmem:[#allocation8 + $0xa78] sm:$0xff]  ;;  %v2109_v18 = vld [vmem:[#allocation8 + $0x10b0] sm:$0xff] }
 0x380   : > { %3783 = vmatprep.mubr.f32.mxu0 %v5425_v12  ;;  %3648 = vmatprep.subr.mxu1 %v1934_v5  ;;  %v1909_v12 = vld [vmem:[#allocation8 + $0xa70] sm:$0xff]  ;;  %v1846_v49 = vld [vmem:[#allocation8 + $0x878] sm:$0xff] }
 0x381   : > { %3725 = vmatprep.subr.mxu0 %v2190_v15  ;;  %3649 = vmatpush1.msra.mxu1 %v1933_v51  ;;  %v2102_v5 = vld [vmem:[#allocation8 + $0x1078] sm:$0xff]  ;;  %v1845_v15 = vld [vmem:[#allocation8 + $0x870] sm:$0xff] }
 0x382   : > { %3726 = vmatpush1.msra.mxu0 %v2189_v53  ;;  %3650 = vmatprep.subr.mxu1 %v1926_v54  ;;  %v2101_v51 = vld [vmem:[#allocation8 + $0x1070] sm:$0xff]  ;;  %v1838_v53 = vld [vmem:[#allocation8 + $0x838] sm:$0xff] }
 0x383   : > { %3727 = vmatprep.subr.mxu0 %v2182_v20  ;;  %3651 = vmatpush1.msra.mxu1 %v1925_v55  ;;  %v2094_v54 = vld [vmem:[#allocation8 + $0x1038] sm:$0xff]  ;;  %v1837_v20 = vld [vmem:[#allocation8 + $0x830] sm:$0xff] }
 0x384   : > { %3728 = vmatpush1.msra.mxu0 %v2181_v56  ;;  %3652 = vmatprep.subr.mxu1 %v1918_v28  ;;  %v2093_v55 = vld [vmem:[#allocation8 + $0x1030] sm:$0xff]  ;;  %v2086_v56 = vld [vmem:[#allocation8 + $0xff8] sm:$0xff] }
 0x385   : > { %3729 = vmatprep.subr.mxu0 %v2174_v24  ;;  %3653 = vmatpush1.msra.mxu1 %v1917_v57  ;;  %v2342_v28 = vld [vmem:[#allocation8 + $0x17f8] sm:$0xff]  ;;  %v2085_v24 = vld [vmem:[#allocation8 + $0xff0] sm:$0xff] }
 0x386   : > { %3730 = vmatpush1.msra.mxu0 %v2173_v59  ;;  %3654 = vmatprep.subr.mxu1 %v1910_v21  ;;  %v2341_v57 = vld [vmem:[#allocation8 + $0x17f0] sm:$0xff]  ;;  %v2078_v59 = vld [vmem:[#allocation8 + $0xfb8] sm:$0xff] }
 0x387   : > { %3731 = vmatprep.subr.mxu0 %v2166_v60  ;;  %3655 = vmatpush1.msra.mxu1 %v1909_v12  ;;  %v2334_v21 = vld [vmem:[#allocation8 + $0x17b8] sm:$0xff]  ;;  %v2077_v60 = vld [vmem:[#allocation8 + $0xfb0] sm:$0xff] }
 0x388   : > { %3732 = vmatpush1.msra.mxu0 %v2165_v62  ;;  %3656 = vmatprep.subr.mxu1 %v1902_v0  ;;  %v2333_v12 = vld [vmem:[#allocation8 + $0x17b0] sm:$0xff]  ;;  %v2070_v62 = vld [vmem:[#allocation8 + $0xf78] sm:$0xff] }
 0x389   : > { %3733 = vmatprep.subr.mxu0 %v2158_v19  ;;  %3657 = vmatpush1.msra.mxu1 %v1901_v4  ;;  %v2326_v0 = vld [vmem:[#allocation8 + $0x1778] sm:$0xff]  ;;  %v2069_v19 = vld [vmem:[#allocation8 + $0xf70] sm:$0xff] }
 0x38a   : > { %3734 = vmatpush1.msra.mxu0 %v2157_v7  ;;  %3658 = vmatprep.subr.mxu1 %v1894_v9  ;;  %v2325_v4 = vld [vmem:[#allocation8 + $0x1770] sm:$0xff]  ;;  %v2062_v7 = vld [vmem:[#allocation8 + $0xf38] sm:$0xff] }
 0x38b   : > { %3735 = vmatprep.subr.mxu0 %v2150_v10  ;;  %3659 = vmatpush1.msra.mxu1 %v1893_v11  ;;  %v2318_v9 = vld [vmem:[#allocation8 + $0x1738] sm:$0xff]  ;;  %v2061_v10 = vld [vmem:[#allocation8 + $0xf30] sm:$0xff] }
 0x38c   : > { %3736 = vmatpush1.msra.mxu0 %v2149_v13  ;;  %3660 = vmatprep.subr.mxu1 %v1886_v14  ;;  %v2317_v11 = vld [vmem:[#allocation8 + $0x1730] sm:$0xff]  ;;  %v2054_v13 = vld [vmem:[#allocation8 + $0xef8] sm:$0xff] }
 0x38d   : > { %3737 = vmatprep.subr.mxu0 %v2142_v17  ;;  %3661 = vmatpush1.msra.mxu1 %v1885_v3  ;;  %v2310_v14 = vld [vmem:[#allocation8 + $0x16f8] sm:$0xff]  ;;  %v2053_v17 = vld [vmem:[#allocation8 + $0xef0] sm:$0xff] }
 0x38e   : > { %3738 = vmatpush1.msra.mxu0 %v2141_v22  ;;  %3662 = vmatprep.subr.mxu1 %v1878_v23  ;;  %v2309_v3 = vld [vmem:[#allocation8 + $0x16f0] sm:$0xff]  ;;  %v2046_v22 = vld [vmem:[#allocation8 + $0xeb8] sm:$0xff] }
 0x38f   : > { %3739 = vmatprep.subr.mxu0 %v2134_v1  ;;  %3663 = vmatpush1.msra.mxu1 %v1877_v25  ;;  %v2302_v23 = vld [vmem:[#allocation8 + $0x16b8] sm:$0xff]  ;;  %v2045_v1 = vld [vmem:[#allocation8 + $0xeb0] sm:$0xff] }
 0x390   : > { %3740 = vmatpush1.msra.mxu0 %v2133_v31  ;;  %3664 = vmatprep.subr.mxu1 %v1870_v33  ;;  %v2301_v25 = vld [vmem:[#allocation8 + $0x16b0] sm:$0xff]  ;;  %v2038_v31 = vld [vmem:[#allocation8 + $0xe78] sm:$0xff] }
 0x391   : > { %3741 = vmatprep.subr.mxu0 %v2126_v34  ;;  %3665 = vmatpush1.msra.mxu1 %v1869_v37  ;;  %v2294_v33 = vld [vmem:[#allocation8 + $0x1678] sm:$0xff]  ;;  %v2037_v34 = vld [vmem:[#allocation8 + $0xe70] sm:$0xff] }
 0x392   : > { %3742 = vmatpush1.msra.mxu0 %v2125_v40  ;;  %3666 = vmatprep.subr.mxu1 %v1862_v41  ;;  %v2293_v37 = vld [vmem:[#allocation8 + $0x1670] sm:$0xff]  ;;  %v2030_v40 = vld [vmem:[#allocation8 + $0xe38] sm:$0xff] }
 0x393   : > { %3743 = vmatprep.subr.mxu0 %v2118_v58  ;;  %3667 = vmatpush1.msra.mxu1 %v1861_v42  ;;  %v2286_v41 = vld [vmem:[#allocation8 + $0x1638] sm:$0xff]  ;;  %v5495_v58 = vpop.f32.mrf.mxu0  ;;  %v2029_v42 = vld [vmem:[#allocation8 + $0xe30] sm:$0xff] }
 0x394   : > { %3744 = vmatpush1.msra.mxu0 %v2117_v45  ;;  %3668 = vmatprep.subr.mxu1 %v1854_v46  ;;  %v2285_v45 = vld [vmem:[#allocation8 + $0x1630] sm:$0xff]  ;;  %v2022_v46 = vld [vmem:[#allocation8 + $0xdf8] sm:$0xff] }
 0x395   : > { %3745 = vmatprep.subr.mxu0 %v2110_v47  ;;  %3669 = vmatpush1.msra.mxu1 %v1853_v48  ;;  %v2278_v47 = vld [vmem:[#allocation8 + $0x15f8] sm:$0xff]  ;;  %v5497_v48 = vpop.f32.mrf.mxu1 }
 0x396   : > { %3746 = vmatpush1.msra.mxu0 %v2109_v18  ;;  %3670 = vmatprep.subr.mxu1 %v1846_v49  ;;  %v2021_v18 = vld [vmem:[#allocation8 + $0xdf0] sm:$0xff] }
 0x397   : > { %3747 = vmatprep.subr.mxu0 %v2102_v5  ;;  %3671 = vmatpush1.msra.mxu1 %v1845_v15  ;;  %v2277_v49 = vld [vmem:[#allocation8 + $0x15f0] sm:$0xff]  ;;  %v2014_v5 = vld [vmem:[#allocation8 + $0xdb8] sm:$0xff] }
 0x398   : > { %3748 = vmatpush1.msra.mxu0 %v2101_v51  ;;  %3672 = vmatprep.subr.mxu1 %v1838_v53  ;;  %v2270_v15 = vld [vmem:[#allocation8 + $0x15b8] sm:$0xff]  ;;  %v2709_v51 = vpop.f32.mrf.mxu0  ;;  %v2013_v53 = vld [vmem:[#allocation8 + $0xdb0] sm:$0xff] }
 0x399   : > { %3749 = vmatprep.subr.mxu0 %v2094_v54  ;;  %3673 = vmatpush1.msra.mxu1 %v1837_v20  ;;  %v2269_v54 = vld [vmem:[#allocation8 + $0x15b0] sm:$0xff]  ;;  %v2006_v20 = vld [vmem:[#allocation8 + $0xd78] sm:$0xff] }
 0x39a   : > { %3750 = vmatpush1.msra.mxu0 %v2093_v55  ;;  %3674 = vmatprep.subr.mxu1 %v2086_v56  ;;  %v2262_v55 = vld [vmem:[#allocation8 + $0x1578] sm:$0xff]  ;;  %v2786_v56 = vpop.f32.mrf.mxu1 }
 0x39b   : > { %3751 = vmatprep.subr.mxu0 %v2342_v28  ;;  %3675 = vmatpush2.msra.mxu1 %v2085_v24  ;;  %v2005_v28 = vld [vmem:[#allocation8 + $0xd70] sm:$0xff] }
 0x39c   : > { %3752 = vmatpush2.msra.mxu0 %v2341_v57  ;;  %3676 = vmatprep.subr.mxu1 %v2078_v59  ;;  %v2261_v24 = vld [vmem:[#allocation8 + $0x1570] sm:$0xff]  ;;  %v1998_v57 = vld [vmem:[#allocation8 + $0xd38] sm:$0xff] }
 0x39d   : > { %3753 = vmatprep.subr.mxu0 %v2334_v21  ;;  %3677 = vmatpush2.msra.mxu1 %v2077_v60  ;;  %v2254_v59 = vld [vmem:[#allocation8 + $0x1538] sm:$0xff]  ;;  %v5499_v21 = vpop.f32.mrf.mxu0  ;;  %v1997_v60 = vld [vmem:[#allocation8 + $0xd30] sm:$0xff] }
 0x39e   : > { %3754 = vmatpush2.msra.mxu0 %v2333_v12  ;;  %3678 = vmatprep.subr.mxu1 %v2070_v62  ;;  %v2253_v12 = vld [vmem:[#allocation8 + $0x1530] sm:$0xff]  ;;  %v1990_v62 = vld [vmem:[#allocation8 + $0xcf8] sm:$0xff] }
 0x39f   : > { %3755 = vmatprep.subr.mxu0 %v2326_v0  ;;  %3679 = vmatpush2.msra.mxu1 %v2069_v19  ;;  %v2246_v0 = vld [vmem:[#allocation8 + $0x14f8] sm:$0xff]  ;;  %v5501_v19 = vpop.f32.mrf.mxu1 }
 0x3a0   : > { %3756 = vmatpush2.msra.mxu0 %v2325_v4  ;;  %3680 = vmatprep.subr.mxu1 %v2062_v7  ;;  %v1989_v4 = vld [vmem:[#allocation8 + $0xcf0] sm:$0xff] }
 0x3a1   : > { %3757 = vmatprep.subr.mxu0 %v2318_v9  ;;  %3681 = vmatpush2.msra.mxu1 %v2061_v10  ;;  %v2245_v7 = vld [vmem:[#allocation8 + $0x14f0] sm:$0xff]  ;;  %v1982_v9 = vld [vmem:[#allocation8 + $0xcb8] sm:$0xff] }
 0x3a2   : > { %3758 = vmatpush2.msra.mxu0 %v2317_v11  ;;  %3682 = vmatprep.subr.mxu1 %v2054_v13  ;;  %v2238_v10 = vld [vmem:[#allocation8 + $0x14b8] sm:$0xff]  ;;  %v5503_v11 = vld [vmem:[#allocation10] sm:$0xff]  ;;  %v5505_v13 = vpop.f32.mrf.mxu0 }
 0x3a3   : > { %3759 = vmatprep.subr.mxu0 %v2310_v14  ;;  %3683 = vmatpush2.msra.mxu1 %v2053_v17  ;;  %v1981_v14 = vld [vmem:[#allocation8 + $0xcb0] sm:$0xff] }
 0x3a4   : > { %3760 = vmatpush2.msra.mxu0 %v2309_v3  ;;  %3684 = vmatprep.subr.mxu1 %v2046_v22  ;;  %v2237_v17 = vld [vmem:[#allocation8 + $0x14b0] sm:$0xff]  ;;  %v5510_v3 = vrot.slane %v5503_v11, %v909_v16  ;;  %v1974_v22 = vld [vmem:[#allocation8 + $0xc78] sm:$0xff] }
 0x3a5   : > { %3761 = vmatprep.subr.mxu0 %v2302_v23  ;;  %3685 = vmatpush2.msra.mxu1 %v2045_v1  ;;  %v2230_v23 = vld [vmem:[#allocation8 + $0x1478] sm:$0xff]  ;;  %v5512_v1 = vpop.f32.mrf.mxu1  ;;  %v1965_v16 = vld [vmem:[#allocation8 + $0xc30] sm:$0xff] }
 0x3a6   : > { %3762 = vmatpush2.msra.mxu0 %v2301_v25  ;;  %3686 = vmatprep.subr.mxu1 %v2038_v31  ;;  %v5514_v25 = vpop.f32.mrf.mxu0  ;;  %v1973_v31 = vld [vmem:[#allocation8 + $0xc70] sm:$0xff] }
 0x3a7   : > { %3763 = vmatprep.subr.mxu0 %v2294_v33  ;;  %3687 = vmatpush2.msra.mxu1 %v2037_v34  ;;  %v2229_v33 = vld [vmem:[#allocation8 + $0x1470] sm:$0xff]  ;;  %v1966_v34 = vld [vmem:[#allocation8 + $0xc38] sm:$0xff] }
 0x3a8   : > { %3764 = vmatpush2.msra.mxu0 %v2293_v37  ;;  %3688 = vmatprep.subr.mxu1 %v2030_v40  ;;  %v2222_v37 = vld [vmem:[#allocation8 + $0x1438] sm:$0xff]  ;;  %v5516_v40 = vpop.f32.mrf.mxu1 }
 0x3a9   : > { %3765 = vmatprep.subr.mxu0 %v2286_v41  ;;  %3689 = vmatpush2.msra.mxu1 %v2029_v42  ;;  %v2221_v41 = vld [vmem:[#allocation8 + $0x1430] sm:$0xff]  ;;  %v2710_v42 = vadd.f32 %v2709_v51, %v5510_v3  ;;  %v2462_v51 = vld [vmem:[#allocation8 + $0x1bb8] sm:$0xff] }
 0x3aa   : > { %3766 = vmatpush2.msra.mxu0 %v2285_v45  ;;  %3690 = vmatprep.subr.mxu1 %v2022_v46  ;;  %v2863_v45 = vpop.f32.mrf.mxu0  ;;  %v2470_v46 = vld [vmem:[#allocation8 + $0x1bf8] sm:$0xff] }
 0x3ab   : > { %3767 = vmatprep.subr.mxu0 %v2278_v47  ;;  %3691 = vmatpush2.msra.mxu1 %v2021_v18  ;;  %v3920_v47 = vld [vmem:[#allocation11 + $0xf8] sm:$0xff]  ;;  %v2787_v18 = vadd.f32 %v2786_v56, %v2710_v42  ;;  %v2398_v42 = vld [vmem:[#allocation8 + $0x19b8] sm:$0xff] }
 0x3ac   : > { %3768 = vmatpush2.msra.mxu0 %v2277_v49  ;;  %3692 = vmatprep.subr.mxu1 %v2014_v5  ;;  %v2940_v49 = vpop.f32.mrf.mxu1  ;;  %v2469_v5 = vld [vmem:[#allocation8 + $0x1bf0] sm:$0xff] }
 0x3ad   : > { %3769 = vmatprep.subr.mxu0 %v2270_v15  ;;  %3693 = vmatpush2.msra.mxu1 %v2013_v53  ;;  %v3904_v15 = vld [vmem:[#allocation11 + $0x78] sm:$0xff]  ;;  %v2864_v53 = vadd.f32 %v2863_v45, %v2787_v18  ;;  %v3911_v45 = vld [vmem:[#allocation11 + $0xb0] sm:$0xff] }
 0x3ae   : > { %3770 = vmatpush2.msra.mxu0 %v2269_v54  ;;  %3694 = vmatprep.subr.mxu1 %v2006_v20  ;;  %v3919_v54 = vld [vmem:[#allocation11 + $0xf0] sm:$0xff]  ;;  %v2461_v20 = vld [vmem:[#allocation8 + $0x1bb0] sm:$0xff] }
 0x3af   : > { %3771 = vmatprep.subr.mxu0 %v2262_v55  ;;  %3695 = vmatpush2.msra.mxu1 %v2005_v28  ;;  %v3903_v55 = vld [vmem:[#allocation11 + $0x70] sm:$0xff]  ;;  %v2941_v56 = vadd.f32 %v2940_v49, %v2864_v53  ;;  %v2453_v28 = vld [vmem:[#allocation8 + $0x1b70] sm:$0xff] }
 0x3b0   : > { %3772 = vmatpush2.msra.mxu0 %v2261_v24  ;;  %3696 = vmatprep.subr.mxu1 %v1998_v57  ;;  %v3902_v24 = vld [vmem:[#allocation11 + $0x68] sm:$0xff]  ;;  %v3917_v57 = vld [vmem:[#allocation11 + $0xe0] sm:$0xff]  ;;  %v3895_v18 = vld [vmem:[#allocation11 + $0x30] sm:$0xff] }
 0x3b1   : > { %3773 = vmatprep.subr.mxu0 %v2254_v59  ;;  %3697 = vmatpush2.msra.mxu1 %v1997_v60  ;;  %v2445_v59 = vld [vmem:[#allocation8 + $0x1b30] sm:$0xff]  ;;  %v3901_v60 = vld [vmem:[#allocation11 + $0x60] sm:$0xff]  ;;  %v2390_v49 = vld [vmem:[#allocation8 + $0x1978] sm:$0xff] }
 0x3b2   : > { %3774 = vmatpush2.msra.mxu0 %v2253_v12  ;;  %3698 = vmatprep.subr.mxu1 %v1990_v62  ;;  %v2438_v12 = vld [vmem:[#allocation8 + $0x1af8] sm:$0xff]  ;;  %v3916_v62 = vld [vmem:[#allocation11 + $0xd8] sm:$0xff]  ;;  %v2389_v53 = vld [vmem:[#allocation8 + $0x1970] sm:$0xff] }
 0x3b3   : > { %3775 = vmatprep.subr.mxu0 %v2246_v0  ;;  %3699 = vmatpush2.msra.mxu1 %v1989_v4  ;;  %v3900_v0 = vld [vmem:[#allocation11 + $0x58] sm:$0xff]  ;;  %v3915_v4 = vld [vmem:[#allocation11 + $0xd0] sm:$0xff] }
 0x3b4   : > { %3776 = vmatpush2.msra.mxu0 %v2245_v7  ;;  %3700 = vmatprep.subr.mxu1 %v1982_v9  ;;  %v2429_v7 = vld [vmem:[#allocation8 + $0x1ab0] sm:$0xff]  ;;  %v3899_v9 = vld [vmem:[#allocation11 + $0x50] sm:$0xff] }
 0x3b5   : > { %3777 = vmatprep.subr.mxu0 %v2238_v10  ;;  %3701 = vmatpush2.msra.mxu1 %v1981_v14  ;;  %v3914_v10 = vld [vmem:[#allocation11 + $0xc8] sm:$0xff] }
 0x3b6   : > { %3778 = vmatpush2.msra.mxu0 %v2237_v17  ;;  %3702 = vmatprep.subr.mxu1 %v1974_v22  ;;  %v2421_v14 = vld [vmem:[#allocation8 + $0x1a70] sm:$0xff]  ;;  %v2414_v22 = vld [vmem:[#allocation8 + $0x1a38] sm:$0xff] }
 0x3b7   : > { %3779 = vmatprep.subr.mxu0 %v2230_v23  ;;  %3703 = vmatpush2.msra.mxu1 %v1973_v31  ;;  %v3898_v17 = vld [vmem:[#allocation11 + $0x48] sm:$0xff]  ;;  %v3913_v23 = vld [vmem:[#allocation11 + $0xc0] sm:$0xff] }
 0x3b8   : > { %3780 = vmatpush2.msra.mxu0 %v2229_v33  ;;  %3704 = vmatprep.subr.mxu1 %v1966_v34  ;;  %v2413_v31 = vld [vmem:[#allocation8 + $0x1a30] sm:$0xff]  ;;  %v3897_v33 = vld [vmem:[#allocation11 + $0x40] sm:$0xff]  ;;  %v2406_v34 = vld [vmem:[#allocation8 + $0x19f8] sm:$0xff] }
 0x3b9   : > { %3781 = vmatprep.subr.mxu0 %v2222_v37  ;;  %3705 = vmatpush2.msra.mxu1 %v1965_v16  ;;  %v3912_v37 = vld [vmem:[#allocation11 + $0xb8] sm:$0xff]  ;;  %v2405_v16 = vld [vmem:[#allocation8 + $0x19f0] sm:$0xff] }
 0x3ba   : > { %3782 = vmatpush2.msra.mxu0 %v2221_v41  ;;  %3707 = vmatmul.mubr.f32.vlgmr.msra.gmra.mxu1 %v5405_v39  ;;  %v2454_v39 = vld [vmem:[#allocation8 + $0x1b78] sm:$0xff]  ;;  %v3896_v41 = vld [vmem:[#allocation11 + $0x38] sm:$0xff] }
 0x3bb   : > { %3784 = vmatmul.mubr.f32.vlgmr.msra.gmra.mxu0 %v5427_v30  ;;  %3796 = vmatprep.subr.mxu1 %v2470_v46  ;;  %v3918_v30 = vld [vmem:[#allocation11 + $0xe8] sm:$0xff]  ;;  %v2604_v46 = vrot.slane %v5503_v11, %v905_v63  ;;  %v2944_v63 = vpop.f32.mrf.mxu1 }
 0x3bc   : > { %4501 = vmatprep.subr.mxu0 %v3920_v47  ;;  %3712 = vmatprep.mubr.f32.mxu1 %v5410_v44  ;;  %v3874_v44 = vmax.f32 %v2941_v56, 0.0  ;;  %v2397_v47 = vld [vmem:[#allocation8 + $0x19b0] sm:$0xff] }
 0x3bd   : > { %3789 = vmatprep.mubr.f32.mxu0 %v5433_v29  ;;  %3797 = vmatpush1.msra.mxu1 %v2469_v5  ;;  %v2446_v29 = vld [vmem:[#allocation8 + $0x1b38] sm:$0xff]  ;;  %v3910_v5 = vld [vmem:[#allocation11 + $0xa8] sm:$0xff] }
 0x3be   : > { %4502 = vmatpush3.msra.mxu0 %v3904_v15  ;;  %3798 = vmatprep.subr.mxu1 %v2462_v51  ;;  %v2867_v15 = vpop.f32.mrf.mxu0  ;;  %v3894_v51 = vld [vmem:[#allocation11 + $0x28] sm:$0xff] }
 0x3bf   : > { %4503 = vmatprep.subr.mxu0 %v3919_v54  ;;  %3799 = vmatpush1.msra.mxu1 %v2461_v20  ;;  %v2382_v54 = vld [vmem:[#allocation8 + $0x1938] sm:$0xff]  ;;  %v3909_v20 = vld [vmem:[#allocation11 + $0xa0] sm:$0xff]  ;;  %v2381_v56 = vld [vmem:[#allocation8 + $0x1930] sm:$0xff] }
 0x3c0   : > { %4504 = vmatpush3.msra.mxu0 %v3903_v55  ;;  %3713 = vmatmul.mubr.f32.gmra.mxu1 %v5408_v43  ;;  %v2437_v43 = vld [vmem:[#allocation8 + $0x1af0] sm:$0xff]  ;;  %v2708_v55 = vadd.f32 %v5495_v58, %v2604_v46 }
 0x3c1   : > { %3790 = vmatmul.mubr.f32.gmra.mxu0 %v5431_v26  ;;  %3800 = vmatprep.subr.mxu1 %v2454_v39  ;;  %v2430_v26 = vld [vmem:[#allocation8 + $0x1ab8] sm:$0xff]  ;;  %v3893_v39 = vld [vmem:[#allocation11 + $0x20] sm:$0xff] }
 0x3c2   : > { %4505 = vmatprep.subr.mxu0 %v3918_v30  ;;  %3801 = vmatpush1.msra.mxu1 %v2453_v28  ;;  %v2716_v30 = vadd.f32 %v5505_v13, %v5510_v3  ;;  %v2374_v28 = vld [vmem:[#allocation8 + $0x18f8] sm:$0xff]  ;;  %v2946_v3 = vpop.f32.mrf.mxu1 }
 0x3c3   : > { %3860 = vmatprep.mubr.f32.mxu1 %v5448_v27  ;;  %4506 = vmatpush3.msra.mxu0 %v3902_v24  ;;  %v2422_v27 = vld [vmem:[#allocation8 + $0x1a78] sm:$0xff]  ;;  %v3908_v24 = vld [vmem:[#allocation11 + $0x98] sm:$0xff] }
 0x3c4   : > { %4088 = vmatprep.mubr.f32.mxu0 %v3874_v44  ;;  %3802 = vmatprep.subr.mxu1 %v2446_v29  ;;  %v2785_v44 = vadd.f32 %v5497_v48, %v2708_v55  ;;  %v2869_v29 = vpop.f32.mrf.mxu0  ;;  %v2793_v58 = vadd.f32 %v5512_v1, %v2716_v30  ;;  %v3891_v48 = vld [vmem:[#allocation11 + $0x10] sm:$0xff] }
 0x3c5   : > { %4507 = vmatprep.subr.mxu0 %v3917_v57  ;;  %3803 = vmatpush1.msra.mxu1 %v2445_v59  ;;  %v2373_v57 = vld [vmem:[#allocation8 + $0x18f0] sm:$0xff]  ;;  %v3892_v59 = vld [vmem:[#allocation11 + $0x18] sm:$0xff]  ;;  %v2558_v55 = vld [vmem:[#allocation8 + $0x1eb8] sm:$0xff] }
 0x3c6   : > { %4508 = vmatpush3.msra.mxu0 %v3901_v60  ;;  %3804 = vmatprep.subr.mxu1 %v2438_v12  ;;  %v2366_v60 = vld [vmem:[#allocation8 + $0x18b8] sm:$0xff]  ;;  %v2862_v13 = vadd.f32 %v5514_v25, %v2785_v44  ;;  %v5540_v44 = vpop.f32.mrf.mxu1 }
 0x3c7   : > { %4509 = vmatprep.subr.mxu0 %v3916_v62  ;;  %3805 = vmatpush1.msra.mxu1 %v2437_v43  ;;  %v3907_v12 = vld [vmem:[#allocation11 + $0x90] sm:$0xff]  ;;  %v2714_v62 = vadd.f32 %v5499_v21, %v2604_v46  ;;  %v2365_v43 = vld [vmem:[#allocation8 + $0x18b0] sm:$0xff] }
 0x3c8   : > { %4510 = vmatpush3.msra.mxu0 %v3900_v0  ;;  %3806 = vmatprep.subr.mxu1 %v2430_v26  ;;  %v2870_v0 = vadd.f32 %v2869_v29, %v2793_v58  ;;  %v2358_v26 = vld [vmem:[#allocation8 + $0x1878] sm:$0xff]  ;;  %v3890_v21 = vld [vmem:[#allocation11 + $0x8] sm:$0xff] }
 0x3c9   : > { %4511 = vmatprep.subr.mxu0 %v3915_v4  ;;  %3807 = vmatpush1.msra.mxu1 %v2429_v7  ;;  %v3906_v4 = vld [vmem:[#allocation11 + $0x88] sm:$0xff]  ;;  %v2791_v1 = vadd.f32 %v5501_v19, %v2714_v62  ;;  %v2939_v7 = vadd.f32 %v5516_v40, %v2862_v13  ;;  %v2350_v25 = vld [vmem:[#allocation8 + $0x1838] sm:$0xff] }
 0x3ca   : > { %4512 = vmatpush3.msra.mxu0 %v3899_v9  ;;  %3808 = vmatprep.subr.mxu1 %v2422_v27  ;;  %v2357_v9 = vld [vmem:[#allocation8 + $0x1870] sm:$0xff]  ;;  %v2947_v27 = vadd.f32 %v2946_v3, %v2870_v0  ;;  %v2550_v30 = vld [vmem:[#allocation8 + $0x1e78] sm:$0xff]  ;;  %v3977_v0 = vld [vmem:[#allocation11 + $0x2c0] sm:$0xff] }
 0x3cb   : > { %4513 = vmatprep.subr.mxu0 %v3914_v10  ;;  %3809 = vmatpush1.msra.mxu1 %v2421_v14  ;;  %v3905_v10 = vld [vmem:[#allocation11 + $0x80] sm:$0xff]  ;;  %v2868_v14 = vadd.f32 %v2867_v15, %v2791_v1  ;;  %v3873_v19 = vmax.f32 %v2939_v7, 0.0  ;;  %v2597_v40 = vld [vmem:[#allocation8 + $0x1ff0] sm:$0xff]  ;;  %v3963_v58 = vld [vmem:[#allocation11 + $0x250] sm:$0xff] }
 0x3cc   : > { %4514 = vmatpush3.msra.mxu0 %v3898_v17  ;;  %3810 = vmatprep.subr.mxu1 %v2414_v22  ;;  %v2349_v17 = vld [vmem:[#allocation8 + $0x1830] sm:$0xff]  ;;  %v3889_v22 = vld [vmem:[#allocation11] sm:$0xff]  ;;  %v2534_v62 = vld [vmem:[#allocation8 + $0x1df8] sm:$0xff] }
 0x3cd   : > { %4515 = vmatprep.subr.mxu0 %v3913_v23  ;;  %3811 = vmatpush1.msra.mxu1 %v2413_v31  ;;  %v2598_v23 = vld [vmem:[#allocation8 + $0x1ff8] sm:$0xff]  ;;  %v2945_v31 = vadd.f32 %v2944_v63, %v2868_v14  ;;  %v2581_v46 = vld [vmem:[#allocation8 + $0x1f70] sm:$0xff]  ;;  %v3965_v63 = vld [vmem:[#allocation11 + $0x260] sm:$0xff] }
 0x3ce   : > { %4516 = vmatpush3.msra.mxu0 %v3897_v33  ;;  %3812 = vmatprep.subr.mxu1 %v2406_v34  ;;  %v3882_v33 = vmax.f32 %v2947_v27, 0.0  ;;  %v2590_v34 = vld [vmem:[#allocation8 + $0x1fb8] sm:$0xff]  ;;  %v3982_v15 = vld [vmem:[#allocation11 + $0x2e8] sm:$0xff]  ;;  %v3976_v7 = vld [vmem:[#allocation11 + $0x2b8] sm:$0xff] }
 0x3cf   : > { %4517 = vmatprep.subr.mxu0 %v3912_v37  ;;  %3813 = vmatpush1.msra.mxu1 %v2405_v16  ;;  %v3984_v37 = vld [vmem:[#allocation11 + $0x2f8] sm:$0xff]  ;;  %v2589_v16 = vld [vmem:[#allocation8 + $0x1fb0] sm:$0xff]  ;;  %v3975_v14 = vld [vmem:[#allocation11 + $0x2b0] sm:$0xff] }
 0x3d0   : > { %4518 = vmatpush3.msra.mxu0 %v3896_v41  ;;  %3814 = vmatprep.subr.mxu1 %v2398_v42  ;;  %v3968_v41 = vld [vmem:[#allocation11 + $0x278] sm:$0xff]  ;;  %v2582_v42 = vld [vmem:[#allocation8 + $0x1f78] sm:$0xff]  ;;  %v2549_v29 = vld [vmem:[#allocation8 + $0x1e70] sm:$0xff] }
 0x3d1   : > { %4519 = vmatprep.subr.mxu0 %v3911_v45  ;;  %3815 = vmatpush1.msra.mxu1 %v2397_v47  ;;  %v3881_v45 = vmax.f32 %v2945_v31, 0.0  ;;  %v3983_v47 = vld [vmem:[#allocation11 + $0x2f0] sm:$0xff]  ;;  %v3962_v13 = vld [vmem:[#allocation11 + $0x248] sm:$0xff] }
 0x3d2   : > { %4520 = vmatpush3.msra.mxu0 %v3895_v18  ;;  %3816 = vmatprep.subr.mxu1 %v2390_v49  ;;  %v2574_v18 = vld [vmem:[#allocation8 + $0x1f38] sm:$0xff]  ;;  %v2525_v1 = vld [vmem:[#allocation8 + $0x1db0] sm:$0xff] }
 0x3d3   : > { %4521 = vmatprep.subr.mxu0 %v3910_v5  ;;  %3817 = vmatpush1.msra.mxu1 %v2389_v53  ;;  %v3967_v49 = vld [vmem:[#allocation11 + $0x270] sm:$0xff]  ;;  %v2573_v5 = vld [vmem:[#allocation8 + $0x1f30] sm:$0xff] }
 0x3d4   : > { %4522 = vmatpush3.msra.mxu0 %v3894_v51  ;;  %3818 = vmatprep.subr.mxu1 %v2382_v54  ;;  %v2566_v53 = vld [vmem:[#allocation8 + $0x1ef8] sm:$0xff]  ;;  %v3966_v51 = vld [vmem:[#allocation11 + $0x268] sm:$0xff] }
 0x3d5   : > { %4523 = vmatprep.subr.mxu0 %v3909_v20  ;;  %3819 = vmatpush1.msra.mxu1 %v2381_v56  ;;  %v2565_v54 = vld [vmem:[#allocation8 + $0x1ef0] sm:$0xff]  ;;  %v3981_v20 = vld [vmem:[#allocation11 + $0x2e0] sm:$0xff] }
 0x3d6   : > { %4524 = vmatpush3.msra.mxu0 %v3893_v39  ;;  %3820 = vmatprep.subr.mxu1 %v2374_v28  ;;  %v2557_v56 = vld [vmem:[#allocation8 + $0x1eb0] sm:$0xff]  ;;  %v3980_v39 = vld [vmem:[#allocation11 + $0x2d8] sm:$0xff] }
 0x3d7   : > { %4525 = vmatprep.subr.mxu0 %v3908_v24  ;;  %3821 = vmatpush1.msra.mxu1 %v2373_v57  ;;  %v3964_v28 = vld [vmem:[#allocation11 + $0x258] sm:$0xff]  ;;  %v5538_v24 = vpop.f32.mrf.mxu0  ;;  %v3979_v57 = vld [vmem:[#allocation11 + $0x2d0] sm:$0xff]  ;;  %v3974_v31 = vld [vmem:[#allocation11 + $0x2a8] sm:$0xff] }
 0x3d8   : > { %4526 = vmatpush3.msra.mxu0 %v3892_v59  ;;  %3822 = vmatprep.subr.mxu1 %v2366_v60  ;;  %v2542_v59 = vld [vmem:[#allocation8 + $0x1e38] sm:$0xff]  ;;  %v2541_v60 = vld [vmem:[#allocation8 + $0x1e30] sm:$0xff] }
 0x3d9   : > { %4527 = vmatprep.subr.mxu0 %v3907_v12  ;;  %3823 = vmatpush1.msra.mxu1 %v2365_v43  ;;  %v3978_v12 = vld [vmem:[#allocation11 + $0x2c8] sm:$0xff]  ;;  %v3017_v3 = vpop.f32.mrf.mxu0  ;;  %v3094_v43 = vpop.f32.mrf.mxu1 }
 0x3da   : > { %4528 = vmatpush3.msra.mxu0 %v3891_v48  ;;  %3824 = vmatprep.subr.mxu1 %v2358_v26  ;;  %v2533_v48 = vld [vmem:[#allocation8 + $0x1df0] sm:$0xff]  ;;  %v2526_v26 = vld [vmem:[#allocation8 + $0x1db8] sm:$0xff] }
 0x3db   : > { %4529 = vmatprep.subr.mxu0 %v3906_v4  ;;  %3825 = vmatpush1.msra.mxu1 %v2357_v9  ;;  %v3961_v4 = vld [vmem:[#allocation11 + $0x240] sm:$0xff]  ;;  %v2518_v9 = vld [vmem:[#allocation8 + $0x1d78] sm:$0xff]  ;;  %v5542_v27 = vpop.f32.mrf.mxu0 }
 0x3dc   : > { %4530 = vmatpush3.msra.mxu0 %v3890_v21  ;;  %3826 = vmatprep.subr.mxu1 %v2350_v25  ;;  %v3960_v21 = vld [vmem:[#allocation11 + $0x238] sm:$0xff]  ;;  %v5544_v25 = vpop.f32.mrf.mxu1 }
 0x3dd   : > { %4531 = vmatprep.subr.mxu0 %v3905_v10  ;;  %3827 = vmatpush1.msra.mxu1 %v2349_v17  ;;  %v2517_v10 = vld [vmem:[#allocation8 + $0x1d70] sm:$0xff]  ;;  %v5549_v17 = vrot.slane %v5503_v11, %v917_v36  ;;  %v3973_v36 = vld [vmem:[#allocation11 + $0x2a0] sm:$0xff] }
 0x3de   : > { %4532 = vmatpush3.msra.mxu0 %v3889_v22  ;;  %3828 = vmatprep.subr.mxu1 %v2598_v23  ;;  %v2510_v22 = vld [vmem:[#allocation8 + $0x1d38] sm:$0xff] }
 0x3df   : > { %4089 = vmatmul.mubr.f32.vlgmr.msra.gmra.mxu0 %v3873_v19  ;;  %3829 = vmatpush2.msra.mxu1 %v2597_v40  ;;  %v3959_v23 = vld [vmem:[#allocation11 + $0x230] sm:$0xff]  ;;  %v2509_v19 = vld [vmem:[#allocation8 + $0x1d30] sm:$0xff] }
 0x3e0   : > { %4093 = vmatprep.mubr.f32.mxu0 %v3882_v33  ;;  %3830 = vmatprep.subr.mxu1 %v2590_v34  ;;  %v2502_v40 = vld [vmem:[#allocation8 + $0x1cf8] sm:$0xff]  ;;  %v3958_v33 = vld [vmem:[#allocation11 + $0x228] sm:$0xff]  ;;  %v5551_v34 = vpop.f32.mrf.mxu0 }
 0x3e1   : > { %4577 = vmatprep.subr.mxu0 %v3984_v37  ;;  %3831 = vmatpush2.msra.mxu1 %v2589_v16  ;;  %v5553_v37 = vpop.f32.mrf.mxu1  ;;  %v2501_v16 = vld [vmem:[#allocation8 + $0x1cf0] sm:$0xff] }
 0x3e2   : > { %4578 = vmatpush3.msra.mxu0 %v3968_v41  ;;  %3832 = vmatprep.subr.mxu1 %v2582_v42  ;;  %v3018_v41 = vadd.f32 %v3017_v3, %v5549_v17  ;;  %v2494_v42 = vld [vmem:[#allocation8 + $0x1cb8] sm:$0xff]  ;;  %v3934_v3 = vld [vmem:[#allocation11 + $0x168] sm:$0xff] }
 0x3e3   : > { %4094 = vmatmul.mubr.f32.gmra.mxu0 %v3881_v45  ;;  %3833 = vmatpush2.msra.mxu1 %v2581_v46  ;;  %v3957_v45 = vld [vmem:[#allocation11 + $0x220] sm:$0xff]  ;;  %v5556_v46 = vpop.f32.mrf.mxu0 }
 0x3e4   : > { %4579 = vmatprep.subr.mxu0 %v3983_v47  ;;  %3834 = vmatprep.subr.mxu1 %v2574_v18  ;;  %v5558_v47 = vpop.f32.mrf.mxu1  ;;  %v2493_v18 = vld [vmem:[#allocation8 + $0x1cb0] sm:$0xff] }
 0x3e5   : > { %4580 = vmatpush3.msra.mxu0 %v3967_v49  ;;  %3835 = vmatpush2.msra.mxu1 %v2573_v5  ;;  %v3972_v49 = vld [vmem:[#allocation11 + $0x298] sm:$0xff]  ;;  %v3095_v5 = vadd.f32 %v3094_v43, %v3018_v41 }
 0x3e6   : > { %4581 = vmatprep.subr.mxu0 %v3982_v15  ;;  %3836 = vmatprep.subr.mxu1 %v2566_v53  ;;  %v2486_v15 = vld [vmem:[#allocation8 + $0x1c78] sm:$0xff]  ;;  %v3956_v53 = vld [vmem:[#allocation11 + $0x218] sm:$0xff] }
 0x3e7   : > { %4582 = vmatpush3.msra.mxu0 %v3966_v51  ;;  %3837 = vmatpush2.msra.mxu1 %v2565_v54  ;;  %v2485_v51 = vld [vmem:[#allocation8 + $0x1c70] sm:$0xff]  ;;  %v3971_v54 = vld [vmem:[#allocation11 + $0x290] sm:$0xff] }
 0x3e8   : > { %4583 = vmatprep.subr.mxu0 %v3981_v20  ;;  %3838 = vmatprep.subr.mxu1 %v2558_v55  ;;  %v2478_v20 = vld [vmem:[#allocation8 + $0x1c38] sm:$0xff] }
 0x3e9   : > { %4584 = vmatpush3.msra.mxu0 %v3965_v63  ;;  %3839 = vmatpush2.msra.mxu1 %v2557_v56  ;;  %v3955_v55 = vld [vmem:[#allocation11 + $0x210] sm:$0xff]  ;;  %v3171_v63 = vpop.f32.mrf.mxu0  ;;  %v3248_v56 = vpop.f32.mrf.mxu1 }
 0x3ea   : > { %4585 = vmatprep.subr.mxu0 %v3980_v39  ;;  %3840 = vmatprep.subr.mxu1 %v2550_v30  ;;  %v2477_v39 = vld [vmem:[#allocation8 + $0x1c30] sm:$0xff] }
 0x3eb   : > { %4586 = vmatpush3.msra.mxu0 %v3964_v28  ;;  %3841 = vmatpush2.msra.mxu1 %v2549_v29  ;;  %v3970_v30 = vld [vmem:[#allocation11 + $0x288] sm:$0xff]  ;;  %v3172_v28 = vadd.f32 %v3171_v63, %v3095_v5  ;;  %v3952_v29 = vld [vmem:[#allocation11 + $0x1f8] sm:$0xff]  ;;  %v3937_v63 = vld [vmem:[#allocation11 + $0x180] sm:$0xff] }
 0x3ec   : > { %4587 = vmatprep.subr.mxu0 %v3979_v57  ;;  %3842 = vmatprep.subr.mxu1 %v2542_v59  ;;  %v3936_v57 = vld [vmem:[#allocation11 + $0x178] sm:$0xff] }
 0x3ed   : > { %4588 = vmatpush3.msra.mxu0 %v3963_v58  ;;  %3843 = vmatpush2.msra.mxu1 %v2541_v60  ;;  %v3249_v59 = vadd.f32 %v3248_v56, %v3172_v28  ;;  %v3951_v58 = vld [vmem:[#allocation11 + $0x1f0] sm:$0xff]  ;;  %v3954_v60 = vld [vmem:[#allocation11 + $0x208] sm:$0xff] }
 0x3ee   : > { %4589 = vmatprep.subr.mxu0 %v3978_v12  ;;  %3844 = vmatprep.subr.mxu1 %v2534_v62  ;;  %v3935_v12 = vld [vmem:[#allocation11 + $0x170] sm:$0xff]  ;;  %v3969_v62 = vld [vmem:[#allocation11 + $0x280] sm:$0xff] }
 0x3ef   : > { %4590 = vmatpush3.msra.mxu0 %v3962_v13  ;;  %3845 = vmatpush2.msra.mxu1 %v2533_v48  ;;  %v3950_v13 = vld [vmem:[#allocation11 + $0x1e8] sm:$0xff]  ;;  %v3876_v43 = vmax.f32 %v3249_v59, 0.0  ;;  %v3949_v48 = vld [vmem:[#allocation11 + $0x1e0] sm:$0xff]  ;;  %v4000_v59 = vld [vmem:[#allocation11 + $0x378] sm:$0xff] }
 0x3f0   : > { %4591 = vmatprep.subr.mxu0 %v3977_v0  ;;  %3846 = vmatprep.subr.mxu1 %v2526_v26  ;;  %v3953_v0 = vld [vmem:[#allocation11 + $0x200] sm:$0xff] }
 0x3f1   : > { %4592 = vmatpush3.msra.mxu0 %v3961_v4  ;;  %3847 = vmatpush2.msra.mxu1 %v2525_v1  ;;  %v3933_v26 = vld [vmem:[#allocation11 + $0x160] sm:$0xff]  ;;  %v3932_v4 = vld [vmem:[#allocation11 + $0x158] sm:$0xff]  ;;  %v3931_v1 = vld [vmem:[#allocation11 + $0x150] sm:$0xff] }
 0x3f2   : > { %4593 = vmatprep.subr.mxu0 %v3976_v7  ;;  %3848 = vmatprep.subr.mxu1 %v2518_v9  ;;  %v3946_v7 = vld [vmem:[#allocation11 + $0x1c8] sm:$0xff] }
 0x3f3   : > { %4594 = vmatpush3.msra.mxu0 %v3960_v21  ;;  %3849 = vmatpush2.msra.mxu1 %v2517_v10  ;;  %v3930_v9 = vld [vmem:[#allocation11 + $0x148] sm:$0xff]  ;;  %v3945_v21 = vld [vmem:[#allocation11 + $0x1c0] sm:$0xff]  ;;  %v3944_v10 = vld [vmem:[#allocation11 + $0x1b8] sm:$0xff] }
 0x3f4   : > { %4595 = vmatprep.subr.mxu0 %v3975_v14  ;;  %3850 = vmatprep.subr.mxu1 %v2510_v22  ;;  %v2612_v14 = vrot.slane %v5503_v11, %v913_v61  ;;  %v3928_v22 = vld [vmem:[#allocation11 + $0x138] sm:$0xff]  ;;  %v3175_v61 = vpop.f32.mrf.mxu0 }
 0x3f5   : > { %4596 = vmatpush3.msra.mxu0 %v3959_v23  ;;  %3851 = vmatpush2.msra.mxu1 %v2509_v19  ;;  %v3943_v23 = vld [vmem:[#allocation11 + $0x1b0] sm:$0xff] }
 0x3f6   : > { %4597 = vmatprep.subr.mxu0 %v3974_v31  ;;  %3852 = vmatprep.subr.mxu1 %v2502_v40  ;;  %v3927_v19 = vld [vmem:[#allocation11 + $0x130] sm:$0xff]  ;;  %v3942_v31 = vld [vmem:[#allocation11 + $0x1a8] sm:$0xff]  ;;  %v3016_v40 = vadd.f32 %v5538_v24, %v2612_v14  ;;  %v3022_v5 = vadd.f32 %v5542_v27, %v2612_v14  ;;  %v3924_v24 = vld [vmem:[#allocation11 + $0x118] sm:$0xff] }
 0x3f7   : > { %4598 = vmatpush3.msra.mxu0 %v3958_v33  ;;  %3853 = vmatpush2.msra.mxu1 %v2501_v16  ;;  %v3926_v33 = vld [vmem:[#allocation11 + $0x128] sm:$0xff]  ;;  %v3024_v16 = vadd.f32 %v5551_v34, %v5549_v17 }
 0x3f8   : > { %4599 = vmatprep.subr.mxu0 %v3973_v36  ;;  %3854 = vmatprep.subr.mxu1 %v2494_v42  ;;  %v3941_v36 = vld [vmem:[#allocation11 + $0x1a0] sm:$0xff]  ;;  %v3093_v41 = vadd.f32 %v5540_v44, %v3016_v40  ;;  %v3252_v42 = vpop.f32.mrf.mxu1  ;;  %v3099_v34 = vadd.f32 %v5544_v25, %v3022_v5  ;;  %v4006_v5 = vld [vmem:[#allocation11 + $0x3a8] sm:$0xff] }
 0x3f9   : > { %4600 = vmatpush3.msra.mxu0 %v3957_v45  ;;  %3855 = vmatpush2.msra.mxu1 %v2493_v18  ;;  %v3925_v45 = vld [vmem:[#allocation11 + $0x120] sm:$0xff]  ;;  %v3101_v18 = vadd.f32 %v5553_v37, %v3024_v16  ;;  %v3992_v16 = vld [vmem:[#allocation11 + $0x338] sm:$0xff] }
 0x3fa   : > { %4601 = vmatprep.subr.mxu0 %v3972_v49  ;;  %3856 = vmatprep.subr.mxu1 %v2486_v15  ;;  %v3940_v49 = vld [vmem:[#allocation11 + $0x198] sm:$0xff]  ;;  %v3939_v15 = vld [vmem:[#allocation11 + $0x190] sm:$0xff]  ;;  %v3170_v17 = vadd.f32 %v5556_v46, %v3093_v41  ;;  %v3254_v44 = vpop.f32.mrf.mxu1  ;;  %v3176_v56 = vadd.f32 %v3175_v61, %v3099_v34 }
 0x3fb   : > { %4602 = vmatpush3.msra.mxu0 %v3956_v53  ;;  %3857 = vmatpush2.msra.mxu1 %v2485_v51  ;;  %v3177_v53 = vpop.f32.mrf.mxu0  ;;  %v3923_v51 = vld [vmem:[#allocation11 + $0x110] sm:$0xff] }
 0x3fc   : > { %4603 = vmatprep.subr.mxu0 %v3971_v54  ;;  %3858 = vmatprep.subr.mxu1 %v2478_v20  ;;  %v3178_v54 = vadd.f32 %v3177_v53, %v3101_v18  ;;  %v3938_v20 = vld [vmem:[#allocation11 + $0x188] sm:$0xff]  ;;  %v3247_v37 = vadd.f32 %v5558_v47, %v3170_v17  ;;  %v3253_v25 = vadd.f32 %v3252_v42, %v3176_v56  ;;  %v4016_v47 = vld [vmem:[#allocation11 + $0x3f8] sm:$0xff] }
 0x3fd   : > { %4604 = vmatpush3.msra.mxu0 %v3955_v55  ;;  %3859 = vmatpush2.msra.mxu1 %v2477_v39  ;;  %v3922_v55 = vld [vmem:[#allocation11 + $0x108] sm:$0xff]  ;;  %v3921_v39 = vld [vmem:[#allocation11 + $0x100] sm:$0xff] }
 0x3fe   : > { %4605 = vmatprep.subr.mxu0 %v3970_v30  ;;  %3861 = vmatmul.mubr.f32.vlgmr.msra.gmra.mxu1 %v5450_v35  ;;  %v3948_v35 = vld [vmem:[#allocation11 + $0x1d8] sm:$0xff]  ;;  %v3255_v27 = vadd.f32 %v3254_v44, %v3178_v54  ;;  %v3875_v46 = vmax.f32 %v3247_v37, 0.0  ;;  %v3883_v28 = vmax.f32 %v3253_v25, 0.0  ;;  %v3990_v53 = vld [vmem:[#allocation11 + $0x328] sm:$0xff]  ;;  %v4005_v54 = vld [vmem:[#allocation11 + $0x3a0] sm:$0xff] }
 0x3ff   : > { %4539 = vmatprep.subr.mxu1 %v3952_v29  ;;  %3866 = vmatprep.mubr.f32.mxu1 %v5457_v8  ;;  %v3947_v8 = vld [vmem:[#allocation11 + $0x1d0] sm:$0xff]  ;;  %v3323_v29 = vpop.f32.mrf.mxu0 }
 0x400   : > { %4540 = vmatpush3.msra.mxu1 %v3936_v57  ;;  %4606 = vmatpush3.msra.mxu0 %v3954_v60  ;;  %v3884_v30 = vmax.f32 %v3255_v27, 0.0  ;;  %v3999_v60 = vld [vmem:[#allocation11 + $0x370] sm:$0xff] }
 0x401   : > { %4541 = vmatprep.subr.mxu1 %v3951_v58  ;;  %4607 = vmatprep.subr.mxu0 %v3969_v62  ;;  %v3325_v57 = vpop.f32.mrf.mxu0  ;;  %v4015_v58 = vld [vmem:[#allocation11 + $0x3f0] sm:$0xff]  ;;  %v3400_v62 = vpop.f32.mrf.mxu1 }
 0x402   : > { %4542 = vmatpush3.msra.mxu1 %v3935_v12  ;;  %4608 = vmatpush3.msra.mxu0 %v3953_v0  ;;  %v4014_v12 = vld [vmem:[#allocation11 + $0x3e8] sm:$0xff]  ;;  %v4012_v0 = vld [vmem:[#allocation11 + $0x3d8] sm:$0xff] }
 0x403   : > { %3867 = vmatmul.mubr.f32.gmra.mxu1 %v5455_v2  ;;  %4543 = vmatprep.subr.mxu1 %v3950_v13  ;;  %v3929_v2 = vld [vmem:[#allocation11 + $0x140] sm:$0xff]  ;;  %v3998_v13 = vld [vmem:[#allocation11 + $0x368] sm:$0xff] }
 0x404   : > { %4544 = vmatpush3.msra.mxu1 %v3934_v3  ;;  %4163 = vmatprep.mubr.f32.mxu1 %v3876_v43  ;;  %v4013_v3 = vld [vmem:[#allocation11 + $0x3e0] sm:$0xff]  ;;  %v3329_v43 = vpop.f32.mrf.mxu0 }
 0x405   : > { %4545 = vmatprep.subr.mxu1 %v3949_v48  ;;  %v3997_v48 = vld [vmem:[#allocation11 + $0x360] sm:$0xff] }
 0x406   : > { %4546 = vmatpush3.msra.mxu1 %v3933_v26  ;;  %v2620_v26 = vrot.slane %v5503_v11, %v921_v32 }
 0x407   : > { %4547 = vmatprep.subr.mxu1 %v3948_v35  ;;  %v3402_v35 = vpop.f32.mrf.mxu1 }
 0x408   : > { %4548 = vmatpush3.msra.mxu1 %v3932_v4  ;;  %v3996_v4 = vld [vmem:[#allocation11 + $0x358] sm:$0xff]  ;;  %v3330_v41 = vadd.f32 %v3329_v43, %v2620_v26 }
 0x409   : > { %4549 = vmatprep.subr.mxu1 %v3947_v8  ;;  %v2624_v8 = vrot.slane %v5503_v11, %v925_v38  ;;  %v3406_v14 = vpop.f32.mrf.mxu1  ;;  %v4008_v38 = vld [vmem:[#allocation11 + $0x3b8] sm:$0xff] }
 0x40a   : > { %4550 = vmatpush3.msra.mxu1 %v3931_v1  ;;  %v4011_v1 = vld [vmem:[#allocation11 + $0x3d0] sm:$0xff] }
 0x40b   : > { %4551 = vmatprep.subr.mxu1 %v3946_v7  ;;  %v3331_v7 = vpop.f32.mrf.mxu0  ;;  %v3326_v32 = vadd.f32 %v3325_v57, %v2624_v8  ;;  %v3987_v57 = vld [vmem:[#allocation11 + $0x310] sm:$0xff] }
 0x40c   : > { %4552 = vmatpush3.msra.mxu1 %v3930_v9  ;;  %v3995_v9 = vld [vmem:[#allocation11 + $0x350] sm:$0xff]  ;;  %v3332_v18 = vadd.f32 %v3331_v7, %v2624_v8 }
 0x40d   : > { %4553 = vmatprep.subr.mxu1 %v3945_v21  ;;  %v4010_v21 = vld [vmem:[#allocation11 + $0x3c8] sm:$0xff]  ;;  %v3403_v40 = vadd.f32 %v3402_v35, %v3326_v32 }
 0x40e   : > { %4554 = vmatpush3.msra.mxu1 %v3929_v2  ;;  %v3324_v2 = vadd.f32 %v3323_v29, %v2620_v26  ;;  %v4777_v26 = vld [vmem:[#allocation10] sm:$0xff] }
 0x40f   : > { %4555 = vmatprep.subr.mxu1 %v3944_v10  ;;  %v3477_v10 = vpop.f32.mrf.mxu0  ;;  %v2628_v35 = vrot.slane %v4777_v26, %v929_v50 }
 0x410   : > { %4556 = vmatpush3.msra.mxu1 %v3928_v22  ;;  %v3994_v22 = vld [vmem:[#allocation11 + $0x348] sm:$0xff] }
 0x411   : > { %4557 = vmatprep.subr.mxu1 %v3943_v23  ;;  %v4009_v23 = vld [vmem:[#allocation11 + $0x3c0] sm:$0xff]  ;;  %v3479_v11 = vpop.f32.mrf.mxu0 }
 0x412   : > { %4558 = vmatpush3.msra.mxu1 %v3927_v19  ;;  %v3401_v19 = vadd.f32 %v3400_v62, %v3324_v2  ;;  %v4001_v62 = vld [vmem:[#allocation11 + $0x380] sm:$0xff] }
 0x413   : > { %4559 = vmatprep.subr.mxu1 %v3942_v31  ;;  %v3993_v31 = vld [vmem:[#allocation11 + $0x340] sm:$0xff] }
 0x414   : > { %4560 = vmatpush3.msra.mxu1 %v3926_v33  ;;  %v3408_v33 = vpop.f32.mrf.mxu1  ;;  %v3478_v61 = vadd.f32 %v3477_v10, %v3401_v19 }
 0x415   : > { %4561 = vmatprep.subr.mxu1 %v3941_v36  ;;  %v4007_v36 = vld [vmem:[#allocation11 + $0x3b0] sm:$0xff]  ;;  %v3409_v44 = vadd.f32 %v3408_v33, %v3332_v18 }
 0x416   : > { %4562 = vmatpush3.msra.mxu1 %v3925_v45  ;;  %v3991_v45 = vld [vmem:[#allocation11 + $0x330] sm:$0xff] }
 0x417   : > { %4563 = vmatprep.subr.mxu1 %v3940_v49  ;;  %v3480_v49 = vadd.f32 %v3479_v11, %v3403_v40 }
 0x418   : > { %4564 = vmatpush3.msra.mxu1 %v3924_v24  ;;  %v3407_v24 = vadd.f32 %v3406_v14, %v3330_v41 }
 0x419   : > { %4565 = vmatprep.subr.mxu1 %v3939_v15  ;;  %v3483_v15 = vpop.f32.mrf.mxu0 }
 0x41a   : > { %4566 = vmatpush3.msra.mxu1 %v3923_v51 }
 0x41b   : > { %4567 = vmatprep.subr.mxu1 %v3938_v20  ;;  %v3989_v20 = vld [vmem:[#allocation11 + $0x320] sm:$0xff]  ;;  %v3485_v27 = vpop.f32.mrf.mxu0 }
 0x41c   : > { %4568 = vmatpush3.msra.mxu1 %v3922_v55  ;;  %v3484_v55 = vadd.f32 %v3483_v15, %v3407_v24 }
 0x41d   : > { %4569 = vmatprep.subr.mxu1 %v3937_v63 }
 0x41e   : > { %4570 = vmatpush3.msra.mxu1 %v3921_v39  ;;  %v3486_v39 = vadd.f32 %v3485_v27, %v3409_v44 }
 0x41f   : > { %4164 = vmatmul.mubr.f32.vlgmr.msra.gmra.mxu1 %v3875_v46  ;;  %4615 = vmatprep.subr.mxu1 %v4016_v47  ;;  %v4004_v46 = vld [vmem:[#allocation11 + $0x398] sm:$0xff]  ;;  %v4003_v47 = vld [vmem:[#allocation11 + $0x390] sm:$0xff] }
 0x420   : > { %4168 = vmatprep.mubr.f32.mxu1 %v3884_v30  ;;  %4616 = vmatpush3.msra.mxu1 %v4000_v59 }
 0x421   : > { %4617 = vmatprep.subr.mxu1 %v4015_v58  ;;  %v4002_v58 = vld [vmem:[#allocation11 + $0x388] sm:$0xff] }
 0x422   : > { %4618 = vmatpush3.msra.mxu1 %v3999_v60 }
 0x423   : > { %4169 = vmatmul.mubr.f32.gmra.mxu1 %v3883_v28  ;;  %4619 = vmatprep.subr.mxu1 %v4014_v12  ;;  %v3988_v28 = vld [vmem:[#allocation11 + $0x318] sm:$0xff]  ;;  %v3986_v12 = vld [vmem:[#allocation11 + $0x308] sm:$0xff] }
 0x424   : > { %4620 = vmatpush3.msra.mxu1 %v3998_v13  ;;  %v3985_v13 = vld [vmem:[#allocation11 + $0x300] sm:$0xff] }
 0x425   : > { %4621 = vmatprep.subr.mxu1 %v4013_v3 }
 0x426   : > { %4622 = vmatpush3.msra.mxu1 %v3997_v48 }
 0x427   : > { %4623 = vmatprep.subr.mxu1 %v4012_v0 }
 0x428   : > { %4624 = vmatpush3.msra.mxu1 %v3996_v4 }
 0x429   : > { %4625 = vmatprep.subr.mxu1 %v4011_v1  ;;  %v2632_v1 = vrot.slane %v4777_v26, %v933_v52 }
 0x42a   : > { %4626 = vmatpush3.msra.mxu1 %v3995_v9 }
 0x42b   : > { %4627 = vmatprep.subr.mxu1 %v4010_v21 }
 0x42c   : > { %4628 = vmatpush3.msra.mxu1 %v3994_v22 }
 0x42d   : > { %4629 = vmatprep.subr.mxu1 %v4009_v23 }
 0x42e   : > { %4630 = vmatpush3.msra.mxu1 %v3993_v31 }
 0x42f   : > { %4631 = vmatprep.subr.mxu1 %v4008_v38 }
 0x430   : > { %4632 = vmatpush3.msra.mxu1 %v3992_v16 }
 0x431   : > { %4633 = vmatprep.subr.mxu1 %v4007_v36 }
 0x432   : > { %4634 = vmatpush3.msra.mxu1 %v3991_v45 }
 0x433   : > { %4635 = vmatprep.subr.mxu1 %v4006_v5 }
 0x434   : > { %4636 = vmatpush3.msra.mxu1 %v3990_v53 }
 0x435   : > { %4637 = vmatprep.subr.mxu1 %v4005_v54 }
 0x436   : > { %v3554_v42 = vpop.f32.mrf.mxu1  ;;  %4638 = vmatpush3.msra.mxu1 %v3989_v20 }
 0x437   : > { %v3555_v17 = vadd.f32 %v3554_v42, %v3478_v61  ;;  %4639 = vmatprep.subr.mxu1 %v4004_v46  ;;  %v3631_v3 = vpop.f32.mrf.mxu0 }
 0x438   : > { %v3556_v34 = vpop.f32.mrf.mxu1  ;;  %4640 = vmatpush3.msra.mxu1 %v3988_v28  ;;  %v3632_v9 = vadd.f32 %v3631_v3, %v2628_v35 }
 0x439   : > { %v3557_v51 = vadd.f32 %v3556_v34, %v3480_v49  ;;  %v3877_v63 = vmax.f32 %v3555_v17, 0.0  ;;  %4641 = vmatprep.subr.mxu1 %v4003_v47  ;;  %v3633_v43 = vpop.f32.mrf.mxu0 }
 0x43a   : > { %4642 = vmatpush3.msra.mxu1 %v3987_v57  ;;  %v3634_v2 = vadd.f32 %v3633_v43, %v2632_v1 }
 0x43b   : > { %v3878_v37 = vmax.f32 %v3557_v51, 0.0  ;;  %4643 = vmatprep.subr.mxu1 %v4002_v58 }
 0x43c   : > { %v3560_v56 = vpop.f32.mrf.mxu1  ;;  %4644 = vmatpush3.msra.mxu1 %v3986_v12 }
 0x43d   : > { %4238 = vmatprep.mubr.f32.mxu0 %v3878_v37  ;;  %v3561_v25 = vadd.f32 %v3560_v56, %v3484_v55  ;;  %4645 = vmatprep.subr.mxu1 %v4001_v62  ;;  %v3637_v48 = vpop.f32.mrf.mxu0  ;;  %v4492_v56 = vld [vmem:[#allocation13] ss:$0 sm:$0xff] }
 0x43e   : > { %v3562_v30 = vpop.f32.mrf.mxu1  ;;  %4239 = vmatmul.mubr.f32.vlgmr.msra.gmra.mxu0 %v3877_v63  ;;  %4646 = vmatpush3.msra.mxu1 %v3985_v13  ;;  %v3638_v32 = vadd.f32 %v3637_v48, %v2628_v35 }
 0x43f   : > { %v3563_v29 = vadd.f32 %v3562_v30, %v3486_v39  ;;  %v3885_v60 = vmax.f32 %v3561_v25, 0.0  ;;  %v3639_v4 = vpop.f32.mrf.mxu0 }
 0x440   : > { %v3640_v19 = vadd.f32 %v3639_v4, %v2632_v1 }
 0x441   : > { %v3886_v59 = vmax.f32 %v3563_v29, 0.0 }
 0x443   : > { %4243 = vmatprep.mubr.f32.mxu0 %v3886_v59 }
 0x444   : > { %4244 = vmatmul.mubr.f32.gmra.mxu0 %v3885_v60 }
 0x47a   : > { %v3708_v0 = vpop.f32.mrf.mxu1 }
 0x47b   : > { %v3785_v7 = vpop.f32.mrf.mxu0  ;;  %v3709_v10 = vadd.f32 %v3708_v0, %v3632_v9 }
 0x47c   : > { %v3710_v8 = vpop.f32.mrf.mxu1 }
 0x47d   : > { %v3787_v14 = vpop.f32.mrf.mxu0  ;;  %v3711_v22 = vadd.f32 %v3710_v8, %v3634_v2  ;;  %v3786_v31 = vadd.f32 %v3785_v7, %v3709_v10 }
 0x47f   : > { %v3788_v50 = vadd.f32 %v3787_v14, %v3711_v22 }
 0x480   : > { %v3714_v21 = vpop.f32.mrf.mxu1 }
 0x481   : > { %v3715_v40 = vadd.f32 %v3714_v21, %v3638_v32  ;;  %v3791_v38 = vpop.f32.mrf.mxu0 }
 0x482   : > { %v3716_v23 = vpop.f32.mrf.mxu1 }
 0x483   : > { %v3717_v33 = vadd.f32 %v3716_v23, %v3640_v19  ;;  %v3792_v52 = vadd.f32 %v3791_v38, %v3715_v40  ;;  %v3793_v41 = vpop.f32.mrf.mxu0 }
 0x485   : > { %v3794_v42 = vadd.f32 %v3793_v41, %v3717_v33 }
 0x49f   : > { %v4533_v34 = vpop.f32.mrf.mxu0 }
 0x4a1   : > { %v4534_v53 = vpop.f32.mrf.mxu0 }
 0x4a2   : > { %v4535_v63 = vadd.f32 %v4534_v53, %v4533_v34 }
 0x4a3   : > { %v4536_v44 = vpop.f32.mrf.mxu0 }
 0x4a4   : > { %v4091_v30 = vadd.f32 %v4535_v63, %v4492_v56 }
 0x4a5   : > { %v4537_v51 = vpop.f32.mrf.mxu0 }
 0x4a6   : > { %v4538_v28 = vadd.f32 %v4537_v51, %v4536_v44 }
 0x4a8   : > { %v4096_v12 = vadd.f32 %v4538_v28, %v4492_v56 }
 0x4be   : > { %v3862_v11 = vpop.f32.mrf.mxu1 }
 0x4bf   : > { %v3863_v16 = vadd.f32 %v3862_v11, %v3786_v31 }
 0x4c0   : > { %v3864_v36 = vpop.f32.mrf.mxu1 }
 0x4c1   : > { %v3865_v6 = vadd.f32 %v3864_v36, %v3788_v50  ;;  %v3879_v18 = vmax.f32 %v3863_v16, 0.0 }
 0x4c3   : > { %v3868_v61 = vpop.f32.mrf.mxu1  ;;  %v3880_v45 = vmax.f32 %v3865_v6, 0.0 }
 0x4c4   : > { %v3869_v49 = vadd.f32 %v3868_v61, %v3792_v52 }
 0x4c5   : > { %v3870_v5 = vpop.f32.mrf.mxu1  ;;  %4313 = vmatprep.mubr.f32.mxu1 %v3880_v45 }
 0x4c6   : > { %v3871_v24 = vadd.f32 %v3870_v5, %v3794_v42  ;;  %4314 = vmatmul.mubr.f32.vlgmr.msra.gmra.mxu1 %v3879_v18  ;;  %v3887_v17 = vmax.f32 %v3869_v49, 0.0 }
 0x4c8   : > { %v3888_v15 = vmax.f32 %v3871_v24, 0.0 }
 0x4ca   : > { %4318 = vmatprep.mubr.f32.mxu1 %v3888_v15 }
 0x4cb   : > { %4319 = vmatmul.mubr.f32.gmra.mxu1 %v3887_v17 }
 0x4df   : > { %v4571_v54 = vpop.f32.mrf.mxu1 }
 0x4e1   : > { %v4572_v37 = vpop.f32.mrf.mxu1 }
 0x4e2   : > { %v4573_v46 = vadd.f32 %v4572_v37, %v4571_v54 }
 0x4e3   : > { %v4574_v27 = vpop.f32.mrf.mxu1 }
 0x4e4   : > { %v4166_v59 = vadd.f32 %v4573_v46, %v4091_v30 }
 0x4e5   : > { %v4575_v25 = vpop.f32.mrf.mxu1 }
 0x4e6   : > { %v4576_v58 = vadd.f32 %v4575_v25, %v4574_v27 }
 0x4e8   : > { %v4171_v48 = vadd.f32 %v4576_v58, %v4096_v12 }
 0x4fe   : > { %v4609_v20 = vpop.f32.mrf.mxu0 }
 0x500   : > { %v4610_v55 = vpop.f32.mrf.mxu0 }
 0x501   : > { %v4611_v29 = vadd.f32 %v4610_v55, %v4609_v20 }
 0x503   : > { %v4241_v62 = vadd.f32 %v4611_v29, %v4166_v59 }
 0x504   : > { %v4612_v39 = vpop.f32.mrf.mxu0 }
 0x506   : > { %v4613_v47 = vpop.f32.mrf.mxu0 }
 0x507   : > { %v4614_v13 = vadd.f32 %v4613_v47, %v4612_v39 }
 0x509   : > { %v4246_v35 = vadd.f32 %v4614_v13, %v4171_v48 }
 0x586   : > { %v4647_v57 = vpop.f32.mrf.mxu1 }
 0x588   : > { %v4648_v60 = vpop.f32.mrf.mxu1 }
 0x589   : > { %v4649_v3 = vadd.f32 %v4648_v60, %v4647_v57 }
 0x58b   : > { %v4650_v43 = vpop.f32.mrf.mxu1  ;;  %v4316_v0 = vadd.f32 %v4649_v3, %v4241_v62 }
 0x58d   : > { %v4651_v26 = vpop.f32.mrf.mxu1  ;;  %4324 = vst [vmem:[%s378_s19] sm:$0xff] %v4316_v0 }
 0x58e   : > { %v4652_v4 = vadd.f32 %v4651_v26, %v4650_v43 }
 0x590   : > { %v4321_v8 = vadd.f32 %v4652_v4, %v4246_v35 }
 0x592   : > { %4325 = vst [vmem:[%s378_s19 + $0x8] sm:$0xff] %v4321_v8 }
 0x593   : > { %4975 = shalt.err (!%p4972_p6)
}
 0x594   : > { %s4976_s1 = scalar_lea.hbm %s5592_s18, 256  ;;  %s4980_s8 = scalar_lea.hbm %s5642_s7, 512 }
 0x595   : > { %p4977_p5 = scmp.ne.s32.totalorder %s5592_s18, %s4976_s1  ;;  %p4981_p9 = scmp.lt.s32.totalorder %s5592_s18, %s5642_s7 }
 0x596   : > { %p4982_p10 = scmp.lt.s32.totalorder %s4980_s8, %s4976_s1 }
 0x597   : > { %p4978_p8 = pnand %p4977_p5, %p5666_p13 }
 0x598   : > { %p4983_p11 = por %p4982_p10, %p4981_p9 }
 0x599   : > { %p4979_p1 = pneg %p4978_p8 }
 0x59b   : > { %p4984_p12 = pnand %p4983_p11, %p4979_p1 }
 0x59d   : > { %4987 = shalt.err (!%p4984_p12)
}
 0x59e   : > { %s5054_s14 = smov 128   ;;  %s5055_s15 = smov 8  }
 0x59f   : > { %4679 = dma.vmem_to_hbm [thread:$0]  (%p5666_p13), %s5587_s9, 256, %s5592_s18, %s4327_s20, %s5054_s14, %s5054_s14, %s5055_s15  }
 0x5a0 PF: > { %s4355_s23 = sand.u32 1, %s5026_s24   ;;  %p5667_p0 = scmp.ne.s32.totalorder %s5656_s21, 0 }
 0x5a1   : > { %p5668_p2 = scmp.ge.s32.totalorder %s5038_s27, 2  ;;  %s4356_s30 = scalar_lea.sflag [#allocation4], %s4355_s23 }
 0x5a3   : > { %p4705_p3 = pnand %p5668_p2, %p5667_p0 }
 0x5a5   : > { %p4706_p7 = pneg %p4705_p3 }
 0x5a7   : > { %5021 = dma.done.wait (%p4706_p7), %s4356_s30, 256  }
 0x5a8   : > { %5023 = vsyncadd (%p4706_p7), %s4356_s30, 4294967040  ;;  %p23_p4 = scmp.ge.s32.totalorder %s5199_s11, 4   ;;  %s5669_s24 = smov %s5030_s25 }
 0x5a9   : > { %s5670_s25 = smov %s5034_s26  ;;  %s5671_s26 = smov %s5210_s17 }
 0x5aa   : > { %s5672_s27 = smov %s5199_s11  ;;  %25 = sbr.rel (!%p23_p4) target bundleno = 10 (0xa), region = 117 }
 0x5af   :  { %4361 = vsyncpa [#allocation3], 1 }
 0x5b0   :  { %4363 = vsyncpa [#allocation3 + $0x1], 1 }
 0x5b1   :  { %4364 = vsyncpa [#allocation6], 1 }
 0x5b2   :  { %4365 = vsyncpa [#allocation9], 1 }
 0x5b3   :  { %4366 = vsyncpa [#allocation12], 1 }
 0x5b4   :  { %4367 = vsyncpa [#allocation4], 1 }
 0x5b5   :  { %4369 = vsyncpa [#allocation4 + $0x1], 1 }

</bundles_post_ra>
